<compile_context>
chip_gen: v7x
topology: tpu7x:2x2x1
jax: 0.10.0
libtpu: 0.0.40
codegen_flags: <defaults>
</compile_context>

<pallas_src>
import functools

import jax
import jax.numpy as jnp
from jax.experimental import pallas as pl
from jax.experimental.pallas import tpu as pltpu

NEG_SLOPE = 0.2
BN_EPS = 1e-5
LANE = 128
SUBLANE = 8
VMEM_LIMIT = 48 * 1024 * 1024        # requested scoped VMEM (< v7x 64 MiB physical)
VMEM_TILE_BUDGET = 32 * 1024 * 1024  # budget used to size the batch tile
MAX_TILE_N = 1024


def _round_up(v, m):
    return ((v + m - 1) // m) * m


def _cdiv(a, b):
    return -(-a // b)


def _pad2(a, rows, cols):
    return jnp.pad(a, ((0, rows - a.shape[0]), (0, cols - a.shape[1])))


def _pick_tiles(n, per_row_bytes, max_tile_n):
    """Largest batch tile keeping double-buffered tiles inside the VMEM budget,
    with padding waste bounded by ~SUBLANE rows per tile."""
    cap = VMEM_TILE_BUDGET // max(per_row_bytes, 1)
    cap = max(SUBLANE, min(max_tile_n, cap))
    num_tiles = max(1, _cdiv(n, cap))
    tile_n = _round_up(_cdiv(n, num_tiles), SUBLANE)
    return num_tiles, tile_n, num_tiles * tile_n


# --------------------------------------------------------------------------
# Kernel 1: per-tile BN partial statistics over the batch axis ("parallel").
# Padded batch rows of x are zero -> no row mask needed; wrapper divides by
# the true batch size.
# --------------------------------------------------------------------------
def _bn_stats_kernel(x_ref, part_ref):
    x = x_ref[...].astype(jnp.float32)
    s = jnp.sum(x, axis=0, keepdims=True)
    ssq = jnp.sum(x * x, axis=0, keepdims=True)
    part_ref[...] = jnp.concatenate([s, ssq], axis=0)[None]


def _bn_partials(x, *, num_tiles, tile_n):
    n_pad, c = x.shape
    return pl.pallas_call(
        _bn_stats_kernel,
        out_shape=jax.ShapeDtypeStruct((num_tiles, 2, c), jnp.float32),
        grid=(num_tiles,),
        in_specs=[pl.BlockSpec((tile_n, c), lambda i: (i, 0))],
        out_specs=pl.BlockSpec((1, 2, c), lambda i: (i, 0, 0)),
        compiler_params=pltpu.CompilerParams(
            dimension_semantics=("parallel",),
            vmem_limit_bytes=VMEM_LIMIT),
        cost_estimate=pl.CostEstimate(
            flops=3 * n_pad * c,
            transcendentals=0,
            bytes_accessed=n_pad * c * x.dtype.itemsize + num_tiles * 2 * c * 4),
    )(x)


def _finalize_bn(partials, gamma, beta, n_true):
    """Tiny final reduce of the per-tile partials (plain JAX): emits per-channel
    scale = gamma*rsqrt(var+eps) and shift = beta - mean*scale."""
    s = jnp.sum(partials[:, 0, :], axis=0)
    ssq = jnp.sum(partials[:, 1, :], axis=0)
    inv_n = jnp.float32(1.0 / n_true)
    mean = s * inv_n
    var = jnp.maximum(ssq * inv_n - mean * mean, 0.0)
    scale = gamma.reshape(-1) * jax.lax.rsqrt(var + BN_EPS)
    shift = beta.reshape(-1) - mean * scale
    return scale.reshape(1, -1), shift.reshape(1, -1)


# --------------------------------------------------------------------------
# Kernel 2: fused BN1-apply -> LeakyReLU -> Linear1 (MXU) + BN2 partial stats
# of the freshly computed f32 h (mask padded batch rows: they are non-zero).
# --------------------------------------------------------------------------
def _stage1_kernel(x_ref, scale_ref, shift_ref, w_ref, b_ref,
                   h_ref, part_ref, *, n_true, tile_n, precision):
    x = x_ref[...].astype(jnp.float32)
    x = x * scale_ref[...] + shift_ref[...]           # BN apply (single FMA)
    x = jnp.where(x >= 0, x, NEG_SLOPE * x)           # LeakyReLU(0.2)
    # Dropout(p=0.0) == identity.
    h = jnp.dot(x.astype(w_ref.dtype), w_ref[...],
                precision=precision,
                preferred_element_type=jnp.float32) + b_ref[...]
    h_ref[...] = h.astype(h_ref.dtype)

    row = (pl.program_id(0) * tile_n
           + jax.lax.broadcasted_iota(jnp.int32, h.shape, 0))
    hm = jnp.where(row < n_true, h, 0.0)
    s = jnp.sum(hm, axis=0, keepdims=True)
    ssq = jnp.sum(hm * hm, axis=0, keepdims=True)
    part_ref[...] = jnp.concatenate([s, ssq], axis=0)[None]


def _stage1(x, scale, shift, w, bias, *, num_tiles, tile_n, n_true,
            h_dtype, precision):
    n_pad, cin = x.shape
    cmid = w.shape[1]
    kernel = functools.partial(_stage1_kernel, n_true=n_true, tile_n=tile_n,
                               precision=precision)
    w_bytes = int(w.size) * w.dtype.itemsize
    h_bytes = jnp.dtype(h_dtype).itemsize
    return pl.pallas_call(
        kernel,
        out_shape=(jax.ShapeDtypeStruct((n_pad, cmid), h_dtype),
                   jax.ShapeDtypeStruct((num_tiles, 2, cmid), jnp.float32)),
        grid=(num_tiles,),
        in_specs=[pl.BlockSpec((tile_n, cin), lambda i: (i, 0)),
                  # constant index maps -> loaded once, VMEM-resident
                  pl.BlockSpec((1, cin), lambda i: (0, 0)),
                  pl.BlockSpec((1, cin), lambda i: (0, 0)),
                  pl.BlockSpec((cin, cmid), lambda i: (0, 0)),
                  pl.BlockSpec((1, cmid), lambda i: (0, 0))],
        out_specs=(pl.BlockSpec((tile_n, cmid), lambda i: (i, 0)),
                   pl.BlockSpec((1, 2, cmid), lambda i: (i, 0, 0))),
        compiler_params=pltpu.CompilerParams(
            dimension_semantics=("parallel",),        # megacore splits N tiles
            vmem_limit_bytes=VMEM_LIMIT),
        cost_estimate=pl.CostEstimate(
            flops=2 * n_pad * cin * cmid + 4 * n_pad * cin + 7 * n_pad * cmid,
            transcendentals=0,
            bytes_accessed=(n_pad * cin * x.dtype.itemsize + w_bytes
                            + n_pad * cmid * h_bytes
                            + num_tiles * 2 * cmid * 4)),
    )(x, scale, shift, w, bias)


# --------------------------------------------------------------------------
# Kernel 3: BN2-apply -> LeakyReLU -> Linear2 (MXU matmul + bias).
# --------------------------------------------------------------------------
def _stage2_kernel(h_ref, scale_ref, shift_ref, w_ref, b_ref, o_ref, *, precision):
    h = h_ref[...].astype(jnp.float32)
    h = h * scale_ref[...] + shift_ref[...]
    h = jnp.where(h >= 0, h, NEG_SLOPE * h)
    y = jnp.dot(h.astype(w_ref.dtype), w_ref[...],
                precision=precision,
                preferred_element_type=jnp.float32) + b_ref[...]
    o_ref[...] = y.astype(o_ref.dtype)


def _stage2(h, scale, shift, w, bias, *, num_tiles, tile_n, precision):
    n_pad, cmid = h.shape
    cout = w.shape[1]
    kernel = functools.partial(_stage2_kernel, precision=precision)
    w_bytes = int(w.size) * w.dtype.itemsize
    return pl.pallas_call(
        kernel,
        out_shape=jax.ShapeDtypeStruct((n_pad, cout), jnp.float32),
        grid=(num_tiles,),
        in_specs=[pl.BlockSpec((tile_n, cmid), lambda i: (i, 0)),
                  pl.BlockSpec((1, cmid), lambda i: (0, 0)),
                  pl.BlockSpec((1, cmid), lambda i: (0, 0)),
                  pl.BlockSpec((cmid, cout), lambda i: (0, 0)),
                  pl.BlockSpec((1, cout), lambda i: (0, 0))],
        out_specs=pl.BlockSpec((tile_n, cout), lambda i: (i, 0)),
        compiler_params=pltpu.CompilerParams(
            dimension_semantics=("parallel",),
            vmem_limit_bytes=VMEM_LIMIT),
        cost_estimate=pl.CostEstimate(
            flops=2 * n_pad * cmid * cout + 4 * n_pad * cmid,
            transcendentals=0,
            bytes_accessed=(n_pad * cmid * h.dtype.itemsize + w_bytes
                            + n_pad * cout * 4)),
    )(h, scale, shift, w, bias)


# --------------------------------------------------------------------------
# Wrapper: VMEM-aware tiling, minimal batch padding, lane-dense padded
# outputs, bf16 intermediate, two fused passes, final slice.
# --------------------------------------------------------------------------
@functools.partial(jax.jit, static_argnames=("matmul_dtype", "max_tile_n"))
def mlp_forward(x, params, *, matmul_dtype=jnp.bfloat16, max_tile_n=MAX_TILE_N):
    """x: (N, C_in) float32.  params: dict of MLP parameters (unpadded)."""
    n, in_c = x.shape
    mid_c = params["w1"].shape[1]
    out_c = params["w2"].shape[1]

    cmid_p = _round_up(mid_c, LANE)   # lane-dense matmul-1 output
    cout_p = _round_up(out_c, LANE)   # lane-dense matmul-2 output

    matmul_dtype = jnp.dtype(matmul_dtype)
    h_dtype = jnp.bfloat16 if matmul_dtype == jnp.bfloat16 else jnp.float32
    precision = (jax.lax.Precision.HIGHEST
                 if matmul_dtype == jnp.float32 else None)

    # Per-grid-step bytes (double-buffered input + output tiles) for the two
    # apply stages; pick one tile_n that fits the VMEM budget for both.
    h_bytes = jnp.dtype(h_dtype).itemsize
    per_row = max(2 * (in_c * 4 + cmid_p * h_bytes),     # stage 1
                  2 * (cmid_p * h_bytes + cout_p * 4))   # stage 2
    num_tiles, tile_n, n_pad = _pick_tiles(n, per_row, max_tile_n)

    # Only the batch axis of x is zero-padded (bounded by ~8 rows per tile);
    # the channel axis keeps its true width.
    xp = x.astype(jnp.float32)
    if n_pad != n:
        xp = jnp.pad(xp, ((0, n_pad - n), (0, 0)))

    # Parameter padding (zeros) keeps padded output channels exactly zero
    # through every stage, so the final slice is exact.
    w1 = _pad2(params["w1"], in_c, cmid_p).astype(matmul_dtype)
    c1 = _pad2(params["c1"], 1, cmid_p)
    g2 = _pad2(params["g2"], 1, cmid_p)
    b2 = _pad2(params["b2"], 1, cmid_p)
    w2 = _pad2(params["w2"], cmid_p, cout_p).astype(matmul_dtype)
    c2 = _pad2(params["c2"], 1, cout_p)

    # BN1 stats (parallel per-tile partials -> tiny JAX reduce).
    part1 = _bn_partials(xp, num_tiles=num_tiles, tile_n=tile_n)
    scale1, shift1 = _finalize_bn(part1, params["g1"], params["b1"], n)

    # BN1 apply -> LeakyReLU -> Linear1, BN2 partial stats fused in.
    h, part2 = _stage1(xp, scale1, shift1, w1, c1,
                       num_tiles=num_tiles, tile_n=tile_n, n_true=n,
                       h_dtype=h_dtype, precision=precision)
    scale2, shift2 = _finalize_bn(part2, g2, b2, n)

    # BN2 apply -> LeakyReLU -> Linear2.
    y = _stage2(h, scale2, shift2, w2, c2,
                num_tiles=num_tiles, tile_n=tile_n, precision=precision)
    return y[:n, :out_c]


# --------------------------------------------------------------------------
# Parameter init (PyTorch-like) and pure-JAX f32 reference.
# --------------------------------------------------------------------------
def init_params(key, in_c, mid_c, out_c):
    ks = jax.random.split(key, 6)
    scale1 = 1.0 / jnp.sqrt(in_c)
    scale2 = 1.0 / jnp.sqrt(mid_c)
    return {
        # BatchNorm1d(in_c): gamma, beta kept 2-D (1,C) for lane layout
        "g1": jnp.ones((1, in_c), jnp.float32) +
              0.05 * jax.random.normal(ks[0], (1, in_c), jnp.float32),
        "b1": 0.05 * jax.random.normal(ks[1], (1, in_c), jnp.float32),
        # Linear(in_c, mid_c): weight stored pre-transposed (in_c, mid_c)
        "w1": jax.random.uniform(ks[2], (in_c, mid_c), jnp.float32,
                                 -scale1, scale1),
        "c1": jax.random.uniform(ks[3], (1, mid_c), jnp.float32,
                                 -scale1, scale1),
        # BatchNorm1d(mid_c)
        "g2": jnp.ones((1, mid_c), jnp.float32),
        "b2": jnp.zeros((1, mid_c), jnp.float32),
        # Linear(mid_c, out_c) pre-transposed to (mid_c, out_c)
        "w2": jax.random.uniform(ks[4], (mid_c, out_c), jnp.float32,
                                 -scale2, scale2),
        "c2": jax.random.uniform(ks[5], (1, out_c), jnp.float32,
                                 -scale2, scale2),
    }


def mlp_reference(x, p):
    """Pure-JAX f32 reference mirroring the PyTorch forward (training-mode BN)."""
    def bn(v, g, b):
        mean = jnp.mean(v, axis=0, keepdims=True)
        var = jnp.mean((v - mean) ** 2, axis=0, keepdims=True)
        return (v - mean) * jax.lax.rsqrt(var + BN_EPS) * g + b

    def lrelu(v):
        return jnp.where(v >= 0, v, NEG_SLOPE * v)

    hp = jax.lax.Precision.HIGHEST
    h = jnp.dot(lrelu(bn(x, p["g1"], p["b1"])), p["w1"], precision=hp) + p["c1"]
    return jnp.dot(lrelu(bn(h, p["g2"], p["b2"])), p["w2"], precision=hp) + p["c2"]


if __name__ == "__main__":
    key = jax.random.PRNGKey(0)
    k_x, k_p = jax.random.split(key)

    # N=601 with max_tile_n=256 -> 3 parallel tiles of 208 rows (23 padded
    # rows), exercising the multi-tile path and the fused-stats row masking.
    N, in_c, mid_c, out_c = 601, 32, 64, 16
    x = jax.random.normal(k_x, (N, in_c), jnp.float32)
    params = init_params(k_p, in_c, mid_c, out_c)

    ref = mlp_reference(x, params)

    # f32 MXU path: tight algorithmic check (f32 intermediate, HIGHEST precision).
    out_f32 = jax.block_until_ready(
        mlp_forward(x, params, matmul_dtype=jnp.float32, max_tile_n=256))
    assert out_f32.shape == (N, out_c)
    assert jnp.allclose(out_f32, ref, atol=5e-4, rtol=5e-4), \
        "f32-path mismatch vs reference"

    # bf16 MXU path (production setting): bf16 matmul operands + bf16 h storage.
    out_bf16 = jax.block_until_ready(
        mlp_forward(x, params, matmul_dtype=jnp.bfloat16, max_tile_n=256))
    assert out_bf16.shape == (N, out_c)
    assert jnp.allclose(out_bf16, ref, atol=5e-2, rtol=5e-2), \
        "bf16-path mismatch vs reference"

    print("KERNEL_OK")
</pallas_src>

<mosaic_0001>
module attributes {stable_mosaic.version = 11 : i64} {
  func.func @_bn_stats_kernel(%arg0: i32, %arg1: memref<208x32xf32, #tpu.memory_space<vmem>>, %arg2: memref<1x2x32xf32, #tpu.memory_space<vmem>>) attributes {dimension_semantics = [#tpu.dimension_semantics<parallel>], iteration_bounds = array<i64: 3>, scalar_prefetch = 0 : i64, scratch_operands = 0 : i64, tpu.core_type = #tpu.core_type<tc>, window_params = [{transform_indices = @transform_0, window_bounds = array<i64: 208, 32>}, {transform_indices = @transform_1, window_bounds = array<i64: 1, 2, 32>}]} {
    %c0 = arith.constant 0 : index
    %c0_0 = arith.constant 0 : index
    %0 = vector.load %arg1[%c0, %c0_0] : memref<208x32xf32, #tpu.memory_space<vmem>>, vector<208x32xf32>
    %cst = arith.constant dense<0.000000e+00> : vector<32xf32>
    %1 = vector.multi_reduction <add>, %0, %cst [0] : vector<208x32xf32> to vector<32xf32>
    %2 = vector.shape_cast %1 : vector<32xf32> to vector<1x32xf32>
    %3 = arith.mulf %0, %0 : vector<208x32xf32>
    %cst_1 = arith.constant dense<0.000000e+00> : vector<32xf32>
    %4 = vector.multi_reduction <add>, %3, %cst_1 [0] : vector<208x32xf32> to vector<32xf32>
    %5 = vector.shape_cast %4 : vector<32xf32> to vector<1x32xf32>
    %6 = tpu.concatenate %2, %5 in 0 : vector<1x32xf32>, vector<1x32xf32> -> vector<2x32xf32>
    %7 = vector.shape_cast %6 : vector<2x32xf32> to vector<1x2x32xf32>
    %c0_2 = arith.constant 0 : index
    %c0_3 = arith.constant 0 : index
    %c0_4 = arith.constant 0 : index
    %8 = vector.load %arg2[%c0_2, %c0_3, %c0_4] : memref<1x2x32xf32, #tpu.memory_space<vmem>>, vector<1x2x32xf32>
    tpu.vector_store %arg2[%c0_2, %c0_3, %c0_4], %7 {strides = array<i32>} : memref<1x2x32xf32, #tpu.memory_space<vmem>>, vector<1x2x32xf32>,
    return
  }
  func.func @transform_0(%arg0: i32) -> (i32, i32) {
    %c0_i32 = arith.constant 0 : i32
    %c0_i32_0 = arith.constant 0 : i32
    return %arg0, %c0_i32 : i32, i32
  }
  func.func @transform_1(%arg0: i32) -> (i32, i32, i32) {
    %c0_i32 = arith.constant 0 : i32
    %c0_i32_0 = arith.constant 0 : i32
    %c0_i32_1 = arith.constant 0 : i32
    return %arg0, %c0_i32, %c0_i32_0 : i32, i32, i32
  }
}

module attributes {stable_mosaic.version = 11 : i64} {
  func.func @_stage1_kernel(%arg0: i32, %arg1: memref<208x32xf32, #tpu.memory_space<vmem>>, %arg2: memref<1x32xf32, #tpu.memory_space<vmem>>, %arg3: memref<1x32xf32, #tpu.memory_space<vmem>>, %arg4: memref<32x128xf32, #tpu.memory_space<vmem>>, %arg5: memref<1x128xf32, #tpu.memory_space<vmem>>, %arg6: memref<208x128xf32, #tpu.memory_space<vmem>>, %arg7: memref<1x2x128xf32, #tpu.memory_space<vmem>>) attributes {dimension_semantics = [#tpu.dimension_semantics<parallel>], iteration_bounds = array<i64: 3>, scalar_prefetch = 0 : i64, scratch_operands = 0 : i64, tpu.core_type = #tpu.core_type<tc>, window_params = [{transform_indices = @transform_0, window_bounds = array<i64: 208, 32>}, {pipeline_mode = #tpu.pipeline_mode<synchronous>, transform_indices = @transform_1, window_bounds = array<i64: 1, 32>}, {pipeline_mode = #tpu.pipeline_mode<synchronous>, transform_indices = @transform_2, window_bounds = array<i64: 1, 32>}, {pipeline_mode = #tpu.pipeline_mode<synchronous>, transform_indices = @transform_3, window_bounds = array<i64: 32, 128>}, {pipeline_mode = #tpu.pipeline_mode<synchronous>, transform_indices = @transform_4, window_bounds = array<i64: 1, 128>}, {transform_indices = @transform_5, window_bounds = array<i64: 208, 128>}, {transform_indices = @transform_6, window_bounds = array<i64: 1, 2, 128>}]} {
    %c0 = arith.constant 0 : index
    %c0_0 = arith.constant 0 : index
    %0 = vector.load %arg1[%c0, %c0_0] : memref<208x32xf32, #tpu.memory_space<vmem>>, vector<208x32xf32>
    %c0_1 = arith.constant 0 : index
    %c0_2 = arith.constant 0 : index
    %1 = vector.load %arg2[%c0_1, %c0_2] : memref<1x32xf32, #tpu.memory_space<vmem>>, vector<1x32xf32>
    %2 = vector.broadcast %1 : vector<1x32xf32> to vector<208x32xf32>
    %3 = arith.mulf %0, %2 : vector<208x32xf32>
    %c0_3 = arith.constant 0 : index
    %c0_4 = arith.constant 0 : index
    %4 = vector.load %arg3[%c0_3, %c0_4] : memref<1x32xf32, #tpu.memory_space<vmem>>, vector<1x32xf32>
    %5 = vector.broadcast %4 : vector<1x32xf32> to vector<208x32xf32>
    %6 = arith.addf %3, %5 : vector<208x32xf32>
    %cst = arith.constant 0.000000e+00 : f32
    %7 = vector.broadcast %cst : f32 to vector<208x32xf32>
    %8 = arith.cmpf oge, %6, %7 : vector<208x32xf32>
    %cst_5 = arith.constant 2.000000e-01 : f32
    %9 = vector.broadcast %cst_5 : f32 to vector<208x32xf32>
    %10 = arith.mulf %9, %6 : vector<208x32xf32>
    %11 = arith.select %8, %6, %10 : vector<208x32xi1>, vector<208x32xf32>
    %c0_6 = arith.constant 0 : index
    %c0_7 = arith.constant 0 : index
    %12 = vector.load %arg4[%c0_6, %c0_7] : memref<32x128xf32, #tpu.memory_space<vmem>>, vector<32x128xf32>
    %cst_8 = arith.constant dense<0.000000e+00> : vector<208x128xf32>
    %13 = tpu.matmul %11, %12, %cst_8 {dimension_numbers = #tpu.dot_dimension_numbers<[1], [0], [0], [1], [0, 0, 1, 1], [], []>, precision = #tpu.contract_precision<fp32>} : vector<208x32xf32>, vector<32x128xf32>, vector<208x128xf32> -> vector<208x128xf32>
    %c0_9 = arith.constant 0 : index
    %c0_10 = arith.constant 0 : index
    %14 = vector.load %arg5[%c0_9, %c0_10] : memref<1x128xf32, #tpu.memory_space<vmem>>, vector<1x128xf32>
    %15 = vector.broadcast %14 : vector<1x128xf32> to vector<208x128xf32>
    %16 = arith.addf %13, %15 : vector<208x128xf32>
    %c0_11 = arith.constant 0 : index
    %c0_12 = arith.constant 0 : index
    %17 = vector.load %arg6[%c0_11, %c0_12] : memref<208x128xf32, #tpu.memory_space<vmem>>, vector<208x128xf32>
    tpu.vector_store %arg6[%c0_11, %c0_12], %16 {strides = array<i32>} : memref<208x128xf32, #tpu.memory_space<vmem>>, vector<208x128xf32>,
    %c208_i32 = arith.constant 208 : i32
    %18 = arith.muli %arg0, %c208_i32 : i32
    %19 = tpu.iota {dimensions = array<i32: 0>} : vector<208x128xi32>
    %20 = vector.broadcast %18 : i32 to vector<208x128xi32>
    %21 = arith.addi %20, %19 : vector<208x128xi32>
    %c601_i32 = arith.constant 601 : i32
    %22 = vector.broadcast %c601_i32 : i32 to vector<208x128xi32>
    %23 = arith.cmpi slt, %21, %22 : vector<208x128xi32>
    %cst_13 = arith.constant 0.000000e+00 : f32
    %24 = vector.broadcast %cst_13 : f32 to vector<208x128xf32>
    %25 = arith.select %23, %16, %24 : vector<208x128xi1>, vector<208x128xf32>
    %cst_14 = arith.constant dense<0.000000e+00> : vector<128xf32>
    %26 = vector.multi_reduction <add>, %25, %cst_14 [0] : vector<208x128xf32> to vector<128xf32>
    %27 = vector.shape_cast %26 : vector<128xf32> to vector<1x128xf32>
    %28 = arith.mulf %25, %25 : vector<208x128xf32>
    %cst_15 = arith.constant dense<0.000000e+00> : vector<128xf32>
    %29 = vector.multi_reduction <add>, %28, %cst_15 [0] : vector<208x128xf32> to vector<128xf32>
    %30 = vector.shape_cast %29 : vector<128xf32> to vector<1x128xf32>
    %31 = tpu.concatenate %27, %30 in 0 : vector<1x128xf32>, vector<1x128xf32> -> vector<2x128xf32>
    %32 = vector.shape_cast %31 : vector<2x128xf32> to vector<1x2x128xf32>
    %c0_16 = arith.constant 0 : index
    %c0_17 = arith.constant 0 : index
    %c0_18 = arith.constant 0 : index
    %33 = vector.load %arg7[%c0_16, %c0_17, %c0_18] : memref<1x2x128xf32, #tpu.memory_space<vmem>>, vector<1x2x128xf32>
    tpu.vector_store %arg7[%c0_16, %c0_17, %c0_18], %32 {strides = array<i32>} : memref<1x2x128xf32, #tpu.memory_space<vmem>>, vector<1x2x128xf32>,
    return
  }
  func.func @transform_0(%arg0: i32) -> (i32, i32) {
    %c0_i32 = arith.constant 0 : i32
    %c0_i32_0 = arith.constant 0 : i32
    return %arg0, %c0_i32 : i32, i32
  }
  func.func @transform_1(%arg0: i32) -> (i32, i32) {
    %c0_i32 = arith.constant 0 : i32
    %c0_i32_0 = arith.constant 0 : i32
    %c0_i32_1 = arith.constant 0 : i32
    return %c0_i32, %c0_i32_0 : i32, i32
  }
  func.func @transform_2(%arg0: i32) -> (i32, i32) {
    %c0_i32 = arith.constant 0 : i32
    %c0_i32_0 = arith.constant 0 : i32
    %c0_i32_1 = arith.constant 0 : i32
    return %c0_i32, %c0_i32_0 : i32, i32
  }
  func.func @transform_3(%arg0: i32) -> (i32, i32) {
    %c0_i32 = arith.constant 0 : i32
    %c0_i32_0 = arith.constant 0 : i32
    %c0_i32_1 = arith.constant 0 : i32
    return %c0_i32, %c0_i32_0 : i32, i32
  }
  func.func @transform_4(%arg0: i32) -> (i32, i32) {
    %c0_i32 = arith.constant 0 : i32
    %c0_i32_0 = arith.constant 0 : i32
    %c0_i32_1 = arith.constant 0 : i32
    return %c0_i32, %c0_i32_0 : i32, i32
  }
  func.func @transform_5(%arg0: i32) -> (i32, i32) {
    %c0_i32 = arith.constant 0 : i32
    %c0_i32_0 = arith.constant 0 : i32
    return %arg0, %c0_i32 : i32, i32
  }
  func.func @transform_6(%arg0: i32) -> (i32, i32, i32) {
    %c0_i32 = arith.constant 0 : i32
    %c0_i32_0 = arith.constant 0 : i32
    %c0_i32_1 = arith.constant 0 : i32
    return %arg0, %c0_i32, %c0_i32_0 : i32, i32, i32
  }
}

module attributes {stable_mosaic.version = 11 : i64} {
  func.func @_stage2_kernel(%arg0: i32, %arg1: memref<208x128xf32, #tpu.memory_space<vmem>>, %arg2: memref<1x128xf32, #tpu.memory_space<vmem>>, %arg3: memref<1x128xf32, #tpu.memory_space<vmem>>, %arg4: memref<128x128xf32, #tpu.memory_space<vmem>>, %arg5: memref<1x128xf32, #tpu.memory_space<vmem>>, %arg6: memref<208x128xf32, #tpu.memory_space<vmem>>) attributes {dimension_semantics = [#tpu.dimension_semantics<parallel>], iteration_bounds = array<i64: 3>, scalar_prefetch = 0 : i64, scratch_operands = 0 : i64, tpu.core_type = #tpu.core_type<tc>, window_params = [{transform_indices = @transform_0, window_bounds = array<i64: 208, 128>}, {pipeline_mode = #tpu.pipeline_mode<synchronous>, transform_indices = @transform_1, window_bounds = array<i64: 1, 128>}, {pipeline_mode = #tpu.pipeline_mode<synchronous>, transform_indices = @transform_2, window_bounds = array<i64: 1, 128>}, {pipeline_mode = #tpu.pipeline_mode<synchronous>, transform_indices = @transform_3, window_bounds = array<i64: 128, 128>}, {pipeline_mode = #tpu.pipeline_mode<synchronous>, transform_indices = @transform_4, window_bounds = array<i64: 1, 128>}, {transform_indices = @transform_5, window_bounds = array<i64: 208, 128>}]} {
    %c0 = arith.constant 0 : index
    %c0_0 = arith.constant 0 : index
    %0 = vector.load %arg1[%c0, %c0_0] : memref<208x128xf32, #tpu.memory_space<vmem>>, vector<208x128xf32>
    %c0_1 = arith.constant 0 : index
    %c0_2 = arith.constant 0 : index
    %1 = vector.load %arg2[%c0_1, %c0_2] : memref<1x128xf32, #tpu.memory_space<vmem>>, vector<1x128xf32>
    %2 = vector.broadcast %1 : vector<1x128xf32> to vector<208x128xf32>
    %3 = arith.mulf %0, %2 : vector<208x128xf32>
    %c0_3 = arith.constant 0 : index
    %c0_4 = arith.constant 0 : index
    %4 = vector.load %arg3[%c0_3, %c0_4] : memref<1x128xf32, #tpu.memory_space<vmem>>, vector<1x128xf32>
    %5 = vector.broadcast %4 : vector<1x128xf32> to vector<208x128xf32>
    %6 = arith.addf %3, %5 : vector<208x128xf32>
    %cst = arith.constant 0.000000e+00 : f32
    %7 = vector.broadcast %cst : f32 to vector<208x128xf32>
    %8 = arith.cmpf oge, %6, %7 : vector<208x128xf32>
    %cst_5 = arith.constant 2.000000e-01 : f32
    %9 = vector.broadcast %cst_5 : f32 to vector<208x128xf32>
    %10 = arith.mulf %9, %6 : vector<208x128xf32>
    %11 = arith.select %8, %6, %10 : vector<208x128xi1>, vector<208x128xf32>
    %c0_6 = arith.constant 0 : index
    %c0_7 = arith.constant 0 : index
    %12 = vector.load %arg4[%c0_6, %c0_7] : memref<128x128xf32, #tpu.memory_space<vmem>>, vector<128x128xf32>
    %cst_8 = arith.constant dense<0.000000e+00> : vector<208x128xf32>
    %13 = tpu.matmul %11, %12, %cst_8 {dimension_numbers = #tpu.dot_dimension_numbers<[1], [0], [0], [1], [0, 0, 1, 1], [], []>, precision = #tpu.contract_precision<fp32>} : vector<208x128xf32>, vector<128x128xf32>, vector<208x128xf32> -> vector<208x128xf32>
    %c0_9 = arith.constant 0 : index
    %c0_10 = arith.constant 0 : index
    %14 = vector.load %arg5[%c0_9, %c0_10] : memref<1x128xf32, #tpu.memory_space<vmem>>, vector<1x128xf32>
    %15 = vector.broadcast %14 : vector<1x128xf32> to vector<208x128xf32>
    %16 = arith.addf %13, %15 : vector<208x128xf32>
    %c0_11 = arith.constant 0 : index
    %c0_12 = arith.constant 0 : index
    %17 = vector.load %arg6[%c0_11, %c0_12] : memref<208x128xf32, #tpu.memory_space<vmem>>, vector<208x128xf32>
    tpu.vector_store %arg6[%c0_11, %c0_12], %16 {strides = array<i32>} : memref<208x128xf32, #tpu.memory_space<vmem>>, vector<208x128xf32>,
    return
  }
  func.func @transform_0(%arg0: i32) -> (i32, i32) {
    %c0_i32 = arith.constant 0 : i32
    %c0_i32_0 = arith.constant 0 : i32
    return %arg0, %c0_i32 : i32, i32
  }
  func.func @transform_1(%arg0: i32) -> (i32, i32) {
    %c0_i32 = arith.constant 0 : i32
    %c0_i32_0 = arith.constant 0 : i32
    %c0_i32_1 = arith.constant 0 : i32
    return %c0_i32, %c0_i32_0 : i32, i32
  }
  func.func @transform_2(%arg0: i32) -> (i32, i32) {
    %c0_i32 = arith.constant 0 : i32
    %c0_i32_0 = arith.constant 0 : i32
    %c0_i32_1 = arith.constant 0 : i32
    return %c0_i32, %c0_i32_0 : i32, i32
  }
  func.func @transform_3(%arg0: i32) -> (i32, i32) {
    %c0_i32 = arith.constant 0 : i32
    %c0_i32_0 = arith.constant 0 : i32
    %c0_i32_1 = arith.constant 0 : i32
    return %c0_i32, %c0_i32_0 : i32, i32
  }
  func.func @transform_4(%arg0: i32) -> (i32, i32) {
    %c0_i32 = arith.constant 0 : i32
    %c0_i32_0 = arith.constant 0 : i32
    %c0_i32_1 = arith.constant 0 : i32
    return %c0_i32, %c0_i32_0 : i32, i32
  }
  func.func @transform_5(%arg0: i32) -> (i32, i32) {
    %c0_i32 = arith.constant 0 : i32
    %c0_i32_0 = arith.constant 0 : i32
    return %arg0, %c0_i32 : i32, i32
  }
}

</mosaic_0001>

<bundles_post_ra>
// kernel: mlp_forward.3
= control target key start
LH: loop header
LB: loop body
LE: loop exit
PB: predicated region body
PF: predicated region fallthrough
CT: control target
= control target key end

     0   :  { %s376_s6 = smov 0   ;;  %s478_s0 = inlined_call_operand.vmem [shape: f32[624,32], index: 0, kind: input, shape index: {}]   ;;  %s479_s1 = inlined_call_operand.vmem [shape: f32[3,2,32], index: 1, kind: output, shape index: {}]  }
   0x1 LB: > { %s382_s7 = sadd.s32 4294967295, %s364_s6   ;;  %p345_p0 = scmp.ge.s32.totalorder %s364_s6, 1  ;;  %s364_s6 = sphi %s376_s6, %s11_s6  }
   0x2   : > { %p88_p1 = scmp.lt.s32.totalorder %s364_s6, 4 }
   0x4   : > { %p89_p2 = pnand %p345_p0, %p88_p1 }
   0x5   : > { %s107_s8 = smul.u32 (!%p89_p2), 26, %s382_s7  ;;  %vm143_vm0 = vcmask (!%p89_p2), 261120   ;;  %p113_p4 = scmp.lt.s32.totalorder (!%p89_p2), %s382_s7, 2  ;;  %vm284_vm1 = vcmask (!%p89_p2), 1040384   ;;  %vm286_vm2 = vcmask (!%p89_p2), 254976  }
   0x6   : > { %92 = sbr.rel (%p89_p2) target bundleno = 86 (0x56), region = 24 }
   0x7   : > { %p108_p3 = scmp.lt.s32.totalorder (!%p89_p2), %s107_s8, 77 }
   0xd   : > { %s481_s8 = smov (!%p108_p3, %s107_s8), 77  ;;  %s483_s7 = smov (!%p113_p4, %s382_s7), 2 }
   0xe   : > { %s346_s9 = sshll.u32 %s481_s8, 3  ;;  %s347_s13 = sshll.u32 %s483_s7, 1 }
   0xf   : > { %s390_s12 = scalar_lea.vmem %s478_s0, %s346_s9  ;;  %s116_s16 = scalar_lea.vmem %s479_s1, %s347_s13 }
  0x10   : > { %v117_v0 = vld [vmem:[%s390_s12] sm:$0xff]  ;;  %v118_v1 = vld [vmem:[%s390_s12 + $0x8] sm:$0xff]  ;;  %v119_v2 = vld [vmem:[%s390_s12 + $0x10] sm:$0xff] }
  0x11   : > { %v144_v3 = vsel %vm143_vm0, %v117_v0, 0.0  ;;  %v145_v4 = vsel %vm143_vm0, %v118_v1, 0.0  ;;  %v147_v5 = vsel %vm143_vm0, %v119_v2, 0.0  ;;  %v120_v6 = vld [vmem:[%s390_s12 + $0x18] sm:$0xff]  ;;  %v121_v9 = vld [vmem:[%s390_s12 + $0x20] sm:$0xff]  ;;  %v122_v12 = vld [vmem:[%s390_s12 + $0x28] sm:$0xff]  ;;  %v201_v21 = vmul.f32 %v117_v0, %v117_v0 }
  0x12   : > { %v146_v7 = vadd.f32 %v145_v4, %v144_v3  ;;  %v149_v8 = vsel %vm143_vm0, %v120_v6, 0.0  ;;  %v151_v11 = vsel %vm143_vm0, %v121_v9, 0.0  ;;  %v153_v14 = vsel %vm143_vm0, %v122_v12, 0.0  ;;  %v123_v15 = vld [vmem:[%s390_s12 + $0x30] sm:$0xff]  ;;  %v124_v18 = vld [vmem:[%s390_s12 + $0x38] sm:$0xff]  ;;  %v125_v22 = vld [vmem:[%s390_s12 + $0x40] sm:$0xff] }
  0x13   : > { %v155_v17 = vsel %vm143_vm0, %v123_v15, 0.0  ;;  %v157_v20 = vsel %vm143_vm0, %v124_v18, 0.0  ;;  %v202_v24 = vmul.f32 %v118_v1, %v118_v1  ;;  %v203_v25 = vmul.f32 %v119_v2, %v119_v2  ;;  %v126_v27 = vld [vmem:[%s390_s12 + $0x48] sm:$0xff]  ;;  %v127_v32 = vld [vmem:[%s390_s12 + $0x50] sm:$0xff]  ;;  %v128_v39 = vld [vmem:[%s390_s12 + $0x58] sm:$0xff] }
  0x14   : > { %v148_v10 = vadd.f32 %v147_v5, %v146_v7  ;;  %v159_v26 = vsel %vm143_vm0, %v125_v22, 0.0  ;;  %v204_v29 = vmul.f32 %v120_v6, %v120_v6  ;;  %v161_v30 = vsel %vm143_vm0, %v126_v27, 0.0  ;;  %v129_v45 = vld [vmem:[%s390_s12 + $0x60] sm:$0xff]  ;;  %v130_v51 = vld [vmem:[%s390_s12 + $0x68] sm:$0xff]  ;;  %v131_v57 = vld [vmem:[%s390_s12 + $0x70] sm:$0xff] }
  0x15   : > { %v227_v31 = vsel %vm143_vm0, %v201_v21, 0.0  ;;  %v205_v34 = vmul.f32 %v121_v9, %v121_v9  ;;  %v228_v35 = vsel %vm143_vm0, %v202_v24, 0.0  ;;  %v230_v36 = vsel %vm143_vm0, %v203_v25, 0.0  ;;  %v132_v63 = vld [vmem:[%s390_s12 + $0x78] sm:$0xff]  ;;  %v133_v5 = vld [vmem:[%s390_s12 + $0x80] sm:$0xff] }
  0x16   : > { %v150_v13 = vadd.f32 %v149_v8, %v148_v10  ;;  %v163_v37 = vsel %vm143_vm0, %v127_v32, 0.0  ;;  %v229_v38 = vadd.f32 %v228_v35, %v227_v31  ;;  %v206_v41 = vmul.f32 %v122_v12, %v122_v12  ;;  %v138_v35 = vld [vmem:[%s390_s12 + $0xa8] sm:$0xff] }
  0x17   : > { %v232_v42 = vsel %vm143_vm0, %v204_v29, 0.0  ;;  %v165_v43 = vsel %vm143_vm0, %v128_v39, 0.0  ;;  %v207_v47 = vmul.f32 %v123_v15, %v123_v15  ;;  %v234_v48 = vsel %vm143_vm0, %v205_v34, 0.0  ;;  %v137_v29 = vld [vmem:[%s390_s12 + $0xa0] sm:$0xff] }
  0x18   : > { %v152_v16 = vadd.f32 %v151_v11, %v150_v13  ;;  %v231_v44 = vadd.f32 %v230_v36, %v229_v38  ;;  %v167_v49 = vsel %vm143_vm0, %v129_v45, 0.0  ;;  %v208_v53 = vmul.f32 %v124_v18, %v124_v18  ;;  %v134_v11 = vld [vmem:[%s390_s12 + $0x88] sm:$0xff] }
  0x19   : > { %v236_v54 = vsel %vm143_vm0, %v206_v41, 0.0  ;;  %v169_v55 = vsel %vm143_vm0, %v130_v51, 0.0  ;;  %v209_v59 = vmul.f32 %v125_v22, %v125_v22  ;;  %v238_v60 = vsel %vm143_vm0, %v207_v47, 0.0  ;;  %v139_v41 = vld [vmem:[%s390_s12 + $0xb0] sm:$0xff]  ;;  %v140_v47 = vld [vmem:[%s390_s12 + $0xb8] sm:$0xff] }
  0x1a   : > { %v154_v19 = vadd.f32 %v153_v14, %v152_v16  ;;  %v233_v50 = vadd.f32 %v232_v42, %v231_v44  ;;  %v171_v61 = vsel %vm143_vm0, %v131_v57, 0.0  ;;  %v210_v1 = vmul.f32 %v126_v27, %v126_v27 }
  0x1b   : > { %v240_v2 = vsel %vm143_vm0, %v208_v53, 0.0  ;;  %v173_v3 = vsel %vm143_vm0, %v132_v63, 0.0  ;;  %v211_v7 = vmul.f32 %v127_v32, %v127_v32  ;;  %v242_v8 = vsel %vm143_vm0, %v209_v59, 0.0  ;;  %v141_v53 = vld [vmem:[%s390_s12 + $0xc0] sm:$0xff] }
  0x1c   : > { %v156_v23 = vadd.f32 %v155_v17, %v154_v19  ;;  %v235_v56 = vadd.f32 %v234_v48, %v233_v50  ;;  %v175_v9 = vsel %vm143_vm0, %v133_v5, 0.0  ;;  %v212_v13 = vmul.f32 %v128_v39, %v128_v39  ;;  %v135_v17 = vld [vmem:[%s390_s12 + $0x90] sm:$0xff] }
  0x1d   : > { %v244_v14 = vsel %vm143_vm0, %v210_v1, 0.0  ;;  %v177_v15 = vsel %vm143_vm0, %v134_v11, 0.0  ;;  %v213_v19 = vmul.f32 %v129_v45, %v129_v45  ;;  %v179_v21 = vsel %vm143_vm0, %v135_v17, 0.0 }
  0x1e   : > { %v158_v28 = vadd.f32 %v157_v20, %v156_v23  ;;  %v237_v62 = vadd.f32 %v236_v54, %v235_v56  ;;  %v246_v20 = vsel %vm143_vm0, %v211_v7, 0.0  ;;  %v136_v23 = vld [vmem:[%s390_s12 + $0x98] sm:$0xff]  ;;  %v214_v25 = vmul.f32 %v130_v51, %v130_v51 }
  0x1f   : > { %v181_v27 = vsel %vm143_vm0, %v136_v23, 0.0  ;;  %v215_v31 = vmul.f32 %v131_v57, %v131_v57  ;;  %v250_v32 = vsel %vm143_vm0, %v213_v19, 0.0  ;;  %v185_v39 = vsel %vm143_vm0, %v138_v35, 0.0 }
  0x20   : > { %v160_v33 = vadd.f32 %v159_v26, %v158_v28  ;;  %v239_v4 = vadd.f32 %v238_v60, %v237_v62  ;;  %v248_v26 = vsel %vm143_vm0, %v212_v13, 0.0  ;;  %v252_v38 = vsel %vm143_vm0, %v214_v25, 0.0  ;;  %v142_v62 = vld [vmem:[%s390_s12 + $0xc8] sm:$0xff] }
  0x21   : > { %v254_v44 = vsel %vm143_vm0, %v215_v31, 0.0  ;;  %v187_v45 = vsel %vm143_vm0, %v139_v41, 0.0  ;;  %v189_v51 = vsel %vm143_vm0, %v140_v47, 0.0  ;;  %v191_v57 = vsel %vm143_vm0, %v141_v53, 0.0 }
  0x22   : > { %v162_v40 = vadd.f32 %v161_v30, %v160_v33  ;;  %v241_v10 = vadd.f32 %v240_v2, %v239_v4  ;;  %v183_v33 = vsel %vm143_vm0, %v137_v29, 0.0  ;;  %v220_v60 = vmul.f32 %v136_v23, %v136_v23 }
  0x23   : > { %v193_v1 = vsel %vm143_vm0, %v142_v62, 0.0  ;;  %v221_v2 = vmul.f32 %v137_v29, %v137_v29  ;;  %v226_v19 = vmul.f32 %v142_v62, %v142_v62 }
  0x24   : > { %v164_v46 = vadd.f32 %v163_v37, %v162_v40  ;;  %v243_v16 = vadd.f32 %v242_v8, %v241_v10  ;;  %v216_v37 = vmul.f32 %v132_v63, %v132_v63 }
  0x25   : > { %v266_v10 = vsel %vm143_vm0, %v221_v2, 0.0  ;;  %v276_v25 = vsel %vm143_vm0, %v226_v19, 0.0 }
  0x26   : > { %v166_v52 = vadd.f32 %v165_v43, %v164_v46  ;;  %v245_v22 = vadd.f32 %v244_v14, %v243_v16  ;;  %v217_v43 = vmul.f32 %v133_v5, %v133_v5  ;;  %v256_v50 = vsel %vm143_vm0, %v216_v37, 0.0 }
  0x27   : > { %v222_v5 = vmul.f32 %v138_v35, %v138_v35  ;;  %v225_v16 = vmul.f32 %v141_v53, %v141_v53 }
  0x28   : > { %v168_v58 = vadd.f32 %v167_v49, %v166_v52  ;;  %v247_v28 = vadd.f32 %v246_v20, %v245_v22  ;;  %v218_v49 = vmul.f32 %v134_v11, %v134_v11  ;;  %v258_v56 = vsel %vm143_vm0, %v217_v43, 0.0 }
  0x29   : > { %v268_v13 = vsel %vm143_vm0, %v222_v5, 0.0  ;;  %v274_v23 = vsel %vm143_vm0, %v225_v16, 0.0 }
  0x2a   : > { %v170_v0 = vadd.f32 %v169_v55, %v168_v58  ;;  %v249_v34 = vadd.f32 %v248_v26, %v247_v28  ;;  %v219_v55 = vmul.f32 %v135_v17, %v135_v17 }
  0x2c   : > { %v172_v6 = vadd.f32 %v171_v61, %v170_v0  ;;  %v251_v40 = vadd.f32 %v250_v32, %v249_v34  ;;  %v260_v61 = vsel %vm143_vm0, %v218_v49, 0.0 }
  0x2e   : > { %v174_v12 = vadd.f32 %v173_v3, %v172_v6  ;;  %v253_v46 = vadd.f32 %v252_v38, %v251_v40  ;;  %v262_v3 = vsel %vm143_vm0, %v219_v55, 0.0  ;;  %v264_v6 = vsel %vm143_vm0, %v220_v60, 0.0 }
  0x30   : > { %v176_v18 = vadd.f32 %v175_v9, %v174_v12  ;;  %v255_v52 = vadd.f32 %v254_v44, %v253_v46  ;;  %v223_v9 = vmul.f32 %v139_v41, %v139_v41  ;;  %v224_v12 = vmul.f32 %v140_v47, %v140_v47 }
  0x32   : > { %v178_v24 = vadd.f32 %v177_v15, %v176_v18  ;;  %v257_v58 = vadd.f32 %v256_v50, %v255_v52  ;;  %v270_v17 = vsel %vm143_vm0, %v223_v9, 0.0  ;;  %v272_v20 = vsel %vm143_vm0, %v224_v12, 0.0 }
  0x34   : > { %v180_v30 = vadd.f32 %v179_v21, %v178_v24  ;;  %v259_v63 = vadd.f32 %v258_v56, %v257_v58 }
  0x36   : > { %v182_v36 = vadd.f32 %v181_v27, %v180_v30  ;;  %v261_v4 = vadd.f32 %v260_v61, %v259_v63 }
  0x38   : > { %v184_v42 = vadd.f32 %v183_v33, %v182_v36  ;;  %v263_v8 = vadd.f32 %v262_v3, %v261_v4 }
  0x3a   : > { %v186_v48 = vadd.f32 %v185_v39, %v184_v42  ;;  %v265_v11 = vadd.f32 %v264_v6, %v263_v8 }
  0x3c   : > { %v188_v54 = vadd.f32 %v187_v45, %v186_v48  ;;  %v267_v15 = vadd.f32 %v266_v10, %v265_v11 }
  0x3e   : > { %v190_v59 = vadd.f32 %v189_v51, %v188_v54  ;;  %v269_v18 = vadd.f32 %v268_v13, %v267_v15 }
  0x40   : > { %v192_v0 = vadd.f32 %v191_v57, %v190_v59  ;;  %v271_v22 = vadd.f32 %v270_v17, %v269_v18 }
  0x42   : > { %v194_v7 = vadd.f32 %v193_v1, %v192_v0  ;;  %v273_v24 = vadd.f32 %v272_v20, %v271_v22 }
  0x44   : > { %v195_v14 = vrot.slane %v194_v7, 4  ;;  %v275_v27 = vadd.f32 %v274_v23, %v273_v24 }
  0x46   : > { %v196_v21 = vadd.f32 %v195_v14, %v194_v7  ;;  %v277_v28 = vadd.f32 %v276_v25, %v275_v27 }
  0x48   : > { %v197_v26 = vrot.slane %v196_v21, 2  ;;  %v278_v30 = vrot.slane %v277_v28, 4 }
  0x4a   : > { %v198_v29 = vadd.f32 %v197_v26, %v196_v21  ;;  %v279_v31 = vadd.f32 %v278_v30, %v277_v28 }
  0x4c   : > { %v199_v32 = vrot.slane %v198_v29, 1  ;;  %v280_v33 = vrot.slane %v279_v31, 2 }
  0x4e   : > { %v281_v34 = vadd.f32 %v280_v33, %v279_v31  ;;  %v200_v35 = vadd.f32 %v199_v32, %v198_v29 }
  0x50   : > { %v282_v36 = vrot.slane %v281_v34, 1 }
  0x52   : > { %v283_v37 = vadd.f32 %v282_v36, %v281_v34 }
  0x54   : > { %v285_v38 = vsel %vm284_vm1, %v200_v35, %v283_v37 }
  0x55   : > { %287 = vst.msk [vmem:[%s116_s16] sm:$0x3] %vm286_vm2, %v285_v38 }
  0x56 PF: > { %s11_s6 = sadd.s32 1, %s364_s6  }
  0x57   : > { %p8_p5 = scmp.ge.s32.totalorder %s11_s6, 5  }
  0x59   :  { %10 = sbr.rel (!%p8_p5) target bundleno = 1 (0x1), region = 54 }

// kernel: mlp_forward.5
= control target key start
LH: loop header
LB: loop body
LE: loop exit
PB: predicated region body
PF: predicated region fallthrough
CT: control target
= control target key end

     0   :  { %s3303_s18 = smov 0   ;;  %s4103_s0 = inlined_call_operand.vmem [shape: f32[624,128], index: 0, kind: input, shape index: {}]   ;;  %s4104_s1 = inlined_call_operand.vmem [shape: f32[1,128], index: 1, kind: input, shape index: {}]   ;;  %s4105_s2 = inlined_call_operand.vmem [shape: f32[1,128], index: 2, kind: input, shape index: {}]   ;;  %s4106_s3 = inlined_call_operand.vmem [shape: f32[128,128], index: 3, kind: input, shape index: {}]   ;;  %s4107_s4 = inlined_call_operand.vmem [shape: f32[1,128], index: 4, kind: input, shape index: {}]   ;;  %s4108_s5 = inlined_call_operand.vmem [shape: f32[624,128], index: 5, kind: output, shape index: {}]  }
   0x1 LB: > { %s2219_s19 = sadd.s32 4294967295, %s3271_s18   ;;  %p2223_p0 = scmp.ge.s32.totalorder %s3271_s18, 1  ;;  %s3271_s18 = sphi %s3303_s18, %s15_s18  }
   0x2   : > { %p188_p1 = scmp.lt.s32.totalorder %s3271_s18, 4 }
   0x4   : > { %p189_p2 = pnand %p2223_p0, %p188_p1 }
   0x6   : > { %192 = sbr.rel (%p189_p2) target bundleno = 442 (0x1ba), region = 40 }
   0xd   : > { %v398_v0 = vld [vmem:[%s4106_s3] sm:$0xff]  ;;  %v399_v1 = vld [vmem:[%s4106_s3 + $0x8] sm:$0xff]  ;;  %v400_v2 = vld [vmem:[%s4106_s3 + $0x10] sm:$0xff]  ;;  %s3320_s26 = smul.u32 26, %s2219_s19 }
   0xe   : > { %v422_v3 = vand.u32 4294901760, %v398_v0  ;;  %v425_v4 = vand.u32 4294901760, %v399_v1  ;;  %v401_v5 = vld [vmem:[%s4106_s3 + $0x18] sm:$0xff]  ;;  %v428_v6 = vand.u32 4294901760, %v400_v2  ;;  %v402_v7 = vld [vmem:[%s4106_s3 + $0x20] sm:$0xff]  ;;  %v403_v8 = vld [vmem:[%s4106_s3 + $0x28] sm:$0xff] }
   0xf   : > { %v431_v9 = vand.u32 4294901760, %v401_v5  ;;  %v434_v10 = vand.u32 4294901760, %v402_v7  ;;  %v437_v11 = vand.u32 4294901760, %v403_v8  ;;  %v404_v12 = vld [vmem:[%s4106_s3 + $0x30] sm:$0xff]  ;;  %v405_v13 = vld [vmem:[%s4106_s3 + $0x38] sm:$0xff]  ;;  %v3340_v14 = vld [vmem:[%s4106_s3 + $0x40] sm:$0xff] }
  0x10   : > { %v3342_v15 = vpack.c.bf16 %v425_v4, %v422_v3  ;;  %v440_v16 = vand.u32 4294901760, %v404_v12  ;;  %v443_v17 = vand.u32 4294901760, %v405_v13  ;;  %v3347_v18 = vld [vmem:[%s4106_s3 + $0x48] sm:$0xff]  ;;  %v4116_v19 = vand.u32 4294901760, %v3340_v14  ;;  %v3353_v20 = vld [vmem:[%s4106_s3 + $0x50] sm:$0xff]  ;;  %v3358_v21 = vld [vmem:[%s4106_s3 + $0x58] sm:$0xff] }
  0x11   : > { %v3360_v22 = vpack.c.bf16 %v431_v9, %v428_v6  ;;  %v4115_v23 = vand.u32 4294901760, %v3347_v18  ;;  %v4114_v24 = vand.u32 4294901760, %v3353_v20  ;;  %v3367_v25 = vld [vmem:[%s4106_s3 + $0x60] sm:$0xff]  ;;  %v3372_v26 = vld [vmem:[%s4106_s3 + $0x68] sm:$0xff]  ;;  %v3377_v27 = vld [vmem:[%s4106_s3 + $0x70] sm:$0xff]  ;;  %p217_p3 = scmp.lt.s32.totalorder %s3320_s26, 77  ;;  %v3382_v28 = vpack.c.bf16 %v437_v11, %v434_v10 }
  0x12   : > { %2910 = vmatprep.subr.bf16.mxu1 %v3342_v15  ;;  %3006 = vmatprep.subr.bf16.mxu0 %v3342_v15  ;;  %v4113_v29 = vand.u32 4294901760, %v3358_v21  ;;  %v4112_v30 = vand.u32 4294901760, %v3367_v25  ;;  %v4111_v31 = vand.u32 4294901760, %v3372_v26  ;;  %v3390_v32 = vld [vmem:[%s4106_s3 + $0x78] sm:$0xff]  ;;  %v3394_v33 = vpack.c.bf16 %v443_v17, %v440_v16  ;;  %v3429_v41 = vld [vmem:[%s4104_s1] ss:$0 sm:$0xff] }
  0x13   : > { %2912 = vmatpush3.bf16.msra.mxu1 %v3342_v15  ;;  %3008 = vmatpush3.bf16.msra.mxu0 %v3342_v15  ;;  %v4110_v34 = vand.u32 4294901760, %v3377_v27  ;;  %v4109_v35 = vand.u32 4294901760, %v3390_v32  ;;  %s4237_s26 = smov (!%p217_p3, %s3320_s26), 77  ;;  %v3401_v36 = vsub.f32 %v398_v0, %v422_v3  ;;  %v3409_v37 = vpack.c.bf16 %v4115_v23, %v4116_v19  ;;  %v3452_v46 = vld [vmem:[%s4105_s2] ss:$0 sm:$0xff] }
  0x14   : > { %2914 = vmatprep.subr.bf16.mxu1 %v3360_v22  ;;  %3010 = vmatprep.subr.bf16.mxu0 %v3360_v22  ;;  %v3415_v38 = vpack.c.bf16 %v4113_v29, %v4114_v24  ;;  %v3417_v39 = vsub.f32 %v399_v1, %v425_v4  ;;  %v3423_v40 = vpack.c.bf16 %v4111_v31, %v4112_v30  ;;  %s2224_s30 = sshll.u32 %s4237_s26, 3 }
  0x15   : > { %v765_v42 = vand.u32 4294901760, %v3401_v36  ;;  %v3432_v43 = vsub.f32 %v400_v2, %v428_v6  ;;  %v3434_v44 = vsub.f32 %v401_v5, %v431_v9  ;;  %v3440_v45 = vpack.c.bf16 %v4109_v35, %v4110_v34  ;;  %s3447_s10 = scalar_lea.vmem %s4103_s0, %s2224_s30  ;;  %s4047_s17 = scalar_lea.vmem %s4108_s5, %s2224_s30 }
  0x16   : > { %4161 = vst [vmem:[#allocation2_spill] sm:$0xff] %v3415_v38  ;;  %4162 = vst [vmem:[#allocation3_spill] sm:$0xff] %v3423_v40  ;;  %v772_v47 = vand.u32 4294901760, %v3417_v39  ;;  %v3455_v48 = vsub.f32 %v402_v7, %v434_v10  ;;  %v3457_v49 = vsub.f32 %v403_v8, %v437_v11  ;;  %v228_v50 = vld [vmem:[%s3447_s10] sm:$0xff]  ;;  %v229_v51 = vld [vmem:[%s3447_s10 + $0x8] sm:$0xff]  ;;  %v3466_v55 = vsub.f32 %v404_v12, %v440_v16 }
  0x17   : > { %4163 = vst [vmem:[#allocation4_spill] sm:$0xff] %v3440_v45  ;;  %2916 = vmatpush3.bf16.msra.mxu1 %v3360_v22  ;;  %3012 = vmatpush3.bf16.msra.mxu0 %v3360_v22  ;;  %v766_v52 = vsub.f32 %v3401_v36, %v765_v42  ;;  %v230_v53 = vld [vmem:[%s3447_s10 + $0x10] sm:$0xff]  ;;  %v779_v54 = vand.u32 4294901760, %v3432_v43  ;;  %v3468_v56 = vsub.f32 %v405_v13, %v443_v17  ;;  %v231_v60 = vld [vmem:[%s3447_s10 + $0x18] sm:$0xff]  ;;  %v232_v61 = vld [vmem:[%s3447_s10 + $0x20] sm:$0xff]  ;;  %v786_v62 = vand.u32 4294901760, %v3434_v44 }
  0x18   : > { %2918 = vmatprep.subr.bf16.mxu1 %v3382_v28  ;;  %3014 = vmatprep.subr.bf16.mxu0 %v3382_v28  ;;  %v261_v57 = vmul.f32 %v3429_v41, %v228_v50  ;;  %v262_v58 = vmul.f32 %v3429_v41, %v229_v51  ;;  %v773_v59 = vsub.f32 %v3417_v39, %v772_v47  ;;  %v793_v2 = vand.u32 4294901760, %v3455_v48  ;;  %v235_v35 = vld [vmem:[%s3447_s10 + $0x38] sm:$0xff]  ;;  %v236_v29 = vld [vmem:[%s3447_s10 + $0x40] sm:$0xff]  ;;  %v237_v19 = vld [vmem:[%s3447_s10 + $0x48] sm:$0xff] }
  0x19   : > { %v767_v63 = vand.u32 4294901760, %v766_v52  ;;  %v263_v0 = vmul.f32 %v3429_v41, %v230_v53  ;;  %v264_v1 = vmul.f32 %v3429_v41, %v231_v60  ;;  %v3483_v5 = vpack.c.bf16 %v772_v47, %v765_v42 }
  0x1a   : > { %v294_v3 = vadd.f32 %v3452_v46, %v261_v57  ;;  %v295_v4 = vadd.f32 %v3452_v46, %v262_v58  ;;  %v265_v6 = vmul.f32 %v3429_v41, %v232_v61  ;;  %v774_v7 = vand.u32 4294901760, %v773_v59  ;;  %v233_v58 = vld [vmem:[%s3447_s10 + $0x28] sm:$0xff] }
  0x1b   : > { %2920 = vmatpush3.bf16.msra.mxu1 %v3382_v28  ;;  %3016 = vmatpush3.bf16.msra.mxu0 %v3382_v28  ;;  %v296_v8 = vadd.f32 %v3452_v46, %v263_v0  ;;  %v297_v9 = vadd.f32 %v3452_v46, %v264_v1  ;;  %v3493_v10 = vsub.f32 %v3432_v43, %v779_v54  ;;  %v4121_v16 = vand.u32 4294901760, %v3457_v49 }
  0x1c   : > { %2922 = vmatprep.subr.bf16.mxu1 %v3394_v33  ;;  %3018 = vmatprep.subr.bf16.mxu0 %v3394_v33  ;;  %vm320_vm0 = vcmp.ge.f32.partialorder %v294_v3, 0.0  ;;  %v346_v11 = vmul.f32 0.2, %v294_v3  ;;  %vm321_vm1 = vcmp.ge.f32.partialorder %v295_v4, 0.0  ;;  %v347_v12 = vmul.f32 0.2, %v295_v4 }
  0x1d   : > { %vm322_vm2 = vcmp.ge.f32.partialorder %v296_v8, 0.0  ;;  %v348_v13 = vmul.f32 0.2, %v296_v8  ;;  %vm323_vm3 = vcmp.ge.f32.partialorder %v297_v9, 0.0  ;;  %v349_v47 = vmul.f32 0.2, %v297_v9 }
  0x1e   : > { %v372_v17 = vsel %vm320_vm0, %v294_v3, %v346_v11  ;;  %v373_v42 = vsel %vm321_vm1, %v295_v4, %v347_v12  ;;  %v298_v50 = vadd.f32 %v3452_v46, %v265_v6  ;;  %v3505_v53 = vpack.c.bf16 %v774_v7, %v767_v63  ;;  %v234_v4 = vld [vmem:[%s3447_s10 + $0x30] sm:$0xff] }
  0x1f   : > { %2924 = vmatpush3.bf16.msra.mxu1 %v3394_v33  ;;  %3020 = vmatpush3.bf16.msra.mxu0 %v3394_v33  ;;  %v3501_v51 = vand.u32 4294901760, %v372_v17  ;;  %v3503_v52 = vand.u32 4294901760, %v373_v42  ;;  %v374_v57 = vsel %vm322_vm2, %v296_v8, %v348_v13  ;;  %v375_v60 = vsel %vm323_vm3, %v297_v9, %v349_v47 }
  0x20   : > { %2926 = vmatprep.subr.bf16.mxu1 %v3409_v37  ;;  %3022 = vmatprep.subr.bf16.mxu0 %v3409_v37  ;;  %v3510_v59 = vand.u32 4294901760, %v374_v57  ;;  %vm324_vm4 = vcmp.ge.f32.partialorder %v298_v50, 0.0  ;;  %v350_v61 = vmul.f32 0.2, %v298_v50  ;;  %v3519_v63 = vand.u32 4294901760, %v375_v60 }
  0x21   : > { %v3514_v0 = vsub.f32 %v372_v17, %v3501_v51  ;;  %v3517_v1 = vsub.f32 %v373_v42, %v3503_v52  ;;  %v787_v3 = vsub.f32 %v3434_v44, %v786_v62  ;;  %v781_v8 = vand.u32 4294901760, %v3493_v10 }
  0x22   : > { %v3526_v6 = vsub.f32 %v374_v57, %v3510_v59  ;;  %v376_v7 = vsel %vm324_vm4, %v298_v50, %v350_v61  ;;  %v266_v9 = vmul.f32 %v3429_v41, %v233_v58  ;;  %v3535_v13 = vsub.f32 %v375_v60, %v3519_v63 }
  0x23   : > { %4164 = vst [vmem:[#allocation5_spill] sm:$0xff] %v3514_v0  ;;  %4165 = vst [vmem:[#allocation6_spill] sm:$0xff] %v3517_v1  ;;  %2928 = vmatpush3.bf16.msra.mxu1 %v3409_v37  ;;  %3024 = vmatpush3.bf16.msra.mxu0 %v3409_v37  ;;  %v504_v11 = vand.u32 4294901760, %v3514_v0  ;;  %v4120_v12 = vand.u32 4294901760, %v3517_v1  ;;  %v3537_v17 = vand.u32 4294901760, %v376_v7  ;;  %v788_v42 = vand.u32 4294901760, %v787_v3 }
  0x24   : > { %4166 = vst [vmem:[#allocation7_spill] sm:$0xff] %v3526_v6  ;;  %4167 = vst [vmem:[#allocation8_spill] sm:$0xff] %v3535_v13  ;;  %2930 = vmatprep.subr.bf16.mxu1 %v3415_v38  ;;  %3026 = vmatprep.subr.bf16.mxu0 %v3415_v38  ;;  %v4119_v10 = vand.u32 4294901760, %v3526_v6  ;;  %v299_v47 = vadd.f32 %v3452_v46, %v266_v9  ;;  %v267_v50 = vmul.f32 %v3429_v41, %v234_v4 }
  0x25   : > { %v505_v57 = vsub.f32 %v3514_v0, %v504_v11  ;;  %2728 = vmatprep.mubr.f32.mxu0 %v504_v11  ;;  %v3548_v58 = vsub.f32 %v3517_v1, %v4120_v12  ;;  %v4118_v60 = vand.u32 4294901760, %v3535_v13  ;;  %v3552_v61 = vsub.f32 %v376_v7, %v3537_v17 }
  0x26   : > { %v3558_v3 = vsub.f32 %v3526_v6, %v4119_v10  ;;  %vm325_vm5 = vcmp.ge.f32.partialorder %v299_v47, 0.0  ;;  %v351_v4 = vmul.f32 0.2, %v299_v47  ;;  %v3564_v9 = vpack.c.bf16 %v786_v62, %v779_v54 }
  0x27   : > { %4168 = vst [vmem:[#allocation9_spill] sm:$0xff] %v3552_v61  ;;  %2932 = vmatpush3.bf16.msra.mxu1 %v3415_v38  ;;  %3028 = vmatpush3.bf16.msra.mxu0 %v3415_v38  ;;  %v506_v7 = vand.u32 4294901760, %v505_v57  ;;  %v3571_v11 = vsub.f32 %v3535_v13, %v4118_v60  ;;  %v4117_v34 = vand.u32 4294901760, %v3552_v61  ;;  %v3574_v31 = vpack.c.bf16 %v788_v42, %v781_v8 }
  0x28   : > { %2934 = vmatprep.subr.bf16.mxu1 %v3423_v40  ;;  %3030 = vmatprep.subr.bf16.mxu0 %v3423_v40  ;;  %v516_v54 = vand.u32 4294901760, %v3548_v58  ;;  %v377_v62 = vsel %vm325_vm5, %v299_v47, %v351_v4  ;;  %v300_v30 = vadd.f32 %v3452_v46, %v267_v50  ;;  %v268_v57 = vmul.f32 %v3429_v41, %v235_v35 }
  0x29   : > { %2515 = vmatprep.mubr.f32.mxu1 %v506_v7  ;;  %v526_v24 = vand.u32 4294901760, %v3558_v3  ;;  %v3586_v8 = vsub.f32 %v3552_v61, %v4117_v34  ;;  %v3588_v42 = vand.u32 4294901760, %v377_v62  ;;  %v794_v47 = vsub.f32 %v3455_v48, %v793_v2  ;;  %v238_v34 = vld [vmem:[%s3447_s10 + $0x50] sm:$0xff] }
  0x2a   : > { %vm326_vm6 = vcmp.ge.f32.partialorder %v300_v30, 0.0  ;;  %v352_v50 = vmul.f32 0.2, %v300_v30  ;;  %v301_v35 = vadd.f32 %v3452_v46, %v268_v57  ;;  %v801_v58 = vsub.f32 %v3457_v49, %v4121_v16 }
  0x2b   : > { %2936 = vmatpush3.bf16.msra.mxu1 %v3423_v40  ;;  %3032 = vmatpush3.bf16.msra.mxu0 %v3423_v40  ;;  %v536_v3 = vand.u32 4294901760, %v3571_v11  ;;  %v3601_v4 = vsub.f32 %v377_v62, %v3588_v42  ;;  %v795_v7 = vand.u32 4294901760, %v794_v47  ;;  %v269_v23 = vmul.f32 %v3429_v41, %v236_v29  ;;  %v239_v47 = vld [vmem:[%s3447_s10 + $0x58] sm:$0xff] }
  0x2c   : > { %2938 = vmatprep.subr.bf16.mxu1 %v3440_v45  ;;  %3034 = vmatprep.subr.bf16.mxu0 %v3440_v45  ;;  %v378_v57 = vsel %vm326_vm6, %v300_v30, %v352_v50  ;;  %vm327_vm7 = vcmp.ge.f32.partialorder %v301_v35, 0.0  ;;  %v353_v60 = vmul.f32 0.2, %v301_v35  ;;  %v802_v10 = vand.u32 4294901760, %v801_v58 }
  0x2d   : > { %4169 = vst [vmem:[#allocation10_spill] sm:$0xff] %v3601_v4  ;;  %v546_v12 = vand.u32 4294901760, %v3586_v8  ;;  %v4125_v11 = vand.u32 4294901760, %v3601_v4  ;;  %v3610_v16 = vand.u32 4294901760, %v378_v57  ;;  %v302_v62 = vadd.f32 %v3452_v46, %v269_v23 }
  0x2e   : > { %v379_v29 = vsel %vm327_vm7, %v301_v35, %v353_v60  ;;  %v4170_v0 = vand.u32 4294901760, %v3457_v49  ;;  %v270_v30 = vmul.f32 %v3429_v41, %v237_v19  ;;  %v271_v50 = vmul.f32 %v3429_v41, %v238_v34 }
  0x2f   : > { %2940 = vmatpush3.bf16.msra.mxu1 %v3440_v45  ;;  %3036 = vmatpush3.bf16.msra.mxu0 %v3440_v45  ;;  %v3625_v8 = vsub.f32 %v378_v57, %v3610_v16  ;;  %v3627_v23 = vand.u32 4294901760, %v379_v29  ;;  %v3629_v60 = vpack.c.bf16 %v802_v10, %v795_v7  ;;  %vm328_vm8 = vcmp.ge.f32.partialorder %v302_v62, 0.0 }
  0x30   : > { %v3618_v40 = vpack.c.bf16 %v4170_v0, %v793_v2  ;;  %2942 = vmatprep.subr.bf16.mxu1 %v3505_v53  ;;  %3038 = vmatprep.subr.bf16.mxu0 %v3483_v5  ;;  %v354_v2 = vmul.f32 0.2, %v302_v62  ;;  %v303_v19 = vadd.f32 %v3452_v46, %v270_v30  ;;  %v304_v34 = vadd.f32 %v3452_v46, %v271_v50 }
  0x31   : > { %4171 = vst [vmem:[#allocation11_spill] sm:$0xff] %v3625_v8  ;;  %v272_v0 = vmul.f32 %v3429_v41, %v239_v47  ;;  %v555_v35 = vsub.f32 %v3601_v4, %v4125_v11  ;;  %v564_v58 = vand.u32 4294901760, %v3625_v8  ;;  %v3641_v10 = vsub.f32 %v379_v29, %v3627_v23 }
  0x32   : > { %v807_v7 = vand.u32 4294901760, %v3466_v55  ;;  %2516 = vmatmul.mubr.f32.vlgmr.msra.gmra.mrb[0].mxu1 %v516_v54  ;;  %v4173_v57 = vand.u32 4294901760, %v3517_v1  ;;  %v380_v30 = vsel %vm328_vm8, %v302_v62, %v354_v2  ;;  %vm329_vm9 = vcmp.ge.f32.partialorder %v303_v19, 0.0  ;;  %v240_v1 = vld [vmem:[%s3447_s10 + $0x60] sm:$0xff] }
  0x33   : > { %4172 = vst [vmem:[#allocation12_spill] sm:$0xff] %v3641_v10  ;;  %v355_v50 = vmul.f32 0.2, %v303_v19  ;;  %vm330_vm10 = vcmp.ge.f32.partialorder %v304_v34, 0.0  ;;  %2944 = vmatpush3.bf16.msra.mxu1 %v3505_v53  ;;  %2518 = vmatprep.mubr.f32.mxu1 %v526_v24  ;;  %v565_v47 = vsub.f32 %v3625_v8, %v564_v58  ;;  %v4131_v11 = vand.u32 4294901760, %v3641_v10 }
  0x34   : > { %2729 = vmatmul.mubr.f32.vlgmr.msra.gmra.mrb[0].mxu0 %v4173_v57  ;;  %v3649_v45 = vand.u32 4294901760, %v380_v30  ;;  %v356_v29 = vmul.f32 0.2, %v304_v34  ;;  %v4174_v38 = vand.u32 4294901760, %v3526_v6  ;;  %v305_v62 = vadd.f32 %v3452_v46, %v272_v0  ;;  %2946 = vmatprep.subr.bf16.mxu1 %v3574_v31 }
  0x35   : > { %3040 = vmatpush3.bf16.msra.mxu0 %v3483_v5  ;;  %v381_v54 = vsel %vm329_vm9, %v303_v19, %v355_v50  ;;  %v808_v2 = vsub.f32 %v3466_v55, %v807_v7  ;;  %v814_v53 = vand.u32 4294901760, %v3468_v56  ;;  %v556_v24 = vand.u32 4294901760, %v555_v35 }
  0x36   : > { %2731 = vmatprep.mubr.f32.mxu0 %v4174_v38  ;;  %3042 = vmatprep.subr.bf16.mxu0 %v3564_v9  ;;  %v575_v57 = vsub.f32 %v3641_v10, %v4131_v11  ;;  %v3663_v38 = vsub.f32 %v380_v30, %v3649_v45  ;;  %v3665_v5 = vand.u32 4294901760, %v381_v54  ;;  %v4176_v19 = vand.u32 4294901760, %v3535_v13  ;;  %v241_v13 = vld [vmem:[%s3447_s10 + $0x68] sm:$0xff] }
  0x37   : > { %2519 = vmatmul.mubr.f32.gmra.mrb[2].mxu1 %v536_v3  ;;  %v566_v0 = vand.u32 4294901760, %v565_v47  ;;  %v382_v35 = vsel %vm330_vm10, %v304_v34, %v356_v29  ;;  %vm331_vm11 = vcmp.ge.f32.partialorder %v305_v62, 0.0  ;;  %v357_v50 = vmul.f32 0.2, %v305_v62 }
  0x38   : > { %4175 = vst [vmem:[#allocation13_spill] sm:$0xff] %v3663_v38  ;;  %2732 = vmatmul.mubr.f32.gmra.mrb[2].mxu0 %v4176_v19  ;;  %2521 = vmatprep.mubr.f32.mxu1 %v546_v12  ;;  %v4177_v8 = vand.u32 4294901760, %v3552_v61  ;;  %v584_v11 = vand.u32 4294901760, %v3663_v38  ;;  %v3674_v30 = vsub.f32 %v381_v54, %v3665_v5  ;;  %v3676_v6 = vand.u32 4294901760, %v382_v35 }
  0x39   : > { %v809_v3 = vand.u32 4294901760, %v808_v2  ;;  %2948 = vmatpush3.bf16.msra.mxu1 %v3574_v31  ;;  %3044 = vmatpush3.bf16.msra.mxu0 %v3564_v9  ;;  %v576_v34 = vand.u32 4294901760, %v575_v57  ;;  %v383_v47 = vsel %vm331_vm11, %v305_v62, %v357_v50  ;;  %v815_v12 = vsub.f32 %v3468_v56, %v814_v53 }
  0x3a   : > { %2734 = vmatprep.mubr.f32.mxu0 %v4177_v8  ;;  %4178 = vst [vmem:[#allocation14_spill] sm:$0xff] %v3674_v30  ;;  %v3049_v29 = vpack.c.bf16 %v814_v53, %v807_v7  ;;  %2950 = vmatprep.subr.bf16.mxu1 %v3629_v60  ;;  %v585_v8 = vsub.f32 %v3663_v38, %v584_v11  ;;  %v594_v54 = vand.u32 4294901760, %v3674_v30  ;;  %v3690_v19 = vand.u32 4294901760, %v383_v47 }
  0x3b   : > { %3046 = vmatprep.subr.bf16.mxu0 %v3618_v40  ;;  %v3688_v2 = vsub.f32 %v382_v35, %v3676_v6  ;;  %2522 = vmatmul.mubr.f32.gmra.mrb[4].mxu1 %v556_v24  ;;  %v4180_v31 = vand.u32 4294901760, %v3601_v4  ;;  %v816_v9 = vand.u32 4294901760, %v815_v12  ;;  %v273_v7 = vmul.f32 %v3429_v41, %v240_v1 }
  0x3c   : > { %v274_v62 = vmul.f32 %v3429_v41, %v241_v13  ;;  %v4181_v53 = vand.u32 4294901760, %v3340_v14  ;;  %2524 = vmatprep.mubr.f32.mxu1 %v566_v0  ;;  %v586_v35 = vand.u32 4294901760, %v585_v8  ;;  %v595_v50 = vsub.f32 %v3674_v30, %v594_v54 }
  0x3d   : > { %4179 = vst [vmem:[#allocation15_spill] sm:$0xff] %v3688_v2  ;;  %2735 = vmatmul.mubr.f32.gmra.mrb[4].mxu0 %v4180_v31  ;;  %v604_v24 = vand.u32 4294901760, %v3688_v2  ;;  %v3704_v31 = vsub.f32 %v383_v47, %v3690_v19  ;;  %2952 = vmatpush3.bf16.msra.mxu1 %v3629_v60  ;;  %v2953_v1 = vpack.c.bf16 %v816_v9, %v809_v3  ;;  %v4183_v47 = vand.u32 4294901760, %v3347_v18 }
  0x3e   : > { %v3699_v57 = vsub.f32 %v3340_v14, %v4181_v53  ;;  %2737 = vmatprep.mubr.f32.mxu0 %v564_v58  ;;  %3048 = vmatpush3.bf16.msra.mxu0 %v3618_v40  ;;  %v306_v13 = vadd.f32 %v3452_v46, %v273_v7  ;;  %v307_v14 = vadd.f32 %v3452_v46, %v274_v62  ;;  %v596_v0 = vand.u32 4294901760, %v595_v50  ;;  %v242_v40 = vld [vmem:[%s3447_s10 + $0x70] sm:$0xff] }
  0x3f   : > { %4182 = vst [vmem:[#allocation16_spill] sm:$0xff] %v3704_v31  ;;  %v605_v12 = vsub.f32 %v3688_v2, %v604_v24  ;;  %v614_v8 = vand.u32 4294901760, %v3704_v31  ;;  %3050 = vmatprep.subr.bf16.mxu0 %v3049_v29  ;;  %v3716_v60 = vsub.f32 %v3347_v18, %v4183_v47  ;;  %2525 = vmatmul.mubr.f32.gmra.mrb[6].mxu1 %v576_v34  ;;  %v4184_v3 = vand.u32 4294901760, %v3641_v10  ;;  %v243_v18 = vld [vmem:[%s3447_s10 + $0x78] sm:$0xff] }
  0x40   : > { %v821_v58 = vand.u32 4294901760, %v3699_v57  ;;  %vm332_vm12 = vcmp.ge.f32.partialorder %v306_v13, 0.0  ;;  %v358_v9 = vmul.f32 0.2, %v306_v13  ;;  %vm333_vm13 = vcmp.ge.f32.partialorder %v307_v14, 0.0  ;;  %2527 = vmatprep.mubr.f32.mxu1 %v586_v35  ;;  %2954 = vmatprep.subr.bf16.mxu1 %v2953_v1 }
  0x41   : > { %2738 = vmatmul.mubr.f32.gmra.mrb[6].mxu0 %v4184_v3  ;;  %v359_v7 = vmul.f32 0.2, %v307_v14  ;;  %v606_v62 = vand.u32 4294901760, %v605_v12  ;;  %v615_v53 = vsub.f32 %v3704_v31, %v614_v8  ;;  %v828_v2 = vand.u32 4294901760, %v3716_v60  ;;  %2956 = vmatpush3.bf16.msra.mxu1 %v2953_v1 }
  0x42   : > { %2740 = vmatprep.mubr.f32.mxu0 %v584_v11  ;;  %v822_v50 = vsub.f32 %v3699_v57, %v821_v58  ;;  %v384_v34 = vsel %vm332_vm12, %v306_v13, %v358_v9  ;;  %3052 = vmatpush3.bf16.msra.mxu0 %v3049_v29  ;;  %v275_v3 = vmul.f32 %v3429_v41, %v242_v40  ;;  %v244_v13 = vld [vmem:[%s3447_s10 + $0x80] sm:$0xff]  ;;  %v245_v29 = vld [vmem:[%s3447_s10 + $0x88] sm:$0xff] }
  0x43   : > { %v385_v47 = vsel %vm333_vm13, %v307_v14, %v359_v7  ;;  %v616_v30 = vand.u32 4294901760, %v615_v53  ;;  %v3726_v35 = vand.u32 4294901760, %v384_v34  ;;  %2528 = vmatmul.mubr.f32.gmra.mrb[8].mxu1 %v596_v0  ;;  %v829_v31 = vsub.f32 %v3716_v60, %v828_v2 }
  0x44   : > { %v3728_v11 = vand.u32 4294901760, %v385_v47  ;;  %v823_v12 = vand.u32 4294901760, %v822_v50  ;;  %v308_v38 = vadd.f32 %v3452_v46, %v275_v3  ;;  %v276_v10 = vmul.f32 %v3429_v41, %v243_v18  ;;  %2530 = vmatprep.mubr.f32.mxu1 %v606_v62 }
  0x45   : > { %2741 = vmatmul.mubr.f32.gmra.mrb[8].mxu0 %v594_v54  ;;  %v3736_v14 = vsub.f32 %v384_v34, %v3726_v35  ;;  %v3053_v40 = vpack.c.bf16 %v828_v2, %v821_v58  ;;  %v830_v0 = vand.u32 4294901760, %v829_v31  ;;  %v277_v62 = vmul.f32 %v3429_v41, %v244_v13 }
  0x46   : > { %2743 = vmatprep.mubr.f32.mxu0 %v604_v24  ;;  %v3739_v1 = vsub.f32 %v385_v47, %v3728_v11  ;;  %vm334_vm14 = vcmp.ge.f32.partialorder %v308_v38, 0.0  ;;  %v360_v54 = vmul.f32 0.2, %v308_v38  ;;  %v309_v9 = vadd.f32 %v3452_v46, %v276_v10 }
  0x47   : > { %4185 = vst [vmem:[#allocation17_spill] sm:$0xff] %v3736_v14  ;;  %v624_v7 = vand.u32 4294901760, %v3736_v14  ;;  %3054 = vmatprep.subr.bf16.mxu0 %v3053_v40  ;;  %v278_v24 = vmul.f32 %v3429_v41, %v245_v29  ;;  %2531 = vmatmul.mubr.f32.gmra.mrb[10].mxu1 %v616_v30  ;;  %v2957_v50 = vpack.c.bf16 %v830_v0, %v823_v12  ;;  %v4188_v3 = vand.u32 4294901760, %v3358_v21 }
  0x48   : > { %4186 = vst [vmem:[#allocation18_spill] sm:$0xff] %v3739_v1  ;;  %v634_v53 = vand.u32 4294901760, %v3739_v1  ;;  %v386_v18 = vsel %vm334_vm14, %v308_v38, %v360_v54  ;;  %vm335_vm15 = vcmp.ge.f32.partialorder %v309_v9, 0.0  ;;  %v361_v2 = vmul.f32 0.2, %v309_v9  ;;  %3056 = vmatpush3.bf16.msra.mxu0 %v3053_v40  ;;  %v246_v54 = vld [vmem:[%s3447_s10 + $0x90] sm:$0xff] }
  0x49   : > { %2744 = vmatmul.mubr.f32.gmra.mrb[10].mxu0 %v614_v8  ;;  %v625_v31 = vsub.f32 %v3736_v14, %v624_v7  ;;  %v3748_v58 = vand.u32 4294901760, %v386_v18  ;;  %v310_v34 = vadd.f32 %v3452_v46, %v277_v62  ;;  %2958 = vmatprep.subr.bf16.mxu1 %v2957_v50  ;;  %v311_v30 = vadd.f32 %v3452_v46, %v278_v24 }
  0x4a   : > { %2746 = vmatprep.mubr.f32.mxu0 %v624_v7  ;;  %v635_v10 = vsub.f32 %v3739_v1, %v634_v53  ;;  %v387_v47 = vsel %vm335_vm15, %v309_v9, %v361_v2  ;;  %v4187_v38 = vand.u32 4294901760, %v3353_v20  ;;  %v3760_v12 = vsub.f32 %v3358_v21, %v4188_v3  ;;  %2960 = vmatpush3.bf16.msra.mxu1 %v2957_v50  ;;  %v247_v9 = vld [vmem:[%s3447_s10 + $0x98] sm:$0xff] }
  0x4b   : > { %v626_v13 = vand.u32 4294901760, %v625_v31  ;;  %v3763_v40 = vsub.f32 %v386_v18, %v3748_v58  ;;  %v3765_v0 = vand.u32 4294901760, %v387_v47  ;;  %vm336_vm0 = vcmp.ge.f32.partialorder %v310_v34, 0.0 }
  0x4c   : > { %v3755_v8 = vsub.f32 %v3353_v20, %v4187_v38  ;;  %v636_v29 = vand.u32 4294901760, %v635_v10  ;;  %v362_v7 = vmul.f32 0.2, %v310_v34  ;;  %vm337_vm1 = vcmp.ge.f32.partialorder %v311_v30, 0.0 }
  0x4d   : > { %4189 = vst [vmem:[#allocation19_spill] sm:$0xff] %v3763_v40  ;;  %2747 = vmatmul.mubr.f32.gmra.mrb[12].mxu0 %v634_v53  ;;  %v363_v20 = vmul.f32 0.2, %v311_v30  ;;  %2533 = vmatprep.mubr.f32.mxu1 %v626_v13  ;;  %v644_v62 = vand.u32 4294901760, %v3763_v40  ;;  %v3771_v21 = vsub.f32 %v387_v47, %v3765_v0  ;;  %v842_v18 = vand.u32 4294901760, %v3760_v12 }
  0x4e   : > { %v835_v24 = vand.u32 4294901760, %v3755_v8  ;;  %2534 = vmatmul.mubr.f32.gmra.mrb[12].mxu1 %v636_v29  ;;  %v388_v50 = vsel %vm336_vm0, %v310_v34, %v362_v7  ;;  %v279_v31 = vmul.f32 %v3429_v41, %v246_v54  ;;  %v280_v53 = vmul.f32 %v3429_v41, %v247_v9 }
  0x4f   : > { %4190 = vst [vmem:[#allocation20_spill] sm:$0xff] %v3771_v21  ;;  %v389_v2 = vsel %vm337_vm1, %v311_v30, %v363_v20  ;;  %v645_v10 = vsub.f32 %v3763_v40, %v644_v62  ;;  %2749 = vmatprep.mubr.f32.mxu0 %v644_v62  ;;  %v654_v38 = vand.u32 4294901760, %v3771_v21  ;;  %v3779_v3 = vand.u32 4294901760, %v388_v50  ;;  %v248_v62 = vld [vmem:[%s3447_s10 + $0xa0] sm:$0xff] }
  0x50   : > { %v3781_v47 = vand.u32 4294901760, %v389_v2  ;;  %v836_v13 = vsub.f32 %v3755_v8, %v835_v24  ;;  %v843_v29 = vsub.f32 %v3760_v12, %v842_v18  ;;  %v312_v34 = vadd.f32 %v3452_v46, %v279_v31 }
  0x51   : > { %v3057_v30 = vpack.c.bf16 %v842_v18, %v835_v24  ;;  %v646_v54 = vand.u32 4294901760, %v645_v10  ;;  %v655_v7 = vsub.f32 %v3771_v21, %v654_v38  ;;  %2750 = vmatmul.mubr.f32.gmra.mrb[14].mxu0 %v654_v38  ;;  %v3788_v9 = vsub.f32 %v388_v50, %v3779_v3 }
  0x52   : > { %v3791_v20 = vsub.f32 %v389_v2, %v3781_v47  ;;  %v837_v40 = vand.u32 4294901760, %v836_v13  ;;  %v844_v1 = vand.u32 4294901760, %v843_v29  ;;  %vm338_vm2 = vcmp.ge.f32.partialorder %v312_v34, 0.0  ;;  %v249_v29 = vld [vmem:[%s3447_s10 + $0xa8] sm:$0xff] }
  0x53   : > { %4191 = vst [vmem:[#allocation21_spill] sm:$0xff] %v3788_v9  ;;  %v364_v14 = vmul.f32 0.2, %v312_v34  ;;  %3058 = vmatprep.subr.bf16.mxu0 %v3057_v30  ;;  %2536 = vmatprep.mubr.f32.mxu1 %v646_v54  ;;  %v656_v31 = vand.u32 4294901760, %v655_v7  ;;  %v664_v24 = vand.u32 4294901760, %v3788_v9  ;;  %v313_v10 = vadd.f32 %v3452_v46, %v280_v53 }
  0x54   : > { %4192 = vst [vmem:[#allocation22_spill] sm:$0xff] %v3791_v20  ;;  %v674_v18 = vand.u32 4294901760, %v3791_v20  ;;  %3060 = vmatpush3.bf16.msra.mxu0 %v3057_v30  ;;  %v2961_v50 = vpack.c.bf16 %v844_v1, %v837_v40  ;;  %v281_v2 = vmul.f32 %v3429_v41, %v248_v62  ;;  %v4193_v21 = vand.u32 4294901760, %v3367_v25 }
  0x55   : > { %v390_v38 = vsel %vm338_vm2, %v312_v34, %v364_v14  ;;  %2537 = vmatmul.mubr.f32.gmra.mrb[14].mxu1 %v656_v31  ;;  %v665_v54 = vsub.f32 %v3788_v9, %v664_v24  ;;  %2752 = vmatprep.mubr.f32.mxu0 %v664_v24  ;;  %vm339_vm3 = vcmp.ge.f32.partialorder %v313_v10, 0.0  ;;  %v365_v14 = vmul.f32 0.2, %v313_v10  ;;  %v250_v24 = vld [vmem:[%s3447_s10 + $0xb0] sm:$0xff] }
  0x56   : > { %v3801_v13 = vsub.f32 %v3367_v25, %v4193_v21  ;;  %v675_v7 = vsub.f32 %v3791_v20, %v674_v18  ;;  %v3806_v53 = vand.u32 4294901760, %v390_v38  ;;  %2753 = vmatmul.mubr.f32.gmra.mrb[16].mxu0 %v674_v18  ;;  %2962 = vmatprep.subr.bf16.mxu1 %v2961_v50  ;;  %v314_v1 = vadd.f32 %v3452_v46, %v281_v2  ;;  %v251_v18 = vld [vmem:[%s3447_s10 + $0xb8] sm:$0xff] }
  0x57   : > { %v4195_v40 = vand.u32 4294901760, %v3372_v26  ;;  %v666_v34 = vand.u32 4294901760, %v665_v54  ;;  %2964 = vmatpush3.bf16.msra.mxu1 %v2961_v50  ;;  %v282_v31 = vmul.f32 %v3429_v41, %v249_v29  ;;  %v391_v20 = vsel %vm339_vm3, %v313_v10, %v365_v14 }
  0x58   : > { %4194 = vst [vmem:[#allocation23_spill] sm:$0xff] %v3806_v53  ;;  %v849_v25 = vand.u32 4294901760, %v3801_v13  ;;  %v676_v30 = vand.u32 4294901760, %v675_v7  ;;  %v3816_v62 = vsub.f32 %v390_v38, %v3806_v53  ;;  %vm340_vm4 = vcmp.ge.f32.partialorder %v314_v1, 0.0 }
  0x59   : > { %v3813_v21 = vsub.f32 %v3372_v26, %v4195_v40  ;;  %v366_v2 = vmul.f32 0.2, %v314_v1  ;;  %2539 = vmatprep.mubr.f32.mxu1 %v666_v34  ;;  %v3823_v26 = vand.u32 4294901760, %v391_v20  ;;  %v315_v50 = vadd.f32 %v3452_v46, %v282_v31 }
  0x5a   : > { %4196 = vst [vmem:[#allocation24_spill] sm:$0xff] %v3816_v62  ;;  %v850_v9 = vsub.f32 %v3801_v13, %v849_v25  ;;  %v684_v4 = vand.u32 4294901760, %v3816_v62  ;;  %2540 = vmatmul.mubr.f32.gmra.mrb[16].mxu1 %v676_v30  ;;  %v283_v29 = vmul.f32 %v3429_v41, %v250_v24  ;;  %v284_v10 = vmul.f32 %v3429_v41, %v251_v18 }
  0x5b   : > { %v856_v54 = vand.u32 4294901760, %v3813_v21  ;;  %v392_v38 = vsel %vm340_vm4, %v314_v1, %v366_v2  ;;  %v3831_v40 = vsub.f32 %v391_v20, %v3823_v26  ;;  %vm341_vm5 = vcmp.ge.f32.partialorder %v315_v50, 0.0 }
  0x5c   : > { %v851_v7 = vand.u32 4294901760, %v850_v9  ;;  %v685_v14 = vsub.f32 %v3816_v62, %v684_v4  ;;  %2755 = vmatprep.mubr.f32.mxu0 %v684_v4  ;;  %v3833_v34 = vand.u32 4294901760, %v392_v38  ;;  %v367_v53 = vmul.f32 0.2, %v315_v50 }
  0x5d   : > { %4197 = vst [vmem:[#allocation25_spill] sm:$0xff] %v3831_v40  ;;  %v857_v61 = vsub.f32 %v3813_v21, %v856_v54  ;;  %v3061_v31 = vpack.c.bf16 %v856_v54, %v849_v25  ;;  %v316_v1 = vadd.f32 %v3452_v46, %v283_v29  ;;  %v694_v30 = vand.u32 4294901760, %v3831_v40 }
  0x5e   : > { %v686_v9 = vand.u32 4294901760, %v685_v14  ;;  %v3839_v24 = vsub.f32 %v392_v38, %v3833_v34  ;;  %v393_v18 = vsel %vm341_vm5, %v315_v50, %v367_v53  ;;  %v317_v2 = vadd.f32 %v3452_v46, %v284_v10  ;;  %v252_v14 = vld [vmem:[%s3447_s10 + $0xc0] sm:$0xff] }
  0x5f   : > { %v858_v4 = vand.u32 4294901760, %v857_v61  ;;  %3062 = vmatprep.subr.bf16.mxu0 %v3061_v31  ;;  %vm342_vm6 = vcmp.ge.f32.partialorder %v316_v1, 0.0  ;;  %v368_v20 = vmul.f32 0.2, %v316_v1  ;;  %v695_v62 = vsub.f32 %v3831_v40, %v694_v30  ;;  %2756 = vmatmul.mubr.f32.gmra.mrb[18].mxu0 %v694_v30 }
  0x60   : > { %4198 = vst [vmem:[#allocation26_spill] sm:$0xff] %v3839_v24  ;;  %2542 = vmatprep.mubr.f32.mxu1 %v686_v9  ;;  %v704_v25 = vand.u32 4294901760, %v3839_v24  ;;  %v3844_v29 = vand.u32 4294901760, %v393_v18  ;;  %3064 = vmatpush3.bf16.msra.mxu0 %v3061_v31  ;;  %vm343_vm7 = vcmp.ge.f32.partialorder %v317_v2, 0.0  ;;  %v369_v61 = vmul.f32 0.2, %v317_v2 }
  0x61   : > { %v2965_v54 = vpack.c.bf16 %v858_v4, %v851_v7  ;;  %v394_v38 = vsel %vm342_vm6, %v316_v1, %v368_v20  ;;  %v4200_v53 = vand.u32 4294901760, %v3377_v27  ;;  %v696_v10 = vand.u32 4294901760, %v695_v62  ;;  %v253_v4 = vld [vmem:[%s3447_s10 + $0xc8] sm:$0xff] }
  0x62   : > { %4199 = vst [vmem:[#allocation27_spill] sm:$0xff] %v3844_v29  ;;  %v705_v9 = vsub.f32 %v3839_v24, %v704_v25  ;;  %2758 = vmatprep.mubr.f32.mxu0 %v704_v25  ;;  %v3854_v30 = vsub.f32 %v393_v18, %v3844_v29  ;;  %v3856_v7 = vand.u32 4294901760, %v394_v38  ;;  %v395_v31 = vsel %vm343_vm7, %v317_v2, %v369_v61 }
  0x63   : > { %v3850_v50 = vsub.f32 %v3377_v27, %v4200_v53  ;;  %2966 = vmatprep.subr.bf16.mxu1 %v2965_v54  ;;  %v4203_v20 = vand.u32 4294901760, %v3390_v32  ;;  %v285_v62 = vmul.f32 %v3429_v41, %v252_v14  ;;  %2543 = vmatmul.mubr.f32.gmra.mrb[18].mxu1 %v696_v10  ;;  %v3870_v24 = vand.u32 4294901760, %v395_v31 }
  0x64   : > { %4201 = vst [vmem:[#allocation28_spill] sm:$0xff] %v3854_v30  ;;  %4202 = vst [vmem:[#allocation29_spill] sm:$0xff] %v3856_v7  ;;  %2968 = vmatpush3.bf16.msra.mxu1 %v2965_v54  ;;  %v706_v53 = vand.u32 4294901760, %v705_v9  ;;  %v714_v25 = vand.u32 4294901760, %v3854_v30  ;;  %v3868_v18 = vsub.f32 %v394_v38, %v3856_v7 }
  0x65   : > { %v863_v1 = vand.u32 4294901760, %v3850_v50  ;;  %v3863_v27 = vsub.f32 %v3390_v32, %v4203_v20  ;;  %4205 = vst [vmem:[#allocation31_spill] sm:$0xff] %v3870_v24  ;;  %v318_v61 = vadd.f32 %v3452_v46, %v285_v62  ;;  %v286_v32 = vmul.f32 %v3429_v41, %v253_v4 }
  0x66   : > { %4204 = vst [vmem:[#allocation30_spill] sm:$0xff] %v3868_v18  ;;  %2545 = vmatprep.mubr.f32.mxu1 %v706_v53  ;;  %v715_v14 = vsub.f32 %v3854_v30, %v714_v25  ;;  %2759 = vmatmul.mubr.f32.gmra.mrb[20].mxu0 %v714_v25  ;;  %v724_v10 = vand.u32 4294901760, %v3868_v18  ;;  %v3879_v9 = vsub.f32 %v395_v31, %v3870_v24 }
  0x67   : > { %v864_v2 = vsub.f32 %v3850_v50, %v863_v1  ;;  %v870_v54 = vand.u32 4294901760, %v3863_v27  ;;  %vm344_vm8 = vcmp.ge.f32.partialorder %v318_v61, 0.0  ;;  %v370_v40 = vmul.f32 0.2, %v318_v61 }
  0x68   : > { %v716_v7 = vand.u32 4294901760, %v715_v14  ;;  %v725_v29 = vsub.f32 %v3868_v18, %v724_v10  ;;  %2761 = vmatprep.mubr.f32.mxu0 %v724_v10  ;;  %v734_v41 = vand.u32 4294901760, %v3879_v9  ;;  %v319_v4 = vadd.f32 %v3452_v46, %v286_v32 }
  0x69   : > { %v865_v38 = vand.u32 4294901760, %v864_v2  ;;  %v871_v20 = vsub.f32 %v3863_v27, %v870_v54  ;;  %v396_v53 = vsel %vm344_vm8, %v318_v61, %v370_v40  ;;  %v3065_v25 = vpack.c.bf16 %v870_v54, %v863_v1  ;;  %v4039_v54 = vld [vmem:[%s4107_s4] ss:$0 sm:$0xff] }
  0x6a   : > { %2546 = vmatmul.mubr.f32.gmra.mrb[20].mxu1 %v716_v7  ;;  %v726_v30 = vand.u32 4294901760, %v725_v29  ;;  %v735_v31 = vsub.f32 %v3879_v9, %v734_v41  ;;  %2762 = vmatmul.mubr.f32.gmra.mrb[22].mxu0 %v734_v41  ;;  %v3886_v2 = vand.u32 4294901760, %v396_v53  ;;  %vm345_vm9 = vcmp.ge.f32.partialorder %v319_v4, 0.0 }
  0x6b   : > { %v872_v62 = vand.u32 4294901760, %v871_v20  ;;  %v371_v14 = vmul.f32 0.2, %v319_v4  ;;  %3066 = vmatprep.subr.bf16.mxu0 %v3065_v25  ;;  %v2985_v10 = vpack.c.bf16 %v3468_v56, %v3466_v55  ;;  %v2973_v40 = vpack.c.bf16 %v3417_v39, %v3401_v36 }
  0x6c   : > { %2548 = vmatprep.mubr.f32.mxu1 %v726_v30  ;;  %v736_v18 = vand.u32 4294901760, %v735_v31  ;;  %v3891_v46 = vsub.f32 %v396_v53, %v3886_v2  ;;  %3068 = vmatpush3.bf16.msra.mxu0 %v3065_v25  ;;  %v2989_v29 = vpack.c.bf16 %v3716_v60, %v3699_v57 }
  0x6d   : > { %v2969_v24 = vpack.c.bf16 %v872_v62, %v865_v38  ;;  %v397_v7 = vsel %vm345_vm9, %v319_v4, %v371_v14  ;;  %3070 = vmatprep.subr.bf16.mxu0 %v3342_v15 }
  0x6e   : > { %2549 = vmatmul.mubr.f32.gmra.mrb[22].mxu1 %v736_v18  ;;  %v744_v1 = vand.u32 4294901760, %v3891_v46  ;;  %v3899_v55 = vand.u32 4294901760, %v397_v7  ;;  %v2981_v18 = vpack.c.bf16 %v3457_v49, %v3455_v48  ;;  %v4210_v48 = vld [vmem:[#allocation27_spill] sm:$0xff]  ;;  %v4211_v49 = vld [vmem:[#allocation29_spill] sm:$0xff] }
  0x6f   : > { %2970 = vmatprep.subr.bf16.mxu1 %v2969_v24 }
  0x70   : > { %2972 = vmatpush3.bf16.msra.mxu1 %v2969_v24  ;;  %v745_v56 = vsub.f32 %v3891_v46, %v744_v1  ;;  %2764 = vmatprep.mubr.f32.mxu0 %v744_v1  ;;  %v3903_v30 = vsub.f32 %v397_v7, %v3899_v55  ;;  %v2977_v24 = vpack.c.bf16 %v3434_v44, %v3432_v43  ;;  %v4208_v43 = vld [vmem:[#allocation4_spill] sm:$0xff]  ;;  %v4209_v44 = vld [vmem:[#allocation23_spill] sm:$0xff] }
  0x71   : > { %2974 = vmatprep.subr.bf16.mxu1 %v2973_v40 }
  0x72   : > { %v746_v36 = vand.u32 4294901760, %v745_v56  ;;  %v754_v39 = vand.u32 4294901760, %v3903_v30 }
  0x74   : > { %2551 = vmatprep.mubr.f32.mxu1 %v746_v36  ;;  %v755_v57 = vsub.f32 %v3903_v30, %v754_v39  ;;  %2765 = vmatmul.mubr.f32.gmra.mrb[24].mxu0 %v754_v39 }
  0x75   : > { %2799 = vmatprep.mubr.f32.mxu0 %v3501_v51 }
  0x76   : > { %v756_v60 = vand.u32 4294901760, %v755_v57 }
  0x78   : > { %2552 = vmatmul.mubr.f32.gmra.mrb[24].mxu1 %v756_v60  ;;  %2800 = vmatmul.mubr.f32.vlgmr.msra.gmra.mrb[0].mxu0 %v3503_v52 }
  0x79   : > { %2586 = vmatprep.mubr.f32.mxu1 %v3501_v51  ;;  %2802 = vmatprep.mubr.f32.mxu0 %v3510_v59 }
  0x7a   : > { %3072 = vmatpush3.bf16.msra.mxu0 %v3342_v15  ;;  %v2993_v15 = vpack.c.bf16 %v3760_v12, %v3755_v8  ;;  %v4212_v8 = vld [vmem:[#allocation31_spill] sm:$0xff]  ;;  %v4213_v12 = vld [vmem:[#allocation5_spill] sm:$0xff] }
  0x7b   : > { %3074 = vmatprep.subr.bf16.mxu0 %v3360_v22 }
  0x7c   : > { %2587 = vmatmul.mubr.f32.vlgmr.msra.gmra.mrb[0].mxu1 %v3503_v52  ;;  %2803 = vmatmul.mubr.f32.gmra.mrb[2].mxu0 %v3519_v63 }
  0x7d   : > { %2976 = vmatpush3.bf16.msra.mxu1 %v2973_v40  ;;  %2589 = vmatprep.mubr.f32.mxu1 %v3510_v59 }
  0x7e   : > { %2978 = vmatprep.subr.bf16.mxu1 %v2977_v24  ;;  %2805 = vmatprep.mubr.f32.mxu0 %v3537_v17 }
  0x7f   : > { %3076 = vmatpush3.bf16.msra.mxu0 %v3360_v22  ;;  %v4206_v22 = vld [vmem:[#allocation2_spill] sm:$0xff] }
  0x80   : > { %2590 = vmatmul.mubr.f32.gmra.mrb[2].mxu1 %v3519_v63  ;;  %2806 = vmatmul.mubr.f32.gmra.mrb[4].mxu0 %v3588_v42 }
  0x81   : > { %2592 = vmatprep.mubr.f32.mxu1 %v3537_v17  ;;  %2980 = vmatpush3.bf16.msra.mxu1 %v2977_v24 }
  0x82   : > { %2808 = vmatprep.mubr.f32.mxu0 %v3610_v16  ;;  %2982 = vmatprep.subr.bf16.mxu1 %v2981_v18 }
  0x83   : > { %3078 = vmatprep.subr.bf16.mxu0 %v3382_v28 }
  0x84   : > { %2593 = vmatmul.mubr.f32.gmra.mrb[4].mxu1 %v3588_v42  ;;  %2809 = vmatmul.mubr.f32.gmra.mrb[6].mxu0 %v3627_v23 }
  0x85   : > { %2595 = vmatprep.mubr.f32.mxu1 %v3610_v16  ;;  %2984 = vmatpush3.bf16.msra.mxu1 %v2981_v18 }
  0x86   : > { %2811 = vmatprep.mubr.f32.mxu0 %v3649_v45  ;;  %3080 = vmatpush3.bf16.msra.mxu0 %v3382_v28  ;;  %v2997_v28 = vpack.c.bf16 %v3813_v21, %v3801_v13  ;;  %v4214_v13 = vld [vmem:[#allocation6_spill] sm:$0xff]  ;;  %v4215_v21 = vld [vmem:[#allocation7_spill] sm:$0xff] }
  0x87   : > { %2986 = vmatprep.subr.bf16.mxu1 %v2985_v10  ;;  %3082 = vmatprep.subr.bf16.mxu0 %v3394_v33 }
  0x88   : > { %2596 = vmatmul.mubr.f32.gmra.mrb[6].mxu1 %v3627_v23  ;;  %2812 = vmatmul.mubr.f32.gmra.mrb[8].mxu0 %v3665_v5 }
  0x89   : > { %2598 = vmatprep.mubr.f32.mxu1 %v3649_v45  ;;  %2814 = vmatprep.mubr.f32.mxu0 %v3676_v6 }
  0x8a   : > { %2988 = vmatpush3.bf16.msra.mxu1 %v2985_v10  ;;  %3084 = vmatpush3.bf16.msra.mxu0 %v3394_v33  ;;  %v4207_v33 = vld [vmem:[#allocation3_spill] sm:$0xff] }
  0x8b   : > { %2990 = vmatprep.subr.bf16.mxu1 %v2989_v29  ;;  %3086 = vmatprep.subr.bf16.mxu0 %v3409_v37 }
  0x8c   : > { %2599 = vmatmul.mubr.f32.gmra.mrb[8].mxu1 %v3665_v5  ;;  %2815 = vmatmul.mubr.f32.gmra.mrb[10].mxu0 %v3690_v19 }
  0x8d   : > { %2601 = vmatprep.mubr.f32.mxu1 %v3676_v6  ;;  %2817 = vmatprep.mubr.f32.mxu0 %v3726_v35 }
  0x8e   : > { %2992 = vmatpush3.bf16.msra.mxu1 %v2989_v29  ;;  %3088 = vmatpush3.bf16.msra.mxu0 %v3409_v37  ;;  %v3001_v37 = vpack.c.bf16 %v3863_v27, %v3850_v50  ;;  %v4216_v50 = vld [vmem:[#allocation8_spill] sm:$0xff]  ;;  %v4235_v27 = vld [vmem:[#allocation30_spill] sm:$0xff] }
  0x8f   : > { %2994 = vmatprep.subr.bf16.mxu1 %v2993_v15  ;;  %3090 = vmatprep.subr.bf16.mxu0 %v4206_v22 }
  0x90   : > { %2602 = vmatmul.mubr.f32.gmra.mrb[10].mxu1 %v3690_v19  ;;  %2818 = vmatmul.mubr.f32.gmra.mrb[12].mxu0 %v3728_v11 }
  0x91   : > { %2604 = vmatprep.mubr.f32.mxu1 %v3726_v35  ;;  %2820 = vmatprep.mubr.f32.mxu0 %v3748_v58 }
  0x92   : > { %2996 = vmatpush3.bf16.msra.mxu1 %v2993_v15  ;;  %3092 = vmatpush3.bf16.msra.mxu0 %v4206_v22 }
  0x93   : > { %2998 = vmatprep.subr.bf16.mxu1 %v2997_v28  ;;  %3094 = vmatprep.subr.bf16.mxu0 %v4207_v33 }
  0x94   : > { %2605 = vmatmul.mubr.f32.gmra.mrb[12].mxu1 %v3728_v11  ;;  %2821 = vmatmul.mubr.f32.gmra.mrb[14].mxu0 %v3765_v0 }
  0x95   : > { %2607 = vmatprep.mubr.f32.mxu1 %v3748_v58  ;;  %2823 = vmatprep.mubr.f32.mxu0 %v3779_v3 }
  0x96   : > { %3000 = vmatpush3.bf16.msra.mxu1 %v2997_v28  ;;  %3096 = vmatpush3.bf16.msra.mxu0 %v4207_v33 }
  0x97   : > { %3002 = vmatprep.subr.bf16.mxu1 %v3001_v37  ;;  %3098 = vmatprep.subr.bf16.mxu0 %v4208_v43 }
  0x98   : > { %2608 = vmatmul.mubr.f32.gmra.mrb[14].mxu1 %v3765_v0  ;;  %2824 = vmatmul.mubr.f32.gmra.mrb[16].mxu0 %v3781_v47 }
  0x99   : > { %2610 = vmatprep.mubr.f32.mxu1 %v3779_v3  ;;  %2826 = vmatprep.mubr.f32.mxu0 %v4209_v44 }
  0x9a   : > { %3004 = vmatpush3.bf16.msra.mxu1 %v3001_v37  ;;  %3100 = vmatpush3.bf16.msra.mxu0 %v4208_v43 }
  0x9c   : > { %2611 = vmatmul.mubr.f32.gmra.mrb[16].mxu1 %v3781_v47  ;;  %2827 = vmatmul.mubr.f32.gmra.mrb[18].mxu0 %v3823_v26 }
  0x9d   : > { %2613 = vmatprep.mubr.f32.mxu1 %v4209_v44  ;;  %2829 = vmatprep.mubr.f32.mxu0 %v3833_v34 }
  0xa0   : > { %2614 = vmatmul.mubr.f32.gmra.mrb[18].mxu1 %v3823_v26  ;;  %2830 = vmatmul.mubr.f32.gmra.mrb[20].mxu0 %v4210_v48 }
  0xa1   : > { %2616 = vmatprep.mubr.f32.mxu1 %v3833_v34  ;;  %2832 = vmatprep.mubr.f32.mxu0 %v4211_v49 }
  0xa4   : > { %2617 = vmatmul.mubr.f32.gmra.mrb[20].mxu1 %v4210_v48  ;;  %2833 = vmatmul.mubr.f32.gmra.mrb[22].mxu0 %v4212_v8 }
  0xa5   : > { %2619 = vmatprep.mubr.f32.mxu1 %v4211_v49  ;;  %2835 = vmatprep.mubr.f32.mxu0 %v3886_v2 }
  0xa8   : > { %2620 = vmatmul.mubr.f32.gmra.mrb[22].mxu1 %v4212_v8  ;;  %2836 = vmatmul.mubr.f32.gmra.mrb[24].mxu0 %v3899_v55 }
  0xa9   : > { %2622 = vmatprep.mubr.f32.mxu1 %v3886_v2  ;;  %2870 = vmatprep.mubr.f32.mxu0 %v3501_v51  ;;  %v4217_v51 = vld [vmem:[#allocation9_spill] sm:$0xff] }
  0xac   : > { %2623 = vmatmul.mubr.f32.gmra.mrb[24].mxu1 %v3899_v55  ;;  %2871 = vmatmul.mubr.f32.vlgmr.msra.gmra.mrb[0].mxu0 %v3503_v52  ;;  %v4218_v52 = vld [vmem:[#allocation10_spill] sm:$0xff] }
  0xad   : > { %2657 = vmatprep.mubr.f32.mxu1 %v4213_v12  ;;  %2873 = vmatprep.mubr.f32.mxu0 %v3510_v59  ;;  %v4219_v59 = vld [vmem:[#allocation11_spill] sm:$0xff] }
  0xb0   : > { %2658 = vmatmul.mubr.f32.vlgmr.msra.gmra.mrb[0].mxu1 %v4214_v13  ;;  %2874 = vmatmul.mubr.f32.gmra.mrb[2].mxu0 %v3519_v63  ;;  %v4220_v63 = vld [vmem:[#allocation12_spill] sm:$0xff] }
  0xb1   : > { %2660 = vmatprep.mubr.f32.mxu1 %v4215_v21  ;;  %2876 = vmatprep.mubr.f32.mxu0 %v3537_v17  ;;  %v4221_v17 = vld [vmem:[#allocation13_spill] sm:$0xff] }
  0xb4   : > { %2661 = vmatmul.mubr.f32.gmra.mrb[2].mxu1 %v4216_v50  ;;  %2877 = vmatmul.mubr.f32.gmra.mrb[4].mxu0 %v3588_v42  ;;  %v4222_v42 = vld [vmem:[#allocation14_spill] sm:$0xff] }
  0xb5   : > { %2663 = vmatprep.mubr.f32.mxu1 %v4217_v51  ;;  %2879 = vmatprep.mubr.f32.mxu0 %v3610_v16  ;;  %v4223_v16 = vld [vmem:[#allocation15_spill] sm:$0xff] }
  0xb8   : > { %2664 = vmatmul.mubr.f32.gmra.mrb[4].mxu1 %v4218_v52  ;;  %2880 = vmatmul.mubr.f32.gmra.mrb[6].mxu0 %v3627_v23  ;;  %v4224_v23 = vld [vmem:[#allocation16_spill] sm:$0xff] }
  0xb9   : > { %2666 = vmatprep.mubr.f32.mxu1 %v4219_v59  ;;  %2882 = vmatprep.mubr.f32.mxu0 %v3649_v45  ;;  %v4225_v45 = vld [vmem:[#allocation17_spill] sm:$0xff] }
  0xbc   : > { %2667 = vmatmul.mubr.f32.gmra.mrb[6].mxu1 %v4220_v63  ;;  %2883 = vmatmul.mubr.f32.gmra.mrb[8].mxu0 %v3665_v5  ;;  %v4226_v5 = vld [vmem:[#allocation18_spill] sm:$0xff] }
  0xbd   : > { %2669 = vmatprep.mubr.f32.mxu1 %v4221_v17  ;;  %2885 = vmatprep.mubr.f32.mxu0 %v3676_v6  ;;  %v4227_v6 = vld [vmem:[#allocation19_spill] sm:$0xff] }
  0xc0   : > { %2670 = vmatmul.mubr.f32.gmra.mrb[8].mxu1 %v4222_v42  ;;  %2886 = vmatmul.mubr.f32.gmra.mrb[10].mxu0 %v3690_v19  ;;  %v4228_v19 = vld [vmem:[#allocation20_spill] sm:$0xff] }
  0xc1   : > { %2672 = vmatprep.mubr.f32.mxu1 %v4223_v16  ;;  %2888 = vmatprep.mubr.f32.mxu0 %v3726_v35  ;;  %v4229_v35 = vld [vmem:[#allocation21_spill] sm:$0xff] }
  0xc4   : > { %2673 = vmatmul.mubr.f32.gmra.mrb[10].mxu1 %v4224_v23  ;;  %2889 = vmatmul.mubr.f32.gmra.mrb[12].mxu0 %v3728_v11  ;;  %v4230_v11 = vld [vmem:[#allocation22_spill] sm:$0xff] }
  0xc5   : > { %2675 = vmatprep.mubr.f32.mxu1 %v4225_v45  ;;  %2891 = vmatprep.mubr.f32.mxu0 %v3748_v58  ;;  %v4231_v58 = vld [vmem:[#allocation24_spill] sm:$0xff] }
  0xc8   : > { %2676 = vmatmul.mubr.f32.gmra.mrb[12].mxu1 %v4226_v5  ;;  %2892 = vmatmul.mubr.f32.gmra.mrb[14].mxu0 %v3765_v0  ;;  %v4232_v0 = vld [vmem:[#allocation25_spill] sm:$0xff] }
  0xc9   : > { %2678 = vmatprep.mubr.f32.mxu1 %v4227_v6  ;;  %2894 = vmatprep.mubr.f32.mxu0 %v3779_v3  ;;  %v4233_v3 = vld [vmem:[#allocation26_spill] sm:$0xff] }
  0xcc   : > { %2679 = vmatmul.mubr.f32.gmra.mrb[14].mxu1 %v4228_v19  ;;  %2895 = vmatmul.mubr.f32.gmra.mrb[16].mxu0 %v3781_v47  ;;  %v4234_v47 = vld [vmem:[#allocation28_spill] sm:$0xff] }
  0xcd   : > { %2681 = vmatprep.mubr.f32.mxu1 %v4229_v35  ;;  %2897 = vmatprep.mubr.f32.mxu0 %v4209_v44 }
  0xd0   : > { %2682 = vmatmul.mubr.f32.gmra.mrb[16].mxu1 %v4230_v11  ;;  %2898 = vmatmul.mubr.f32.gmra.mrb[18].mxu0 %v3823_v26 }
  0xd1   : > { %2684 = vmatprep.mubr.f32.mxu1 %v4231_v58  ;;  %2900 = vmatprep.mubr.f32.mxu0 %v3833_v34 }
  0xd4   : > { %2685 = vmatmul.mubr.f32.gmra.mrb[18].mxu1 %v4232_v0  ;;  %2901 = vmatmul.mubr.f32.gmra.mrb[20].mxu0 %v4210_v48 }
  0xd5   : > { %2687 = vmatprep.mubr.f32.mxu1 %v4233_v3  ;;  %2903 = vmatprep.mubr.f32.mxu0 %v4211_v49 }
  0xd8   : > { %2688 = vmatmul.mubr.f32.gmra.mrb[20].mxu1 %v4234_v47  ;;  %2904 = vmatmul.mubr.f32.gmra.mrb[22].mxu0 %v4212_v8 }
  0xd9   : > { %2690 = vmatprep.mubr.f32.mxu1 %v4235_v27  ;;  %2906 = vmatprep.mubr.f32.mxu0 %v3886_v2 }
  0xdc   : > { %2691 = vmatmul.mubr.f32.gmra.mrb[22].mxu1 %v3879_v9  ;;  %2907 = vmatmul.mubr.f32.gmra.mrb[24].mxu0 %v3899_v55 }
  0xdd   : > { %2693 = vmatprep.mubr.f32.mxu1 %v3891_v46 }
  0xe0   : > { %2694 = vmatmul.mubr.f32.gmra.mrb[24].mxu1 %v3903_v30 }
 0x17f   : > { %v2872_v26 = vpop.f32.mrb[0].mxu0 }
 0x180   : > { %v1983_v34 = vpop.f32.mrb[1].mxu0 }
 0x183   : > { %v2659_v61 = vpop.f32.mrb[0].mxu1  ;;  %v2875_v32 = vpop.f32.mrb[2].mxu0 }
 0x184   : > { %v3101_v38 = vadd.f32 %v2659_v61, %v4039_v54  ;;  %v1163_v20 = vpop.f32.mrb[1].mxu1  ;;  %v1995_v41 = vpop.f32.mrb[3].mxu0 }
 0x185   : > { %v3103_v9 = vadd.f32 %v4039_v54, %v1163_v20 }
 0x186   : > { %v3102_v4 = vadd.f32 %v3101_v38, %v2872_v26 }
 0x187   : > { %v3104_v62 = vadd.f32 %v3103_v9, %v1983_v34  ;;  %v2662_v53 = vpop.f32.mrb[2].mxu1  ;;  %v2878_v25 = vpop.f32.mrb[4].mxu0 }
 0x188   : > { %2138 = vst [vmem:[%s4047_s17 + $0x8] sm:$0xff] %v3102_v4  ;;  %v3105_v31 = vadd.f32 %v2662_v53, %v4039_v54  ;;  %v1177_v2 = vpop.f32.mrb[3].mxu1  ;;  %v2007_v14 = vpop.f32.mrb[5].mxu0 }
 0x189   : > { %2137 = vst [vmem:[%s4047_s17] sm:$0xff] %v3104_v62  ;;  %v3107_v10 = vadd.f32 %v4039_v54, %v1177_v2 }
 0x18a   : > { %v3106_v46 = vadd.f32 %v3105_v31, %v2875_v32 }
 0x18b   : > { %v3108_v40 = vadd.f32 %v3107_v10, %v1995_v41  ;;  %v2665_v29 = vpop.f32.mrb[4].mxu1  ;;  %v2881_v7 = vpop.f32.mrb[6].mxu0 }
 0x18c   : > { %2140 = vst [vmem:[%s4047_s17 + $0x18] sm:$0xff] %v3106_v46  ;;  %v3109_v1 = vadd.f32 %v2665_v29, %v4039_v54  ;;  %v1191_v55 = vpop.f32.mrb[5].mxu1  ;;  %v2019_v56 = vpop.f32.mrb[7].mxu0 }
 0x18d   : > { %2139 = vst [vmem:[%s4047_s17 + $0x10] sm:$0xff] %v3108_v40  ;;  %v3111_v30 = vadd.f32 %v4039_v54, %v1191_v55 }
 0x18e   : > { %v3110_v36 = vadd.f32 %v3109_v1, %v2878_v25 }
 0x18f   : > { %v3112_v39 = vadd.f32 %v3111_v30, %v2007_v14  ;;  %v2668_v57 = vpop.f32.mrb[6].mxu1  ;;  %v2884_v60 = vpop.f32.mrb[8].mxu0 }
 0x190   : > { %2142 = vst [vmem:[%s4047_s17 + $0x28] sm:$0xff] %v3110_v36  ;;  %v3113_v24 = vadd.f32 %v2668_v57, %v4039_v54  ;;  %v1205_v18 = vpop.f32.mrb[7].mxu1  ;;  %v2031_v15 = vpop.f32.mrb[9].mxu0 }
 0x191   : > { %2141 = vst [vmem:[%s4047_s17 + $0x20] sm:$0xff] %v3112_v39  ;;  %v3115_v22 = vadd.f32 %v4039_v54, %v1205_v18 }
 0x192   : > { %v3114_v28 = vadd.f32 %v3113_v24, %v2881_v7 }
 0x193   : > { %v3116_v33 = vadd.f32 %v3115_v22, %v2019_v56  ;;  %v2671_v37 = vpop.f32.mrb[8].mxu1  ;;  %v2887_v43 = vpop.f32.mrb[10].mxu0 }
 0x194   : > { %2144 = vst [vmem:[%s4047_s17 + $0x38] sm:$0xff] %v3114_v28  ;;  %v3117_v44 = vadd.f32 %v2671_v37, %v4039_v54  ;;  %v1219_v48 = vpop.f32.mrb[9].mxu1  ;;  %v2043_v49 = vpop.f32.mrb[11].mxu0 }
 0x195   : > { %2143 = vst [vmem:[%s4047_s17 + $0x30] sm:$0xff] %v3116_v33  ;;  %v3119_v8 = vadd.f32 %v4039_v54, %v1219_v48 }
 0x196   : > { %v3118_v12 = vadd.f32 %v3117_v44, %v2884_v60 }
 0x197   : > { %v3120_v13 = vadd.f32 %v3119_v8, %v2031_v15  ;;  %v2674_v21 = vpop.f32.mrb[10].mxu1  ;;  %v2890_v50 = vpop.f32.mrb[12].mxu0 }
 0x198   : > { %2146 = vst [vmem:[%s4047_s17 + $0x48] sm:$0xff] %v3118_v12  ;;  %v3121_v51 = vadd.f32 %v2674_v21, %v4039_v54  ;;  %v1233_v52 = vpop.f32.mrb[11].mxu1  ;;  %v2055_v59 = vpop.f32.mrb[13].mxu0 }
 0x199   : > { %2145 = vst [vmem:[%s4047_s17 + $0x40] sm:$0xff] %v3120_v13  ;;  %v3123_v63 = vadd.f32 %v4039_v54, %v1233_v52 }
 0x19a   : > { %v3122_v17 = vadd.f32 %v3121_v51, %v2887_v43 }
 0x19b   : > { %v3124_v42 = vadd.f32 %v3123_v63, %v2043_v49  ;;  %v2677_v16 = vpop.f32.mrb[12].mxu1  ;;  %v2893_v23 = vpop.f32.mrb[14].mxu0 }
 0x19c   : > { %2148 = vst [vmem:[%s4047_s17 + $0x58] sm:$0xff] %v3122_v17  ;;  %v3125_v45 = vadd.f32 %v2677_v16, %v4039_v54  ;;  %v1247_v5 = vpop.f32.mrb[13].mxu1  ;;  %v2067_v6 = vpop.f32.mrb[15].mxu0 }
 0x19d   : > { %2147 = vst [vmem:[%s4047_s17 + $0x50] sm:$0xff] %v3124_v42  ;;  %v3127_v19 = vadd.f32 %v4039_v54, %v1247_v5 }
 0x19e   : > { %v3126_v35 = vadd.f32 %v3125_v45, %v2890_v50 }
 0x19f   : > { %v3128_v11 = vadd.f32 %v3127_v19, %v2055_v59  ;;  %v2680_v58 = vpop.f32.mrb[14].mxu1  ;;  %v2896_v0 = vpop.f32.mrb[16].mxu0 }
 0x1a0   : > { %2150 = vst [vmem:[%s4047_s17 + $0x68] sm:$0xff] %v3126_v35  ;;  %v3129_v3 = vadd.f32 %v2680_v58, %v4039_v54  ;;  %v1261_v47 = vpop.f32.mrb[15].mxu1  ;;  %v2079_v27 = vpop.f32.mrb[17].mxu0 }
 0x1a1   : > { %2149 = vst [vmem:[%s4047_s17 + $0x60] sm:$0xff] %v3128_v11  ;;  %v3131_v26 = vadd.f32 %v4039_v54, %v1261_v47 }
 0x1a2   : > { %v3130_v34 = vadd.f32 %v3129_v3, %v2893_v23 }
 0x1a3   : > { %v3132_v61 = vadd.f32 %v3131_v26, %v2067_v6  ;;  %v2683_v32 = vpop.f32.mrb[16].mxu1  ;;  %v2899_v38 = vpop.f32.mrb[18].mxu0 }
 0x1a4   : > { %2152 = vst [vmem:[%s4047_s17 + $0x78] sm:$0xff] %v3130_v34  ;;  %v3133_v20 = vadd.f32 %v2683_v32, %v4039_v54  ;;  %v1275_v41 = vpop.f32.mrb[17].mxu1  ;;  %v2091_v9 = vpop.f32.mrb[19].mxu0 }
 0x1a5   : > { %2151 = vst [vmem:[%s4047_s17 + $0x70] sm:$0xff] %v3132_v61  ;;  %v3135_v4 = vadd.f32 %v4039_v54, %v1275_v41 }
 0x1a6   : > { %v3134_v62 = vadd.f32 %v3133_v20, %v2896_v0 }
 0x1a7   : > { %v3136_v53 = vadd.f32 %v3135_v4, %v2079_v27  ;;  %v2686_v25 = vpop.f32.mrb[18].mxu1  ;;  %v2902_v31 = vpop.f32.mrb[20].mxu0 }
 0x1a8   : > { %2154 = vst [vmem:[%s4047_s17 + $0x88] sm:$0xff] %v3134_v62  ;;  %v3137_v2 = vadd.f32 %v2686_v25, %v4039_v54  ;;  %v1289_v14 = vpop.f32.mrb[19].mxu1  ;;  %v2103_v10 = vpop.f32.mrb[21].mxu0 }
 0x1a9   : > { %2153 = vst [vmem:[%s4047_s17 + $0x80] sm:$0xff] %v3136_v53  ;;  %v3139_v46 = vadd.f32 %v4039_v54, %v1289_v14 }
 0x1aa   : > { %v3138_v40 = vadd.f32 %v3137_v2, %v2899_v38 }
 0x1ab   : > { %v3140_v29 = vadd.f32 %v3139_v46, %v2091_v9  ;;  %v2689_v7 = vpop.f32.mrb[20].mxu1  ;;  %v2905_v1 = vpop.f32.mrb[22].mxu0 }
 0x1ac   : > { %2156 = vst [vmem:[%s4047_s17 + $0x98] sm:$0xff] %v3138_v40  ;;  %v3141_v55 = vadd.f32 %v2689_v7, %v4039_v54  ;;  %v1303_v56 = vpop.f32.mrb[21].mxu1  ;;  %v2115_v30 = vpop.f32.mrb[23].mxu0 }
 0x1ad   : > { %2155 = vst [vmem:[%s4047_s17 + $0x90] sm:$0xff] %v3140_v29  ;;  %v3143_v36 = vadd.f32 %v4039_v54, %v1303_v56 }
 0x1ae   : > { %v3142_v39 = vadd.f32 %v3141_v55, %v2902_v31 }
 0x1af   : > { %v3144_v57 = vadd.f32 %v3143_v36, %v2103_v10  ;;  %v2692_v60 = vpop.f32.mrb[22].mxu1  ;;  %v2908_v24 = vpop.f32.mrb[24].mxu0 }
 0x1b0   : > { %2158 = vst [vmem:[%s4047_s17 + $0xa8] sm:$0xff] %v3142_v39  ;;  %v3145_v18 = vadd.f32 %v2692_v60, %v4039_v54  ;;  %v1317_v15 = vpop.f32.mrb[23].mxu1  ;;  %v2127_v22 = vpop.f32.mrb[25].mxu0 }
 0x1b1   : > { %2157 = vst [vmem:[%s4047_s17 + $0xa0] sm:$0xff] %v3144_v57  ;;  %v3147_v28 = vadd.f32 %v4039_v54, %v1317_v15 }
 0x1b2   : > { %v3146_v33 = vadd.f32 %v3145_v18, %v2905_v1 }
 0x1b3   : > { %v3148_v37 = vadd.f32 %v3147_v28, %v2115_v30  ;;  %v2695_v43 = vpop.f32.mrb[24].mxu1 }
 0x1b4   : > { %2160 = vst [vmem:[%s4047_s17 + $0xb8] sm:$0xff] %v3146_v33  ;;  %v3149_v44 = vadd.f32 %v2695_v43, %v4039_v54  ;;  %v1331_v48 = vpop.f32.mrb[25].mxu1 }
 0x1b5   : > { %2159 = vst [vmem:[%s4047_s17 + $0xb0] sm:$0xff] %v3148_v37  ;;  %v3151_v49 = vadd.f32 %v4039_v54, %v1331_v48 }
 0x1b6   : > { %v3150_v8 = vadd.f32 %v3149_v44, %v2908_v24 }
 0x1b7   : > { %v3152_v12 = vadd.f32 %v3151_v49, %v2127_v22 }
 0x1b8   : > { %2162 = vst [vmem:[%s4047_s17 + $0xc8] sm:$0xff] %v3150_v8 }
 0x1b9   : > { %2161 = vst [vmem:[%s4047_s17 + $0xc0] sm:$0xff] %v3152_v12 }
 0x1ba PF: > { %s15_s18 = sadd.s32 1, %s3271_s18  }
 0x1bb   : > { %p12_p4 = scmp.ge.s32.totalorder %s15_s18, 5  }
 0x1bd   :  { %14 = sbr.rel (!%p12_p4) target bundleno = 1 (0x1), region = 70 }

// kernel: mlp_forward.4
= control target key start
LH: loop header
LB: loop body
LE: loop exit
PB: predicated region body
PF: predicated region fallthrough
CT: control target
= control target key end

     0   :  { %s3127_s21 = smov 0   ;;  %s3832_s0 = inlined_call_operand.vmem [shape: f32[624,32], index: 0, kind: input, shape index: {}]   ;;  %s3833_s1 = inlined_call_operand.vmem [shape: f32[1,32], index: 1, kind: input, shape index: {}]   ;;  %s3834_s2 = inlined_call_operand.vmem [shape: f32[1,32], index: 2, kind: input, shape index: {}]   ;;  %s3835_s3 = inlined_call_operand.vmem [shape: f32[32,128], index: 3, kind: input, shape index: {}]   ;;  %s3836_s4 = inlined_call_operand.vmem [shape: f32[1,128], index: 4, kind: input, shape index: {}]   ;;  %s3837_s5 = inlined_call_operand.vmem [shape: f32[624,128], index: 5, kind: output, shape index: {0}]   ;;  %s3838_s6 = inlined_call_operand.vmem [shape: f32[3,2,128], index: 6, kind: output, shape index: {1}]  }
   0x1 LB: > { %s3133_s22 = sadd.s32 4294967295, %s3090_s21   ;;  %p2401_p0 = scmp.ge.s32.totalorder %s3090_s21, 1  ;;  %s3090_s21 = sphi %s3127_s21, %s17_s21  }
   0x2   : > { %p216_p1 = scmp.lt.s32.totalorder %s3090_s21, 4 }
   0x4   : > { %p217_p2 = pnand %p2401_p0, %p216_p1 }
   0x6   : > { %220 = sbr.rel (%p217_p2) target bundleno = 447 (0x1bf), region = 40 }
   0xd   : > { %v436_v0 = vld [vmem:[%s3835_s3] sm:$0xff]  ;;  %v437_v1 = vld [vmem:[%s3835_s3 + $0x8] sm:$0xff]  ;;  %v438_v2 = vld [vmem:[%s3835_s3 + $0x10] sm:$0xff]  ;;  %s250_s29 = smul.u32 26, %s3133_s22  ;;  %vm447_vm0 = vcmask 261120   ;;  %p262_p4 = scmp.lt.s32.totalorder %s3133_s22, 2 }
   0xe   : > { %v527_v3 = vand.u32 4294901760, %v436_v0  ;;  %v530_v4 = vand.u32 4294901760, %v437_v1  ;;  %v439_v5 = vld [vmem:[%s3835_s3 + $0x18] sm:$0xff]  ;;  %v533_v6 = vand.u32 4294901760, %v438_v2  ;;  %v3164_v17 = vld [vmem:[%s3833_s1] ss:$0 sm:$0xff] }
   0xf   : > { %v536_v7 = vand.u32 4294901760, %v439_v5  ;;  %p251_p3 = scmp.lt.s32.totalorder %s250_s29, 77  ;;  %v3180_v20 = vld [vmem:[%s3834_s2] ss:$0 sm:$0xff]  ;;  %s2112_s16 = smul.u32 208, %s3133_s22 }
  0x10   : > { %v3150_v8 = vpack.c.bf16 %v530_v4, %v527_v3  ;;  %v857_v9 = vsub.f32 %v436_v0, %v527_v3  ;;  %v864_v10 = vsub.f32 %v437_v1, %v530_v4  ;;  %v871_v11 = vsub.f32 %v438_v2, %v533_v6  ;;  %s3854_s22 = smov (!%p262_p4, %s3133_s22), 2 }
  0x11   : > { %v3152_v12 = vpack.c.bf16 %v536_v7, %v533_v6  ;;  %s3852_s29 = smov (!%p251_p3, %s250_s29), 77  ;;  %v878_v13 = vsub.f32 %v439_v5, %v536_v7  ;;  %s2404_s24 = sshll.u32 %s3854_s22, 1 }
  0x12   : > { %2897 = vmatprep.subr.bf16.mxu0 %v3150_v8  ;;  %2873 = vmatprep.subr.bf16.mxu1 %v3150_v8  ;;  %v858_v14 = vand.u32 4294901760, %v857_v9  ;;  %v865_v15 = vand.u32 4294901760, %v864_v10  ;;  %v872_v16 = vand.u32 4294901760, %v871_v11  ;;  %s2402_s8 = sshll.u32 %s3852_s29, 3  ;;  %v3193_v30 = vpack.c.bf16 %v864_v10, %v857_v9  ;;  %s265_s27 = scalar_lea.vmem %s3838_s6, %s2404_s24 }
  0x13   : > { %2899 = vmatpush3.bf16.msra.mxu0 %v3150_v8  ;;  %2875 = vmatpush3.bf16.msra.mxu1 %v3150_v8  ;;  %v879_v18 = vand.u32 4294901760, %v878_v13  ;;  %v3166_v19 = vpack.c.bf16 %v878_v13, %v871_v11  ;;  %s3175_s13 = scalar_lea.vmem %s3832_s0, %s2402_s8  ;;  %s3638_s23 = scalar_lea.vmem %s3837_s5, %s2402_s8 }
  0x14   : > { %2901 = vmatprep.subr.bf16.mxu0 %v3152_v12  ;;  %2877 = vmatprep.subr.bf16.mxu1 %v3152_v12  ;;  %v859_v21 = vsub.f32 %v857_v9, %v858_v14  ;;  %v866_v22 = vsub.f32 %v864_v10, %v865_v15  ;;  %v3182_v23 = vpack.c.bf16 %v865_v15, %v858_v14  ;;  %v266_v24 = vld [vmem:[%s3175_s13] sm:$0xff]  ;;  %v267_v25 = vld [vmem:[%s3175_s13 + $0x8] sm:$0xff]  ;;  %v268_v26 = vld [vmem:[%s3175_s13 + $0x10] sm:$0xff] }
  0x15   : > { %v3187_v27 = vsub.f32 %v871_v11, %v872_v16  ;;  %v3189_v28 = vsub.f32 %v878_v13, %v879_v18  ;;  %v3191_v29 = vpack.c.bf16 %v879_v18, %v872_v16  ;;  %v299_v31 = vmul.f32 %v3164_v17, %v266_v24  ;;  %v269_v35 = vld [vmem:[%s3175_s13 + $0x18] sm:$0xff]  ;;  %v270_v36 = vld [vmem:[%s3175_s13 + $0x20] sm:$0xff]  ;;  %v271_v37 = vld [vmem:[%s3175_s13 + $0x28] sm:$0xff] }
  0x16   : > { %v300_v32 = vmul.f32 %v3164_v17, %v267_v25  ;;  %v860_v33 = vand.u32 4294901760, %v859_v21  ;;  %v867_v34 = vand.u32 4294901760, %v866_v22  ;;  %v301_v38 = vmul.f32 %v3164_v17, %v268_v26  ;;  %v272_v41 = vld [vmem:[%s3175_s13 + $0x30] sm:$0xff]  ;;  %v273_v15 = vld [vmem:[%s3175_s13 + $0x38] sm:$0xff] }
  0x17   : > { %2903 = vmatpush3.bf16.msra.mxu0 %v3152_v12  ;;  %2879 = vmatpush3.bf16.msra.mxu1 %v3152_v12  ;;  %v302_v39 = vmul.f32 %v3164_v17, %v269_v35  ;;  %v303_v40 = vmul.f32 %v3164_v17, %v270_v36  ;;  %v874_v42 = vand.u32 4294901760, %v3187_v27  ;;  %v332_v43 = vadd.f32 %v3180_v20, %v299_v31 }
  0x18   : > { %v333_v44 = vadd.f32 %v3180_v20, %v300_v32  ;;  %v3209_v45 = vpack.c.bf16 %v867_v34, %v860_v33  ;;  %2905 = vmatprep.subr.bf16.mxu0 %v3182_v23  ;;  %v304_v46 = vmul.f32 %v3164_v17, %v271_v37  ;;  %v334_v47 = vadd.f32 %v3180_v20, %v301_v38 }
  0x19   : > { %v335_v48 = vadd.f32 %v3180_v20, %v302_v39  ;;  %v336_v49 = vadd.f32 %v3180_v20, %v303_v40  ;;  %v305_v50 = vmul.f32 %v3164_v17, %v272_v41  ;;  %vm358_vm1 = vcmp.ge.f32.partialorder %v332_v43, 0.0  ;;  %v274_v39 = vld [vmem:[%s3175_s13 + $0x40] sm:$0xff] }
  0x1a   : > { %v384_v51 = vmul.f32 0.2, %v332_v43  ;;  %vm359_vm2 = vcmp.ge.f32.partialorder %v333_v44, 0.0  ;;  %v385_v52 = vmul.f32 0.2, %v333_v44  ;;  %2881 = vmatprep.subr.bf16.mxu1 %v3209_v45  ;;  %vm360_vm3 = vcmp.ge.f32.partialorder %v334_v47, 0.0 }
  0x1b   : > { %v386_v53 = vmul.f32 0.2, %v334_v47  ;;  %vm361_vm4 = vcmp.ge.f32.partialorder %v335_v48, 0.0  ;;  %v387_v54 = vmul.f32 0.2, %v335_v48  ;;  %vm362_vm5 = vcmp.ge.f32.partialorder %v336_v49, 0.0 }
  0x1c   : > { %v410_v55 = vsel %vm358_vm1, %v332_v43, %v384_v51  ;;  %v411_v56 = vsel %vm359_vm2, %v333_v44, %v385_v52  ;;  %v388_v57 = vmul.f32 0.2, %v336_v49  ;;  %v337_v5 = vadd.f32 %v3180_v20, %v304_v46  ;;  %v275_v46 = vld [vmem:[%s3175_s13 + $0x48] sm:$0xff] }
  0x1d   : > { %v449_v58 = vsel %vm447_vm0, %v410_v55, 0  ;;  %v452_v59 = vsel %vm447_vm0, %v411_v56, 0  ;;  %v412_v60 = vsel %vm360_vm3, %v334_v47, %v386_v53  ;;  %v413_v61 = vsel %vm361_vm4, %v335_v48, %v387_v54  ;;  %v276_v47 = vld [vmem:[%s3175_s13 + $0x50] sm:$0xff]  ;;  %v277_v48 = vld [vmem:[%s3175_s13 + $0x58] sm:$0xff] }
  0x1e   : > { %v3220_v62 = vand.u32 4294901760, %v449_v58  ;;  %v3222_v63 = vand.u32 4294901760, %v452_v59  ;;  %v455_v0 = vsel %vm447_vm0, %v412_v60, 0  ;;  %v458_v1 = vsel %vm447_vm0, %v413_v61, 0  ;;  %v278_v60 = vld [vmem:[%s3175_s13 + $0x60] sm:$0xff] }
  0x1f   : > { %v3226_v2 = vand.u32 4294901760, %v455_v0  ;;  %v3228_v3 = vand.u32 4294901760, %v458_v1  ;;  %v414_v4 = vsel %vm362_vm5, %v336_v49, %v388_v57  ;;  %v338_v10 = vadd.f32 %v3180_v20, %v305_v50 }
  0x20   : > { %v3232_v6 = vsub.f32 %v449_v58, %v3220_v62  ;;  %v3235_v7 = vsub.f32 %v452_v59, %v3222_v63  ;;  %v461_v9 = vsel %vm447_vm0, %v414_v4, 0  ;;  %vm363_vm6 = vcmp.ge.f32.partialorder %v337_v5, 0.0 }
  0x21   : > { %v3240_v11 = vsub.f32 %v455_v0, %v3226_v2  ;;  %v3243_v13 = vsub.f32 %v458_v1, %v3228_v3  ;;  %v3245_v14 = vand.u32 4294901760, %v461_v9  ;;  %v389_v21 = vmul.f32 0.2, %v337_v5 }
  0x22   : > { %v597_v16 = vand.u32 4294901760, %v3232_v6  ;;  %v607_v18 = vand.u32 4294901760, %v3235_v7  ;;  %vm364_vm7 = vcmp.ge.f32.partialorder %v338_v10, 0.0  ;;  %v390_v26 = vmul.f32 0.2, %v338_v10 }
  0x23   : > { %v617_v22 = vand.u32 4294901760, %v3240_v11  ;;  %v627_v24 = vand.u32 4294901760, %v3243_v13  ;;  %v3253_v25 = vsub.f32 %v461_v9, %v3245_v14  ;;  %v415_v33 = vsel %vm363_vm6, %v337_v5, %v389_v21 }
  0x24   : > { %2739 = vmatprep.mubr.f32.mxu0 %v597_v16  ;;  %v598_v31 = vsub.f32 %v3232_v6, %v597_v16  ;;  %v608_v32 = vsub.f32 %v3235_v7, %v607_v18  ;;  %v306_v34 = vmul.f32 %v3164_v17, %v273_v15  ;;  %v464_v38 = vsel %vm447_vm0, %v415_v33, 0 }
  0x25   : > { %2740 = vmatmul.mubr.f32.vlgmr.msra.gmra.mrb[0].mxu0 %v607_v18  ;;  %v618_v35 = vsub.f32 %v3240_v11, %v617_v22  ;;  %v637_v36 = vand.u32 4294901760, %v3253_v25  ;;  %v628_v37 = vsub.f32 %v3243_v13, %v627_v24  ;;  %v3264_v43 = vand.u32 4294901760, %v464_v38 }
  0x26   : > { %v599_v40 = vand.u32 4294901760, %v598_v31  ;;  %2742 = vmatprep.mubr.f32.mxu0 %v617_v22  ;;  %v609_v41 = vand.u32 4294901760, %v608_v32  ;;  %2907 = vmatpush3.bf16.msra.mxu0 %v3182_v23  ;;  %v416_v44 = vsel %vm364_vm7, %v338_v10, %v390_v26  ;;  %v339_v54 = vadd.f32 %v3180_v20, %v306_v34 }
  0x27   : > { %v619_v49 = vand.u32 4294901760, %v618_v35  ;;  %v629_v50 = vand.u32 4294901760, %v628_v37  ;;  %v638_v51 = vsub.f32 %v3253_v25, %v637_v36  ;;  %v467_v52 = vsel %vm447_vm0, %v416_v44, 0  ;;  %2909 = vmatprep.subr.bf16.mxu0 %v3191_v29 }
  0x28   : > { %2598 = vmatprep.mubr.f32.mxu1 %v599_v40  ;;  %v3274_v53 = vsub.f32 %v464_v38, %v3264_v43  ;;  %v3276_v23 = vand.u32 4294901760, %v467_v52  ;;  %v307_v55 = vmul.f32 %v3164_v17, %v274_v39  ;;  %v308_v57 = vmul.f32 %v3164_v17, %v275_v46  ;;  %v279_v38 = vld [vmem:[%s3175_s13 + $0x68] sm:$0xff] }
  0x29   : > { %2599 = vmatmul.mubr.f32.vlgmr.msra.gmra.mrb[0].mxu1 %v609_v41  ;;  %2743 = vmatmul.mubr.f32.gmra.mrb[2].mxu0 %v627_v24  ;;  %v639_v56 = vand.u32 4294901760, %v638_v51  ;;  %v309_v58 = vmul.f32 %v3164_v17, %v276_v47  ;;  %v310_v59 = vmul.f32 %v3164_v17, %v277_v48  ;;  %vm365_vm8 = vcmp.ge.f32.partialorder %v339_v54, 0.0 }
  0x2a   : > { %2883 = vmatpush3.bf16.msra.mxu1 %v3209_v45  ;;  %2601 = vmatprep.mubr.f32.mxu1 %v619_v49  ;;  %v647_v61 = vand.u32 4294901760, %v3274_v53  ;;  %v3287_v0 = vsub.f32 %v467_v52, %v3276_v23  ;;  %v391_v1 = vmul.f32 0.2, %v339_v54  ;;  %v340_v4 = vadd.f32 %v3180_v20, %v307_v55  ;;  %v280_v55 = vld [vmem:[%s3175_s13 + $0x70] sm:$0xff] }
  0x2b   : > { %2745 = vmatprep.mubr.f32.mxu0 %v637_v36  ;;  %v341_v5 = vadd.f32 %v3180_v20, %v308_v57  ;;  %v342_v9 = vadd.f32 %v3180_v20, %v309_v58  ;;  %v343_v10 = vadd.f32 %v3180_v20, %v310_v59  ;;  %v311_v18 = vmul.f32 %v3164_v17, %v278_v60 }
  0x2c   : > { %v657_v15 = vand.u32 4294901760, %v3287_v0  ;;  %v648_v45 = vsub.f32 %v3274_v53, %v647_v61  ;;  %v417_v16 = vsel %vm365_vm8, %v339_v54, %v391_v1  ;;  %2911 = vmatpush3.bf16.msra.mxu0 %v3191_v29  ;;  %vm366_vm9 = vcmp.ge.f32.partialorder %v340_v4, 0.0 }
  0x2d   : > { %2602 = vmatmul.mubr.f32.gmra.mrb[2].mxu1 %v629_v50  ;;  %2746 = vmatmul.mubr.f32.gmra.mrb[4].mxu0 %v647_v61  ;;  %v470_v21 = vsel %vm447_vm0, %v417_v16, 0  ;;  %v392_v22 = vmul.f32 0.2, %v340_v4  ;;  %vm367_vm10 = vcmp.ge.f32.partialorder %v341_v5, 0.0  ;;  %v393_v32 = vmul.f32 0.2, %v341_v5 }
  0x2e   : > { %2604 = vmatprep.mubr.f32.mxu1 %v639_v56  ;;  %2748 = vmatprep.mubr.f32.mxu0 %v657_v15  ;;  %v649_v24 = vand.u32 4294901760, %v648_v45  ;;  %v3298_v26 = vand.u32 4294901760, %v470_v21  ;;  %v658_v31 = vsub.f32 %v3287_v0, %v657_v15  ;;  %vm368_vm11 = vcmp.ge.f32.partialorder %v342_v9, 0.0 }
  0x2f   : > { %v418_v33 = vsel %vm366_vm9, %v340_v4, %v392_v22  ;;  %v394_v34 = vmul.f32 0.2, %v342_v9  ;;  %vm369_vm12 = vcmp.ge.f32.partialorder %v343_v10, 0.0  ;;  %2913 = vmatprep.subr.bf16.mxu0 %v3150_v8  ;;  %v419_v37 = vsel %vm367_vm10, %v341_v5, %v393_v32 }
  0x30   : > { %v3303_v29 = vsub.f32 %v470_v21, %v3298_v26  ;;  %v659_v35 = vand.u32 4294901760, %v658_v31  ;;  %v473_v36 = vsel %vm447_vm0, %v418_v33, 0  ;;  %v476_v40 = vsel %vm447_vm0, %v419_v37, 0  ;;  %v281_v21 = vld [vmem:[%s3175_s13 + $0x78] sm:$0xff] }
  0x31   : > { %2605 = vmatmul.mubr.f32.gmra.mrb[4].mxu1 %v649_v24  ;;  %v3307_v39 = vand.u32 4294901760, %v473_v36  ;;  %v420_v41 = vsel %vm368_vm11, %v342_v9, %v394_v34  ;;  %v395_v44 = vmul.f32 0.2, %v343_v10  ;;  %v3311_v47 = vand.u32 4294901760, %v476_v40 }
  0x32   : > { %v667_v46 = vand.u32 4294901760, %v3303_v29  ;;  %2607 = vmatprep.mubr.f32.mxu1 %v659_v35  ;;  %v479_v48 = vsel %vm447_vm0, %v420_v41, 0  ;;  %v344_v49 = vadd.f32 %v3180_v20, %v311_v18  ;;  %v312_v54 = vmul.f32 %v3164_v17, %v279_v38  ;;  %v282_v41 = vld [vmem:[%s3175_s13 + $0x80] sm:$0xff] }
  0x33   : > { %v3316_v50 = vsub.f32 %v473_v36, %v3307_v39  ;;  %v3318_v51 = vand.u32 4294901760, %v479_v48  ;;  %v421_v52 = vsel %vm369_vm12, %v343_v10, %v395_v44  ;;  %v3325_v57 = vsub.f32 %v476_v40, %v3311_v47 }
  0x34   : > { %2749 = vmatmul.mubr.f32.gmra.mrb[6].mxu0 %v667_v46  ;;  %v668_v56 = vsub.f32 %v3303_v29, %v667_v46  ;;  %v482_v58 = vsel %vm447_vm0, %v421_v52, 0  ;;  %vm370_vm13 = vcmp.ge.f32.partialorder %v344_v49, 0.0  ;;  %v396_v1 = vmul.f32 0.2, %v344_v49 }
  0x35   : > { %v677_v59 = vand.u32 4294901760, %v3316_v50  ;;  %v3330_v60 = vsub.f32 %v479_v48, %v3318_v51  ;;  %v3332_v61 = vand.u32 4294901760, %v482_v58  ;;  %v687_v5 = vand.u32 4294901760, %v3325_v57 }
  0x36   : > { %v669_v4 = vand.u32 4294901760, %v668_v56  ;;  %v345_v9 = vadd.f32 %v3180_v20, %v312_v54  ;;  %v313_v10 = vmul.f32 %v3164_v17, %v280_v55  ;;  %v422_v18 = vsel %vm370_vm13, %v344_v49, %v396_v1 }
  0x37   : > { %2751 = vmatprep.mubr.f32.mxu0 %v677_v59  ;;  %v678_v15 = vsub.f32 %v3316_v50, %v677_v59  ;;  %v697_v45 = vand.u32 4294901760, %v3330_v60  ;;  %v3340_v16 = vsub.f32 %v482_v58, %v3332_v61  ;;  %v688_v22 = vsub.f32 %v3325_v57, %v687_v5 }
  0x38   : > { %2608 = vmatmul.mubr.f32.gmra.mrb[6].mxu1 %v669_v4  ;;  %2752 = vmatmul.mubr.f32.gmra.mrb[8].mxu0 %v687_v5  ;;  %v485_v24 = vsel %vm447_vm0, %v422_v18, 0  ;;  %vm371_vm14 = vcmp.ge.f32.partialorder %v345_v9, 0.0  ;;  %v397_v31 = vmul.f32 0.2, %v345_v9  ;;  %v346_v38 = vadd.f32 %v3180_v20, %v313_v10  ;;  %v283_v4 = vld [vmem:[%s3175_s13 + $0x88] sm:$0xff] }
  0x39   : > { %v679_v32 = vand.u32 4294901760, %v678_v15  ;;  %2754 = vmatprep.mubr.f32.mxu0 %v697_v45  ;;  %v707_v33 = vand.u32 4294901760, %v3340_v16  ;;  %v698_v34 = vsub.f32 %v3330_v60, %v697_v45  ;;  %v3347_v35 = vand.u32 4294901760, %v485_v24 }
  0x3a   : > { %v689_v36 = vand.u32 4294901760, %v688_v22  ;;  %v423_v37 = vsel %vm371_vm14, %v345_v9, %v397_v31  ;;  %v314_v40 = vmul.f32 %v3164_v17, %v281_v21  ;;  %vm372_vm15 = vcmp.ge.f32.partialorder %v346_v38, 0.0 }
  0x3b   : > { %2610 = vmatprep.mubr.f32.mxu1 %v679_v32  ;;  %v699_v44 = vand.u32 4294901760, %v698_v34  ;;  %v3353_v46 = vsub.f32 %v485_v24, %v3347_v35  ;;  %v708_v48 = vsub.f32 %v3340_v16, %v707_v33  ;;  %v488_v49 = vsel %vm447_vm0, %v423_v37, 0  ;;  %v284_v32 = vld [vmem:[%s3175_s13 + $0x90] sm:$0xff]  ;;  %v286_v34 = vld [vmem:[%s3175_s13 + $0xa0] sm:$0xff] }
  0x3c   : > { %2611 = vmatmul.mubr.f32.gmra.mrb[8].mxu1 %v689_v36  ;;  %2755 = vmatmul.mubr.f32.gmra.mrb[10].mxu0 %v707_v33  ;;  %v3357_v52 = vand.u32 4294901760, %v488_v49  ;;  %v398_v54 = vmul.f32 0.2, %v346_v38  ;;  %v347_v55 = vadd.f32 %v3180_v20, %v314_v40  ;;  %v881_v59 = vand.u32 4294901760, %v3189_v28  ;;  %v285_v33 = vld [vmem:[%s3175_s13 + $0x98] sm:$0xff] }
  0x3d   : > { %2613 = vmatprep.mubr.f32.mxu1 %v699_v44  ;;  %v717_v56 = vand.u32 4294901760, %v3353_v46  ;;  %v709_v58 = vand.u32 4294901760, %v708_v48  ;;  %v315_v1 = vmul.f32 %v3164_v17, %v282_v41  ;;  %v316_v31 = vmul.f32 %v3164_v17, %v283_v4 }
  0x3e   : > { %v3365_v5 = vsub.f32 %v488_v49, %v3357_v52  ;;  %v424_v9 = vsel %vm372_vm15, %v346_v38, %v398_v54  ;;  %vm373_vm1 = vcmp.ge.f32.partialorder %v347_v55, 0.0  ;;  %v399_v10 = vmul.f32 0.2, %v347_v55 }
  0x3f   : > { %2757 = vmatprep.mubr.f32.mxu0 %v717_v56  ;;  %v718_v15 = vsub.f32 %v3353_v46, %v717_v56  ;;  %v491_v45 = vsel %vm447_vm0, %v424_v9, 0  ;;  %v2884_v28 = vpack.c.bf16 %v881_v59, %v874_v42  ;;  %v348_v18 = vadd.f32 %v3180_v20, %v315_v1 }
  0x40   : > { %2614 = vmatmul.mubr.f32.gmra.mrb[10].mxu1 %v709_v58  ;;  %v727_v21 = vand.u32 4294901760, %v3365_v5  ;;  %v3373_v22 = vand.u32 4294901760, %v491_v45  ;;  %v425_v24 = vsel %vm373_vm1, %v347_v55, %v399_v10  ;;  %v349_v41 = vadd.f32 %v3180_v20, %v316_v31 }
  0x41   : > { %v719_v36 = vand.u32 4294901760, %v718_v15  ;;  %v494_v37 = vsel %vm447_vm0, %v425_v24, 0  ;;  %2885 = vmatprep.subr.bf16.mxu1 %v2884_v28  ;;  %vm374_vm2 = vcmp.ge.f32.partialorder %v348_v18, 0.0  ;;  %v400_v27 = vmul.f32 0.2, %v348_v18 }
  0x42   : > { %2758 = vmatmul.mubr.f32.gmra.mrb[12].mxu0 %v727_v21  ;;  %v3381_v42 = vsub.f32 %v491_v45, %v3373_v22  ;;  %v728_v38 = vsub.f32 %v3365_v5, %v727_v21  ;;  %v3384_v40 = vand.u32 4294901760, %v494_v37  ;;  %2887 = vmatpush3.bf16.msra.mxu1 %v2884_v28  ;;  %v317_v48 = vmul.f32 %v3164_v17, %v284_v32 }
  0x43   : > { %2616 = vmatprep.mubr.f32.mxu1 %v719_v36  ;;  %v426_v44 = vsel %vm374_vm2, %v348_v18, %v400_v27  ;;  %v318_v49 = vmul.f32 %v3164_v17, %v285_v33  ;;  %v319_v54 = vmul.f32 %v3164_v17, %v286_v34  ;;  %2889 = vmatprep.subr.bf16.mxu1 %v3193_v30  ;;  %vm375_vm3 = vcmp.ge.f32.partialorder %v349_v41, 0.0 }
  0x44   : > { %3843 = vst [vmem:[#allocation2_spill] sm:$0xff] %v3381_v42  ;;  %v737_v55 = vand.u32 4294901760, %v3381_v42  ;;  %v729_v56 = vand.u32 4294901760, %v728_v38  ;;  %v3392_v58 = vsub.f32 %v494_v37, %v3384_v40  ;;  %v497_v59 = vsel %vm447_vm0, %v426_v44, 0  ;;  %v287_v38 = vld [vmem:[%s3175_s13 + $0xa8] sm:$0xff]  ;;  %v288_v44 = vld [vmem:[%s3175_s13 + $0xb0] sm:$0xff] }
  0x45   : > { %v3396_v1 = vand.u32 4294901760, %v497_v59  ;;  %v401_v4 = vmul.f32 0.2, %v349_v41  ;;  %v350_v9 = vadd.f32 %v3180_v20, %v317_v48  ;;  %v351_v45 = vadd.f32 %v3180_v20, %v318_v49 }
  0x46   : > { %3844 = vst [vmem:[#allocation3_spill] sm:$0xff] %v3392_v58  ;;  %2760 = vmatprep.mubr.f32.mxu0 %v737_v55  ;;  %2617 = vmatmul.mubr.f32.gmra.mrb[12].mxu1 %v729_v56  ;;  %v747_v10 = vand.u32 4294901760, %v3392_v58  ;;  %v738_v15 = vsub.f32 %v3381_v42, %v737_v55  ;;  %v352_v28 = vadd.f32 %v3180_v20, %v319_v54  ;;  %v291_v42 = vld [vmem:[%s3175_s13 + $0xc8] sm:$0xff] }
  0x47   : > { %v3404_v18 = vsub.f32 %v497_v59, %v3396_v1  ;;  %v427_v21 = vsel %vm375_vm3, %v349_v41, %v401_v4  ;;  %vm376_vm4 = vcmp.ge.f32.partialorder %v350_v9, 0.0  ;;  %v402_v24 = vmul.f32 0.2, %v350_v9  ;;  %v289_v4 = vld [vmem:[%s3175_s13 + $0xb8] sm:$0xff] }
  0x48   : > { %2761 = vmatmul.mubr.f32.gmra.mrb[14].mxu0 %v747_v10  ;;  %v739_v31 = vand.u32 4294901760, %v738_v15  ;;  %v748_v32 = vsub.f32 %v3392_v58, %v747_v10  ;;  %v500_v33 = vsel %vm447_vm0, %v427_v21, 0  ;;  %vm377_vm5 = vcmp.ge.f32.partialorder %v351_v45, 0.0 }
  0x49   : > { %3845 = vst [vmem:[#allocation4_spill] sm:$0xff] %v3404_v18  ;;  %v757_v34 = vand.u32 4294901760, %v3404_v18  ;;  %v3409_v36 = vand.u32 4294901760, %v500_v33  ;;  %v428_v37 = vsel %vm376_vm4, %v350_v9, %v402_v24  ;;  %v403_v27 = vmul.f32 0.2, %v351_v45 }
  0x4a   : > { %2619 = vmatprep.mubr.f32.mxu1 %v739_v31  ;;  %v749_v41 = vand.u32 4294901760, %v748_v32  ;;  %v503_v48 = vsel %vm447_vm0, %v428_v37, 0  ;;  %vm378_vm6 = vcmp.ge.f32.partialorder %v352_v28, 0.0  ;;  %v404_v49 = vmul.f32 0.2, %v352_v28 }
  0x4b   : > { %2763 = vmatprep.mubr.f32.mxu0 %v757_v34  ;;  %v3415_v54 = vsub.f32 %v500_v33, %v3409_v36  ;;  %v758_v55 = vsub.f32 %v3404_v18, %v757_v34  ;;  %v3418_v56 = vand.u32 4294901760, %v503_v48  ;;  %v429_v59 = vsel %vm377_vm5, %v351_v45, %v403_v27 }
  0x4c   : > { %2620 = vmatmul.mubr.f32.gmra.mrb[14].mxu1 %v749_v41  ;;  %v506_v9 = vsel %vm447_vm0, %v429_v59, 0  ;;  %v430_v10 = vsel %vm378_vm6, %v352_v28, %v404_v49  ;;  %v320_v15 = vmul.f32 %v3164_v17, %v287_v38  ;;  %v321_v21 = vmul.f32 %v3164_v17, %v288_v44 }
  0x4d   : > { %3846 = vst [vmem:[#allocation5_spill] sm:$0xff] %v3415_v54  ;;  %v767_v24 = vand.u32 4294901760, %v3415_v54  ;;  %v759_v31 = vand.u32 4294901760, %v758_v55  ;;  %v3427_v32 = vsub.f32 %v503_v48, %v3418_v56  ;;  %v3429_v33 = vand.u32 4294901760, %v506_v9  ;;  %v290_v48 = vld [vmem:[%s3175_s13 + $0xc0] sm:$0xff] }
  0x4e   : > { %v509_v45 = vsel %vm447_vm0, %v430_v10, 0  ;;  %v353_v34 = vadd.f32 %v3180_v20, %v320_v15  ;;  %v354_v37 = vadd.f32 %v3180_v20, %v321_v21  ;;  %v322_v28 = vmul.f32 %v3164_v17, %v289_v4 }
  0x4f   : > { %2764 = vmatmul.mubr.f32.gmra.mrb[16].mxu0 %v767_v24  ;;  %2622 = vmatprep.mubr.f32.mxu1 %v759_v31  ;;  %v777_v27 = vand.u32 4294901760, %v3427_v32  ;;  %v768_v38 = vsub.f32 %v3415_v54, %v767_v24  ;;  %v3438_v44 = vsub.f32 %v506_v9, %v3429_v33  ;;  %v3440_v41 = vand.u32 4294901760, %v509_v45 }
  0x50   : > { %vm379_vm7 = vcmp.ge.f32.partialorder %v353_v34, 0.0  ;;  %v405_v49 = vmul.f32 0.2, %v353_v34  ;;  %vm380_vm8 = vcmp.ge.f32.partialorder %v354_v37, 0.0  ;;  %v406_v55 = vmul.f32 0.2, %v354_v37 }
  0x51   : > { %2766 = vmatprep.mubr.f32.mxu0 %v777_v27  ;;  %v769_v59 = vand.u32 4294901760, %v768_v38  ;;  %v787_v4 = vand.u32 4294901760, %v3438_v44  ;;  %v778_v10 = vsub.f32 %v3427_v32, %v777_v27  ;;  %v3446_v15 = vsub.f32 %v509_v45, %v3440_v41 }
  0x52   : > { %v431_v21 = vsel %vm379_vm7, %v353_v34, %v405_v49  ;;  %v432_v9 = vsel %vm380_vm8, %v354_v37, %v406_v55  ;;  %v355_v24 = vadd.f32 %v3180_v20, %v322_v28  ;;  %v323_v31 = vmul.f32 %v3164_v17, %v290_v48 }
  0x53   : > { %2623 = vmatmul.mubr.f32.gmra.mrb[16].mxu1 %v769_v59  ;;  %2767 = vmatmul.mubr.f32.gmra.mrb[18].mxu0 %v787_v4  ;;  %v779_v54 = vand.u32 4294901760, %v778_v10  ;;  %v797_v18 = vand.u32 4294901760, %v3446_v15  ;;  %v788_v38 = vsub.f32 %v3438_v44, %v787_v4  ;;  %v512_v58 = vsel %vm447_vm0, %v431_v21, 0 }
  0x54   : > { %v3454_v27 = vand.u32 4294901760, %v512_v58  ;;  %v515_v45 = vsel %vm447_vm0, %v432_v9, 0  ;;  %vm381_vm9 = vcmp.ge.f32.partialorder %v355_v24, 0.0  ;;  %v407_v34 = vmul.f32 0.2, %v355_v24 }
  0x55   : > { %2625 = vmatprep.mubr.f32.mxu1 %v779_v54  ;;  %2769 = vmatprep.mubr.f32.mxu0 %v797_v18  ;;  %v789_v37 = vand.u32 4294901760, %v788_v38  ;;  %v798_v28 = vsub.f32 %v3446_v15, %v797_v18  ;;  %v3458_v48 = vand.u32 4294901760, %v515_v45  ;;  %v356_v49 = vadd.f32 %v3180_v20, %v323_v31 }
  0x56   : > { %v3462_v55 = vsub.f32 %v512_v58, %v3454_v27  ;;  %v433_v59 = vsel %vm381_vm9, %v355_v24, %v407_v34  ;;  %v324_v4 = vmul.f32 %v3164_v17, %v291_v42 }
  0x57   : > { %2626 = vmatmul.mubr.f32.gmra.mrb[18].mxu1 %v789_v37  ;;  %v799_v10 = vand.u32 4294901760, %v798_v28  ;;  %v3466_v21 = vsub.f32 %v515_v45, %v3458_v48  ;;  %v518_v54 = vsel %vm447_vm0, %v433_v59, 0  ;;  %vm382_vm10 = vcmp.ge.f32.partialorder %v356_v49, 0.0 }
  0x58   : > { %v807_v18 = vand.u32 4294901760, %v3462_v55  ;;  %v3470_v9 = vand.u32 4294901760, %v518_v54  ;;  %v408_v38 = vmul.f32 0.2, %v356_v49  ;;  %v357_v31 = vadd.f32 %v3180_v20, %v324_v4 }
  0x59   : > { %2628 = vmatprep.mubr.f32.mxu1 %v799_v10  ;;  %v817_v58 = vand.u32 4294901760, %v3466_v21 }
  0x5a   : > { %2770 = vmatmul.mubr.f32.gmra.mrb[20].mxu0 %v807_v18  ;;  %v808_v17 = vsub.f32 %v3462_v55, %v807_v18  ;;  %v3476_v42 = vsub.f32 %v518_v54, %v3470_v9  ;;  %v434_v24 = vsel %vm382_vm10, %v356_v49, %v408_v38  ;;  %vm383_vm11 = vcmp.ge.f32.partialorder %v357_v31, 0.0 }
  0x5b   : > { %2772 = vmatprep.mubr.f32.mxu0 %v817_v58  ;;  %v818_v45 = vsub.f32 %v3466_v21, %v817_v58  ;;  %v521_v34 = vsel %vm447_vm0, %v434_v24, 0  ;;  %v409_v37 = vmul.f32 0.2, %v357_v31 }
  0x5c   : > { %v809_v28 = vand.u32 4294901760, %v808_v17  ;;  %v827_v20 = vand.u32 4294901760, %v3476_v42  ;;  %v3481_v59 = vand.u32 4294901760, %v521_v34 }
  0x5d   : > { %v819_v4 = vand.u32 4294901760, %v818_v45  ;;  %v435_v10 = vsel %vm383_vm11, %v357_v31, %v409_v37 }
  0x5e   : > { %2629 = vmatmul.mubr.f32.gmra.mrb[20].mxu1 %v809_v28  ;;  %2773 = vmatmul.mubr.f32.gmra.mrb[22].mxu0 %v827_v20  ;;  %v3484_v54 = vsub.f32 %v521_v34, %v3481_v59  ;;  %v828_v49 = vsub.f32 %v3476_v42, %v827_v20  ;;  %v524_v18 = vsel %vm447_vm0, %v435_v10, 0 }
  0x5f   : > { %2631 = vmatprep.mubr.f32.mxu1 %v819_v4  ;;  %v3488_v38 = vand.u32 4294901760, %v524_v18 }
  0x60   : > { %v837_v58 = vand.u32 4294901760, %v3484_v54  ;;  %v829_v17 = vand.u32 4294901760, %v828_v49 }
  0x61   : > { %v3492_v24 = vsub.f32 %v524_v18, %v3488_v38 }
  0x62   : > { %2775 = vmatprep.mubr.f32.mxu0 %v837_v58  ;;  %2632 = vmatmul.mubr.f32.gmra.mrb[22].mxu1 %v829_v17  ;;  %v838_v31 = vsub.f32 %v3484_v54, %v837_v58 }
  0x63   : > { %v847_v45 = vand.u32 4294901760, %v3492_v24 }
  0x64   : > { %v839_v34 = vand.u32 4294901760, %v838_v31 }
  0x65   : > { %2776 = vmatmul.mubr.f32.gmra.mrb[24].mxu0 %v847_v45  ;;  %v848_v37 = vsub.f32 %v3492_v24, %v847_v45 }
  0x66   : > { %2634 = vmatprep.mubr.f32.mxu1 %v839_v34  ;;  %2786 = vmatprep.mubr.f32.mxu0 %v3220_v62 }
  0x67   : > { %v849_v28 = vand.u32 4294901760, %v848_v37 }
  0x69   : > { %2635 = vmatmul.mubr.f32.gmra.mrb[24].mxu1 %v849_v28  ;;  %2787 = vmatmul.mubr.f32.vlgmr.msra.gmra.mrb[0].mxu0 %v3222_v63 }
  0x6a   : > { %2645 = vmatprep.mubr.f32.mxu1 %v3220_v62  ;;  %2789 = vmatprep.mubr.f32.mxu0 %v3226_v2 }
  0x6b   : > { %2915 = vmatpush3.bf16.msra.mxu0 %v3150_v8  ;;  %v3847_v8 = vld [vmem:[#allocation2_spill] sm:$0xff] }
  0x6c   : > { %2917 = vmatprep.subr.bf16.mxu0 %v3152_v12 }
  0x6d   : > { %2646 = vmatmul.mubr.f32.vlgmr.msra.gmra.mrb[0].mxu1 %v3222_v63  ;;  %2790 = vmatmul.mubr.f32.gmra.mrb[2].mxu0 %v3228_v3 }
  0x6e   : > { %2891 = vmatpush3.bf16.msra.mxu1 %v3193_v30  ;;  %2648 = vmatprep.mubr.f32.mxu1 %v3226_v2  ;;  %v3850_v30 = vld [vmem:[#allocation5_spill] sm:$0xff] }
  0x6f   : > { %2792 = vmatprep.mubr.f32.mxu0 %v3245_v14  ;;  %2893 = vmatprep.subr.bf16.mxu1 %v3166_v19 }
  0x70   : > { %2919 = vmatpush3.bf16.msra.mxu0 %v3152_v12  ;;  %v3848_v12 = vld [vmem:[#allocation3_spill] sm:$0xff] }
  0x71   : > { %2649 = vmatmul.mubr.f32.gmra.mrb[2].mxu1 %v3228_v3  ;;  %2793 = vmatmul.mubr.f32.gmra.mrb[4].mxu0 %v3264_v43 }
  0x72   : > { %2651 = vmatprep.mubr.f32.mxu1 %v3245_v14  ;;  %2795 = vmatprep.mubr.f32.mxu0 %v3276_v23 }
  0x73   : > { %2895 = vmatpush3.bf16.msra.mxu1 %v3166_v19  ;;  %v3849_v19 = vld [vmem:[#allocation4_spill] sm:$0xff] }
  0x75   : > { %2652 = vmatmul.mubr.f32.gmra.mrb[4].mxu1 %v3264_v43  ;;  %2796 = vmatmul.mubr.f32.gmra.mrb[6].mxu0 %v3298_v26 }
  0x76   : > { %2654 = vmatprep.mubr.f32.mxu1 %v3276_v23  ;;  %2798 = vmatprep.mubr.f32.mxu0 %v3307_v39 }
  0x79   : > { %2655 = vmatmul.mubr.f32.gmra.mrb[6].mxu1 %v3298_v26  ;;  %2799 = vmatmul.mubr.f32.gmra.mrb[8].mxu0 %v3311_v47 }
  0x7a   : > { %2657 = vmatprep.mubr.f32.mxu1 %v3307_v39  ;;  %2801 = vmatprep.mubr.f32.mxu0 %v3318_v51 }
  0x7d   : > { %2658 = vmatmul.mubr.f32.gmra.mrb[8].mxu1 %v3311_v47  ;;  %2802 = vmatmul.mubr.f32.gmra.mrb[10].mxu0 %v3332_v61 }
  0x7e   : > { %2660 = vmatprep.mubr.f32.mxu1 %v3318_v51  ;;  %2804 = vmatprep.mubr.f32.mxu0 %v3347_v35 }
  0x81   : > { %2661 = vmatmul.mubr.f32.gmra.mrb[10].mxu1 %v3332_v61  ;;  %2805 = vmatmul.mubr.f32.gmra.mrb[12].mxu0 %v3357_v52 }
  0x82   : > { %2663 = vmatprep.mubr.f32.mxu1 %v3347_v35  ;;  %2807 = vmatprep.mubr.f32.mxu0 %v3373_v22 }
  0x85   : > { %2664 = vmatmul.mubr.f32.gmra.mrb[12].mxu1 %v3357_v52  ;;  %2808 = vmatmul.mubr.f32.gmra.mrb[14].mxu0 %v3384_v40 }
  0x86   : > { %2666 = vmatprep.mubr.f32.mxu1 %v3373_v22  ;;  %2810 = vmatprep.mubr.f32.mxu0 %v3396_v1 }
  0x89   : > { %2667 = vmatmul.mubr.f32.gmra.mrb[14].mxu1 %v3384_v40  ;;  %2811 = vmatmul.mubr.f32.gmra.mrb[16].mxu0 %v3409_v36 }
  0x8a   : > { %2669 = vmatprep.mubr.f32.mxu1 %v3396_v1  ;;  %2813 = vmatprep.mubr.f32.mxu0 %v3418_v56 }
  0x8d   : > { %2670 = vmatmul.mubr.f32.gmra.mrb[16].mxu1 %v3409_v36  ;;  %2814 = vmatmul.mubr.f32.gmra.mrb[18].mxu0 %v3429_v33 }
  0x8e   : > { %2672 = vmatprep.mubr.f32.mxu1 %v3418_v56  ;;  %2816 = vmatprep.mubr.f32.mxu0 %v3440_v41 }
  0x91   : > { %2673 = vmatmul.mubr.f32.gmra.mrb[18].mxu1 %v3429_v33  ;;  %2817 = vmatmul.mubr.f32.gmra.mrb[20].mxu0 %v3454_v27 }
  0x92   : > { %2675 = vmatprep.mubr.f32.mxu1 %v3440_v41  ;;  %2819 = vmatprep.mubr.f32.mxu0 %v3458_v48 }
  0x95   : > { %2676 = vmatmul.mubr.f32.gmra.mrb[20].mxu1 %v3454_v27  ;;  %2820 = vmatmul.mubr.f32.gmra.mrb[22].mxu0 %v3470_v9 }
  0x96   : > { %2678 = vmatprep.mubr.f32.mxu1 %v3458_v48  ;;  %2822 = vmatprep.mubr.f32.mxu0 %v3481_v59 }
  0x99   : > { %2679 = vmatmul.mubr.f32.gmra.mrb[22].mxu1 %v3470_v9  ;;  %2823 = vmatmul.mubr.f32.gmra.mrb[24].mxu0 %v3488_v38 }
  0x9a   : > { %2681 = vmatprep.mubr.f32.mxu1 %v3481_v59  ;;  %2833 = vmatprep.mubr.f32.mxu0 %v3220_v62  ;;  %v2113_v62 = vlaneseq }
  0x9d   : > { %2682 = vmatmul.mubr.f32.gmra.mrb[24].mxu1 %v3488_v38  ;;  %2834 = vmatmul.mubr.f32.vlgmr.msra.gmra.mrb[0].mxu0 %v3222_v63  ;;  %v3607_v63 = vshrl.u32 %v2113_v62, 7 }
  0x9e   : > { %2692 = vmatprep.mubr.f32.mxu1 %v3232_v6  ;;  %2836 = vmatprep.mubr.f32.mxu0 %v3226_v2 }
  0x9f   : > { %v2115_v2 = vadd.s32 8, %v3607_v63  ;;  %v2117_v6 = vadd.s32 24, %v3607_v63  ;;  %v2124_v20 = vadd.s32 80, %v3607_v63  ;;  %v2127_v18 = vadd.s32 104, %v3607_v63 }
  0xa0   : > { %v2126_v28 = vadd.s32 96, %v3607_v63 }
  0xa1   : > { %2693 = vmatmul.mubr.f32.vlgmr.msra.gmra.mrb[0].mxu1 %v3235_v7  ;;  %2837 = vmatmul.mubr.f32.gmra.mrb[2].mxu0 %v3228_v3  ;;  %v3611_v3 = vstv %s2112_s16  ;;  %v2116_v7 = vadd.s32 16, %v3607_v63 }
  0xa2   : > { %2695 = vmatprep.mubr.f32.mxu1 %v3240_v11  ;;  %2839 = vmatprep.mubr.f32.mxu0 %v3245_v14 }
  0xa5   : > { %2696 = vmatmul.mubr.f32.gmra.mrb[2].mxu1 %v3243_v13  ;;  %2840 = vmatmul.mubr.f32.gmra.mrb[4].mxu0 %v3264_v43  ;;  %v2119_v13 = vadd.s32 40, %v3607_v63  ;;  %v2142_v43 = vadd.s32 %v3611_v3, %v2115_v2 }
  0xa6   : > { %2698 = vmatprep.mubr.f32.mxu1 %v3253_v25  ;;  %2842 = vmatprep.mubr.f32.mxu0 %v3276_v23  ;;  %v3619_v25 = vld [vmem:[%s3836_s4] ss:$0 sm:$0xff]  ;;  %v2118_v23 = vadd.s32 32, %v3607_v63 }
  0xa7   : > { %vm2168_vm0 = vcmp.lt.s32.totalorder %v2142_v43, 601 }
  0xa9   : > { %2699 = vmatmul.mubr.f32.gmra.mrb[4].mxu1 %v3274_v53  ;;  %2843 = vmatmul.mubr.f32.gmra.mrb[6].mxu0 %v3298_v26  ;;  %v2141_v53 = vadd.s32 %v3611_v3, %v3607_v63  ;;  %v2143_v26 = vadd.s32 %v3611_v3, %v2116_v7  ;;  %v3686_v7 = vadd.s32 %v3611_v3, %v2127_v18 }
  0xaa   : > { %2701 = vmatprep.mubr.f32.mxu1 %v3287_v0  ;;  %2845 = vmatprep.mubr.f32.mxu0 %v3307_v39  ;;  %v2144_v0 = vadd.s32 %v3611_v3, %v2117_v6 }
  0xab   : > { %vm2167_vm12 = vcmp.lt.s32.totalorder %v2141_v53, 601  ;;  %vm2169_vm14 = vcmp.lt.s32.totalorder %v2143_v26, 601  ;;  %vm2180_vm8 = vcmp.lt.s32.totalorder %v3686_v7, 601 }
  0xac   : > { %vm2170_vm13 = vcmp.lt.s32.totalorder %v2144_v0, 601 }
  0xad   : > { %2702 = vmatmul.mubr.f32.gmra.mrb[6].mxu1 %v3303_v29  ;;  %2846 = vmatmul.mubr.f32.gmra.mrb[8].mxu0 %v3311_v47  ;;  %v2121_v29 = vadd.s32 56, %v3607_v63 }
  0xae   : > { %2704 = vmatprep.mubr.f32.mxu1 %v3316_v50  ;;  %2848 = vmatprep.mubr.f32.mxu0 %v3318_v51  ;;  %v3629_v50 = vadd.s32 %v3611_v3, %v2119_v13 }
  0xb0   : > { %vm2172_vm15 = vcmp.lt.s32.totalorder %v3629_v50, 601 }
  0xb1   : > { %2705 = vmatmul.mubr.f32.gmra.mrb[8].mxu1 %v3325_v57  ;;  %2849 = vmatmul.mubr.f32.gmra.mrb[10].mxu0 %v3332_v61  ;;  %v2120_v61 = vadd.s32 48, %v3607_v63 }
  0xb2   : > { %2707 = vmatprep.mubr.f32.mxu1 %v3330_v60  ;;  %2851 = vmatprep.mubr.f32.mxu0 %v3347_v35  ;;  %v3642_v35 = vadd.s32 %v3611_v3, %v2118_v23 }
  0xb4   : > { %vm2171_vm1 = vcmp.lt.s32.totalorder %v3642_v35, 601  ;;  %v2129_v35 = vadd.s32 120, %v3607_v63 }
  0xb5   : > { %2708 = vmatmul.mubr.f32.gmra.mrb[10].mxu1 %v3340_v16  ;;  %2852 = vmatmul.mubr.f32.gmra.mrb[12].mxu0 %v3357_v52  ;;  %v3645_v52 = vadd.s32 %v3611_v3, %v2121_v29 }
  0xb6   : > { %2710 = vmatprep.mubr.f32.mxu1 %v3353_v46  ;;  %2854 = vmatprep.mubr.f32.mxu0 %v3373_v22 }
  0xb7   : > { %vm2174_vm2 = vcmp.lt.s32.totalorder %v3645_v52, 601 }
  0xb9   : > { %2711 = vmatmul.mubr.f32.gmra.mrb[12].mxu1 %v3365_v5  ;;  %2855 = vmatmul.mubr.f32.gmra.mrb[14].mxu0 %v3384_v40 }
  0xba   : > { %2713 = vmatprep.mubr.f32.mxu1 %v3847_v8  ;;  %2857 = vmatprep.mubr.f32.mxu0 %v3396_v1  ;;  %v2123_v1 = vadd.s32 72, %v3607_v63 }
  0xbd   : > { %2714 = vmatmul.mubr.f32.gmra.mrb[14].mxu1 %v3848_v12  ;;  %2858 = vmatmul.mubr.f32.gmra.mrb[16].mxu0 %v3409_v36  ;;  %v2122_v36 = vadd.s32 64, %v3607_v63 }
  0xbe   : > { %2716 = vmatprep.mubr.f32.mxu1 %v3849_v19  ;;  %2860 = vmatprep.mubr.f32.mxu0 %v3418_v56 }
  0xbf   : > { %v3666_v49 = vadd.s32 %v3611_v3, %v2122_v36 }
  0xc1   : > { %2717 = vmatmul.mubr.f32.gmra.mrb[16].mxu1 %v3850_v30  ;;  %2861 = vmatmul.mubr.f32.gmra.mrb[18].mxu0 %v3429_v33  ;;  %v3681_v30 = vadd.s32 %v3611_v3, %v2124_v20  ;;  %vm2175_vm5 = vcmp.lt.s32.totalorder %v3666_v49, 601  ;;  %v2132_v49 = vadd.s32 144, %v3607_v63 }
  0xc2   : > { %2719 = vmatprep.mubr.f32.mxu1 %v3427_v32  ;;  %2863 = vmatprep.mubr.f32.mxu0 %v3440_v41  ;;  %v3653_v41 = vadd.s32 %v3611_v3, %v2120_v61 }
  0xc3   : > { %vm2177_vm7 = vcmp.lt.s32.totalorder %v3681_v30, 601 }
  0xc4   : > { %vm2173_vm3 = vcmp.lt.s32.totalorder %v3653_v41, 601  ;;  %v3716_v41 = vadd.s32 %v3611_v3, %v2129_v35  ;;  %v3753_v35 = vadd.s32 %v3611_v3, %v2132_v49 }
  0xc5   : > { %2720 = vmatmul.mubr.f32.gmra.mrb[18].mxu1 %v3438_v44  ;;  %2864 = vmatmul.mubr.f32.gmra.mrb[20].mxu0 %v3454_v27 }
  0xc6   : > { %2722 = vmatprep.mubr.f32.mxu1 %v3446_v15  ;;  %2866 = vmatprep.mubr.f32.mxu0 %v3458_v48  ;;  %v2125_v15 = vadd.s32 88, %v3607_v63  ;;  %vm2182_vm10 = vcmp.lt.s32.totalorder %v3716_v41, 601  ;;  %v2137_v41 = vadd.s32 184, %v3607_v63 }
  0xc8   : > { %v3673_v31 = vadd.s32 %v3611_v3, %v2125_v15 }
  0xc9   : > { %2723 = vmatmul.mubr.f32.gmra.mrb[20].mxu1 %v3462_v55  ;;  %2867 = vmatmul.mubr.f32.gmra.mrb[22].mxu0 %v3470_v9 }
  0xca   : > { %2725 = vmatprep.mubr.f32.mxu1 %v3466_v21  ;;  %2869 = vmatprep.mubr.f32.mxu0 %v3481_v59  ;;  %vm2178_vm6 = vcmp.lt.s32.totalorder %v3673_v31, 601 }
  0xcd   : > { %2726 = vmatmul.mubr.f32.gmra.mrb[22].mxu1 %v3476_v42  ;;  %2870 = vmatmul.mubr.f32.gmra.mrb[24].mxu0 %v3488_v38 }
  0xce   : > { %2728 = vmatprep.mubr.f32.mxu1 %v3484_v54  ;;  %v3663_v54 = vadd.s32 %v3611_v3, %v2123_v1 }
  0xd0   : > { %vm2176_vm4 = vcmp.lt.s32.totalorder %v3663_v54, 601  ;;  %v2133_v54 = vadd.s32 152, %v3607_v63 }
  0xd1   : > { %2729 = vmatmul.mubr.f32.gmra.mrb[24].mxu1 %v3492_v24 }
  0xd2   : > { %v3750_v30 = vadd.s32 %v3611_v3, %v2133_v54 }
 0x170   : > { %v2835_v11 = vpop.f32.mrb[0].mxu0 }
 0x171   : > { %v1932_v14 = vpop.f32.mrb[1].mxu0 }
 0x174   : > { %v2694_v39 = vpop.f32.mrb[0].mxu1  ;;  %v2838_v47 = vpop.f32.mrb[2].mxu0 }
 0x175   : > { %v2920_v51 = vadd.f32 %v2694_v39, %v3619_v25  ;;  %v1172_v57 = vpop.f32.mrb[1].mxu1  ;;  %v1944_v60 = vpop.f32.mrb[3].mxu0  ;;  %v3697_v39 = vadd.s32 %v3611_v3, %v2126_v28 }
 0x176   : > { %v2922_v16 = vadd.f32 %v3619_v25, %v1172_v57 }
 0x177   : > { %v2921_v46 = vadd.f32 %v2920_v51, %v2835_v11  ;;  %vm2179_vm9 = vcmp.lt.s32.totalorder %v3697_v39, 601 }
 0x178   : > { %v2923_v5 = vadd.f32 %v2922_v16, %v1932_v14  ;;  %v2697_v22 = vpop.f32.mrb[2].mxu1  ;;  %v2841_v40 = vpop.f32.mrb[4].mxu0 }
 0x179   : > { %2087 = vst [vmem:[%s3638_s23 + $0x8] sm:$0xff] %v2921_v46  ;;  %v2194_v56 = vsel %vm2168_vm0, %v2921_v46, 0.0  ;;  %v2924_v32 = vadd.f32 %v2697_v22, %v3619_v25  ;;  %v1186_v33 = vpop.f32.mrb[3].mxu1  ;;  %v1956_v44 = vpop.f32.mrb[5].mxu0  ;;  %v2128_v46 = vadd.s32 112, %v3607_v63 }
 0x17a   : > { %v2251_v27 = vmul.f32 %v2194_v56, %v2194_v56  ;;  %2086 = vst [vmem:[%s3638_s23] sm:$0xff] %v2923_v5  ;;  %v2193_v48 = vsel %vm2167_vm12, %v2923_v5, 0.0  ;;  %v2926_v55 = vadd.f32 %v3619_v25, %v1186_v33  ;;  %v2131_v5 = vadd.s32 136, %v3607_v63 }
 0x17b   : > { %v2219_v21 = vadd.f32 %v2194_v56, %v2193_v48  ;;  %v2250_v9 = vmul.f32 %v2193_v48, %v2193_v48  ;;  %v2925_v42 = vadd.f32 %v2924_v32, %v2838_v47 }
 0x17c   : > { %v2927_v59 = vadd.f32 %v2926_v55, %v1944_v60  ;;  %v2700_v4 = vpop.f32.mrb[4].mxu1  ;;  %v2844_v10 = vpop.f32.mrb[6].mxu0 }
 0x17d   : > { %v2276_v38 = vadd.f32 %v2251_v27, %v2250_v9  ;;  %2089 = vst [vmem:[%s3638_s23 + $0x18] sm:$0xff] %v2925_v42  ;;  %v2928_v58 = vadd.f32 %v2700_v4, %v3619_v25  ;;  %v1200_v17 = vpop.f32.mrb[5].mxu1  ;;  %v1968_v24 = vpop.f32.mrb[7].mxu0  ;;  %v2196_v45 = vsel %vm2170_vm13, %v2925_v42, 0.0  ;;  %v2130_v27 = vadd.s32 128, %v3607_v63 }
 0x17e   : > { %2088 = vst [vmem:[%s3638_s23 + $0x10] sm:$0xff] %v2927_v59  ;;  %v2195_v34 = vsel %vm2169_vm14, %v2927_v59, 0.0  ;;  %v2930_v37 = vadd.f32 %v3619_v25, %v1200_v17  ;;  %v2253_v11 = vmul.f32 %v2196_v45, %v2196_v45  ;;  %v3719_v59 = vadd.s32 %v3611_v3, %v2128_v46 }
 0x17f   : > { %v2220_v8 = vadd.f32 %v2219_v21, %v2195_v34  ;;  %v2252_v12 = vmul.f32 %v2195_v34, %v2195_v34  ;;  %v2929_v19 = vadd.f32 %v2928_v58, %v2841_v40  ;;  %v3722_v4 = vadd.s32 %v3611_v3, %v2131_v5 }
 0x180   : > { %v2931_v62 = vadd.f32 %v2930_v37, %v1956_v44  ;;  %v2703_v2 = vpop.f32.mrb[6].mxu1  ;;  %v2847_v6 = vpop.f32.mrb[8].mxu0  ;;  %v3733_v28 = vadd.s32 %v3611_v3, %v2130_v27  ;;  %vm2181_vm11 = vcmp.lt.s32.totalorder %v3719_v59, 601  ;;  %v2135_v46 = vadd.s32 168, %v3607_v63 }
 0x181   : > { %v2277_v13 = vadd.f32 %v2276_v38, %v2252_v12  ;;  %2091 = vst [vmem:[%s3638_s23 + $0x28] sm:$0xff] %v2929_v19  ;;  %v2221_v14 = vadd.f32 %v2220_v8, %v2196_v45  ;;  %v2932_v43 = vadd.f32 %v2703_v2, %v3619_v25  ;;  %v1214_v53 = vpop.f32.mrb[7].mxu1  ;;  %v1980_v23 = vpop.f32.mrb[9].mxu0  ;;  %v2198_v0 = vsel %vm2172_vm15, %v2929_v19, 0.0 }
 0x182   : > { %2090 = vst [vmem:[%s3638_s23 + $0x20] sm:$0xff] %v2931_v62  ;;  %v2197_v26 = vsel %vm2171_vm1, %v2931_v62, 0.0  ;;  %v2934_v29 = vadd.f32 %v3619_v25, %v1214_v53  ;;  %v2255_v22 = vmul.f32 %v2198_v0, %v2198_v0  ;;  %vm2184_vm0 = vcmp.lt.s32.totalorder %v3722_v4, 601 }
 0x183   : > { %v2222_v47 = vadd.f32 %v2221_v14, %v2197_v26  ;;  %v2254_v51 = vmul.f32 %v2197_v26, %v2197_v26  ;;  %v2278_v57 = vadd.f32 %v2277_v13, %v2253_v11  ;;  %v2933_v60 = vadd.f32 %v2932_v43, %v2844_v10 }
 0x184   : > { %v2935_v50 = vadd.f32 %v2934_v29, %v1968_v24  ;;  %v2706_v61 = vpop.f32.mrb[8].mxu1  ;;  %v2850_v16 = vpop.f32.mrb[10].mxu0  ;;  %vm2183_vm12 = vcmp.lt.s32.totalorder %v3733_v28, 601  ;;  %vm2186_vm13 = vcmp.lt.s32.totalorder %v3750_v30, 601  ;;  %vm2185_vm14 = vcmp.lt.s32.totalorder %v3753_v35, 601 }
 0x185   : > { %v2279_v40 = vadd.f32 %v2278_v57, %v2254_v51  ;;  %2093 = vst [vmem:[%s3638_s23 + $0x38] sm:$0xff] %v2933_v60  ;;  %v2223_v1 = vadd.f32 %v2222_v47, %v2198_v0  ;;  %v2936_v36 = vadd.f32 %v2706_v61, %v3619_v25  ;;  %v1228_v56 = vpop.f32.mrb[9].mxu1  ;;  %v1992_v32 = vpop.f32.mrb[11].mxu0  ;;  %v2200_v33 = vsel %vm2174_vm2, %v2933_v60, 0.0 }
 0x186   : > { %2092 = vst [vmem:[%s3638_s23 + $0x30] sm:$0xff] %v2935_v50  ;;  %v2199_v44 = vsel %vm2173_vm3, %v2935_v50, 0.0  ;;  %v2938_v15 = vadd.f32 %v3619_v25, %v1228_v56  ;;  %v2257_v10 = vmul.f32 %v2200_v33, %v2200_v33  ;;  %v3768_v7 = vadd.s32 %v3611_v3, %v2135_v46 }
 0x187   : > { %v2224_v48 = vadd.f32 %v2223_v1, %v2199_v44  ;;  %v2256_v55 = vmul.f32 %v2199_v44, %v2199_v44  ;;  %v2280_v21 = vadd.f32 %v2279_v40, %v2255_v22  ;;  %v2937_v9 = vadd.f32 %v2936_v36, %v2847_v6 }
 0x188   : > { %v2939_v52 = vadd.f32 %v2938_v15, %v1980_v23  ;;  %v2709_v42 = vpop.f32.mrb[10].mxu1  ;;  %v2853_v20 = vpop.f32.mrb[12].mxu0  ;;  %v2134_v15 = vadd.s32 160, %v3607_v63  ;;  %vm2188_vm15 = vcmp.lt.s32.totalorder %v3768_v7, 601  ;;  %v2136_v59 = vadd.s32 176, %v3607_v63 }
 0x189   : > { %v2281_v18 = vadd.f32 %v2280_v21, %v2256_v55  ;;  %2095 = vst [vmem:[%s3638_s23 + $0x48] sm:$0xff] %v2937_v9  ;;  %v2225_v38 = vadd.f32 %v2224_v48, %v2200_v33  ;;  %v2940_v58 = vadd.f32 %v2709_v42, %v3619_v25  ;;  %v1242_v17 = vpop.f32.mrb[11].mxu1  ;;  %v2004_v24 = vpop.f32.mrb[13].mxu0  ;;  %v2202_v45 = vsel %vm2176_vm4, %v2937_v9, 0.0 }
 0x18a   : > { %2094 = vst [vmem:[%s3638_s23 + $0x40] sm:$0xff] %v2939_v52  ;;  %v2201_v34 = vsel %vm2175_vm5, %v2939_v52, 0.0  ;;  %v2942_v37 = vadd.f32 %v3619_v25, %v1242_v17  ;;  %v2259_v13 = vmul.f32 %v2202_v45, %v2202_v45  ;;  %v2164_v4 = vadd.s32 %v3611_v3, %v2137_v41 }
 0x18b   : > { %v2226_v8 = vadd.f32 %v2225_v38, %v2201_v34  ;;  %v2258_v12 = vmul.f32 %v2201_v34, %v2201_v34  ;;  %v2282_v19 = vadd.f32 %v2281_v18, %v2257_v10  ;;  %v2941_v62 = vadd.f32 %v2940_v58, %v2850_v16 }
 0x18c   : > { %v2943_v2 = vadd.f32 %v2942_v37, %v1992_v32  ;;  %v2712_v6 = vpop.f32.mrb[12].mxu1  ;;  %v2856_v11 = vpop.f32.mrb[14].mxu0  ;;  %v3779_v34 = vadd.s32 %v3611_v3, %v2134_v15  ;;  %v2139_v28 = vadd.s32 200, %v3607_v63  ;;  %vm2190_vm2 = vcmp.lt.s32.totalorder %v2164_v4, 601 }
 0x18d   : > { %v2283_v14 = vadd.f32 %v2282_v19, %v2258_v12  ;;  %2097 = vst [vmem:[%s3638_s23 + $0x58] sm:$0xff] %v2941_v62  ;;  %v2227_v43 = vadd.f32 %v2226_v8, %v2202_v45  ;;  %v2944_v53 = vadd.f32 %v2712_v6, %v3619_v25  ;;  %v1256_v23 = vpop.f32.mrb[13].mxu1  ;;  %v2016_v0 = vpop.f32.mrb[15].mxu0  ;;  %v2204_v26 = vsel %vm2178_vm6, %v2941_v62, 0.0 }
 0x18e   : > { %2096 = vst [vmem:[%s3638_s23 + $0x50] sm:$0xff] %v2943_v2  ;;  %v2203_v29 = vsel %vm2177_vm7, %v2943_v2, 0.0  ;;  %v2946_v47 = vadd.f32 %v3619_v25, %v1256_v23  ;;  %v2261_v5 = vmul.f32 %v2204_v26, %v2204_v26  ;;  %vm2187_vm1 = vcmp.lt.s32.totalorder %v3779_v34, 601 }
 0x18f   : > { %v2228_v51 = vadd.f32 %v2227_v43, %v2203_v29  ;;  %v2260_v57 = vmul.f32 %v2203_v29, %v2203_v29  ;;  %v2284_v60 = vadd.f32 %v2283_v14, %v2259_v13  ;;  %v2945_v50 = vadd.f32 %v2944_v53, %v2853_v20 }
 0x190   : > { %v2947_v31 = vadd.f32 %v2946_v47, %v2004_v24  ;;  %v2715_v61 = vpop.f32.mrb[14].mxu1  ;;  %v2859_v16 = vpop.f32.mrb[16].mxu0  ;;  %v2166_v30 = vadd.s32 %v3611_v3, %v2139_v28  ;;  %vm2307_vm6 = vcmask 1040384  }
 0x191   : > { %v2285_v22 = vadd.f32 %v2284_v60, %v2260_v57  ;;  %2099 = vst [vmem:[%s3638_s23 + $0x68] sm:$0xff] %v2945_v50  ;;  %v2229_v40 = vadd.f32 %v2228_v51, %v2204_v26  ;;  %v2948_v1 = vadd.f32 %v2715_v61, %v3619_v25  ;;  %v1270_v36 = vpop.f32.mrb[15].mxu1  ;;  %v2028_v56 = vpop.f32.mrb[17].mxu0  ;;  %v2206_v32 = vsel %vm2180_vm8, %v2945_v50, 0.0 }
 0x192   : > { %2098 = vst [vmem:[%s3638_s23 + $0x60] sm:$0xff] %v2947_v31  ;;  %v2205_v33 = vsel %vm2179_vm9, %v2947_v31, 0.0  ;;  %v2950_v44 = vadd.f32 %v3619_v25, %v1270_v36  ;;  %v2263_v39 = vmul.f32 %v2206_v32, %v2206_v32  ;;  %v2163_v31 = vadd.s32 %v3611_v3, %v2136_v59 }
 0x193   : > { %v2230_v27 = vadd.f32 %v2229_v40, %v2205_v33  ;;  %v2262_v48 = vmul.f32 %v2205_v33, %v2205_v33  ;;  %v2286_v55 = vadd.f32 %v2285_v22, %v2261_v5  ;;  %v2949_v21 = vadd.f32 %v2948_v1, %v2856_v11 }
 0x194   : > { %v2951_v9 = vadd.f32 %v2950_v44, %v2016_v0  ;;  %v2718_v52 = vpop.f32.mrb[16].mxu1  ;;  %v2862_v42 = vpop.f32.mrb[18].mxu0  ;;  %vm2189_vm3 = vcmp.lt.s32.totalorder %v2163_v31, 601  ;;  %vm2192_vm4 = vcmp.lt.s32.totalorder %v2166_v30, 601 }
 0x195   : > { %v2287_v20 = vadd.f32 %v2286_v55, %v2262_v48  ;;  %2101 = vst [vmem:[%s3638_s23 + $0x78] sm:$0xff] %v2949_v21  ;;  %v2231_v10 = vadd.f32 %v2230_v27, %v2206_v32  ;;  %v2952_v18 = vadd.f32 %v2718_v52, %v3619_v25  ;;  %v1284_v38 = vpop.f32.mrb[17].mxu1  ;;  %v2040_v58 = vpop.f32.mrb[19].mxu0  ;;  %v2208_v17 = vsel %vm2182_vm10, %v2949_v21, 0.0 }
 0x196   : > { %2100 = vst [vmem:[%s3638_s23 + $0x70] sm:$0xff] %v2951_v9  ;;  %v2207_v24 = vsel %vm2181_vm11, %v2951_v9, 0.0  ;;  %v2954_v45 = vadd.f32 %v3619_v25, %v1284_v38  ;;  %v2265_v11 = vmul.f32 %v2208_v17, %v2208_v17  ;;  %v2138_v32 = vadd.s32 192, %v3607_v63 }
 0x197   : > { %v2232_v37 = vadd.f32 %v2231_v10, %v2207_v24  ;;  %v2264_v8 = vmul.f32 %v2207_v24, %v2207_v24  ;;  %v2288_v12 = vadd.f32 %v2287_v20, %v2263_v39  ;;  %v2953_v19 = vadd.f32 %v2952_v18, %v2859_v16 }
 0x198   : > { %v2955_v62 = vadd.f32 %v2954_v45, %v2028_v56  ;;  %v2721_v2 = vpop.f32.mrb[18].mxu1  ;;  %v2865_v6 = vpop.f32.mrb[20].mxu0  ;;  %v2165_v38 = vadd.s32 %v3611_v3, %v2138_v32 }
 0x199   : > { %v2289_v54 = vadd.f32 %v2288_v12, %v2264_v8  ;;  %2103 = vst [vmem:[%s3638_s23 + $0x88] sm:$0xff] %v2953_v19  ;;  %v2233_v49 = vadd.f32 %v2232_v37, %v2208_v17  ;;  %v2956_v13 = vadd.f32 %v2721_v2, %v3619_v25  ;;  %v1298_v14 = vpop.f32.mrb[19].mxu1  ;;  %v2052_v43 = vpop.f32.mrb[21].mxu0  ;;  %v2210_v53 = vsel %vm2184_vm0, %v2953_v19, 0.0 }
 0x19a   : > { %2102 = vst [vmem:[%s3638_s23 + $0x80] sm:$0xff] %v2955_v62  ;;  %v2209_v23 = vsel %vm2183_vm12, %v2955_v62, 0.0  ;;  %v2958_v0 = vadd.f32 %v3619_v25, %v1298_v14  ;;  %v2267_v61 = vmul.f32 %v2210_v53, %v2210_v53  ;;  %vm2191_vm5 = vcmp.lt.s32.totalorder %v2165_v38, 601 }
 0x19b   : > { %v2234_v26 = vadd.f32 %v2233_v49, %v2209_v23  ;;  %v2266_v29 = vmul.f32 %v2209_v23, %v2209_v23  ;;  %v2290_v47 = vadd.f32 %v2289_v54, %v2265_v11  ;;  %v2957_v51 = vadd.f32 %v2956_v13, %v2862_v42 }
 0x19c   : > { %v2959_v57 = vadd.f32 %v2958_v0, %v2040_v58  ;;  %v2724_v60 = vpop.f32.mrb[20].mxu1  ;;  %v2868_v50 = vpop.f32.mrb[22].mxu0 }
 0x19d   : > { %v2291_v16 = vadd.f32 %v2290_v47, %v2266_v29  ;;  %2105 = vst [vmem:[%s3638_s23 + $0x98] sm:$0xff] %v2957_v51  ;;  %v2235_v46 = vadd.f32 %v2234_v26, %v2210_v53  ;;  %v2960_v5 = vadd.f32 %v2724_v60, %v3619_v25  ;;  %v1312_v22 = vpop.f32.mrb[21].mxu1  ;;  %v2064_v40 = vpop.f32.mrb[23].mxu0  ;;  %v2212_v1 = vsel %vm2186_vm13, %v2957_v51, 0.0 }
 0x19e   : > { %2104 = vst [vmem:[%s3638_s23 + $0x90] sm:$0xff] %v2959_v57  ;;  %v2211_v36 = vsel %vm2185_vm14, %v2959_v57, 0.0  ;;  %v2962_v56 = vadd.f32 %v3619_v25, %v1312_v22  ;;  %v2269_v9 = vmul.f32 %v2212_v1, %v2212_v1 }
 0x19f   : > { %v2236_v33 = vadd.f32 %v2235_v46, %v2211_v36  ;;  %v2268_v44 = vmul.f32 %v2211_v36, %v2211_v36  ;;  %v2292_v15 = vadd.f32 %v2291_v16, %v2267_v61  ;;  %v2961_v27 = vadd.f32 %v2960_v5, %v2865_v6 }
 0x1a0   : > { %v2963_v48 = vadd.f32 %v2962_v56, %v2052_v43  ;;  %v2727_v55 = vpop.f32.mrb[22].mxu1  ;;  %v2871_v21 = vpop.f32.mrb[24].mxu0 }
 0x1a1   : > { %v2293_v35 = vadd.f32 %v2292_v15, %v2268_v44  ;;  %2107 = vst [vmem:[%s3638_s23 + $0xa8] sm:$0xff] %v2961_v27  ;;  %v2237_v52 = vadd.f32 %v2236_v33, %v2212_v1  ;;  %v2964_v42 = vadd.f32 %v2727_v55, %v3619_v25  ;;  %v1326_v39 = vpop.f32.mrb[23].mxu1  ;;  %v2076_v63 = vpop.f32.mrb[25].mxu0  ;;  %v2214_v20 = vsel %vm2188_vm15, %v2961_v27, 0.0 }
 0x1a2   : > { %2106 = vst [vmem:[%s3638_s23 + $0xa0] sm:$0xff] %v2963_v48  ;;  %v2213_v10 = vsel %vm2187_vm1, %v2963_v48, 0.0  ;;  %v2966_v18 = vadd.f32 %v3619_v25, %v1326_v39  ;;  %v2271_v12 = vmul.f32 %v2214_v20, %v2214_v20 }
 0x1a3   : > { %v2238_v58 = vadd.f32 %v2237_v52, %v2213_v10  ;;  %v2270_v17 = vmul.f32 %v2213_v10, %v2213_v10  ;;  %v2294_v24 = vadd.f32 %v2293_v35, %v2269_v9  ;;  %v2965_v45 = vadd.f32 %v2964_v42, %v2868_v50 }
 0x1a4   : > { %v2967_v37 = vadd.f32 %v2966_v18, %v2064_v40  ;;  %v2730_v8 = vpop.f32.mrb[24].mxu1 }
 0x1a5   : > { %v2295_v19 = vadd.f32 %v2294_v24, %v2270_v17  ;;  %2109 = vst [vmem:[%s3638_s23 + $0xb8] sm:$0xff] %v2965_v45  ;;  %v2239_v7 = vadd.f32 %v2238_v58, %v2214_v20  ;;  %v2968_v34 = vadd.f32 %v2730_v8, %v3619_v25  ;;  %v1340_v62 = vpop.f32.mrb[25].mxu1  ;;  %v2216_v2 = vsel %vm2190_vm2, %v2965_v45, 0.0 }
 0x1a6   : > { %2108 = vst [vmem:[%s3638_s23 + $0xb0] sm:$0xff] %v2967_v37  ;;  %v2215_v3 = vsel %vm2189_vm3, %v2967_v37, 0.0  ;;  %v2970_v6 = vadd.f32 %v3619_v25, %v1340_v62  ;;  %v2273_v13 = vmul.f32 %v2216_v2, %v2216_v2 }
 0x1a7   : > { %v2240_v41 = vadd.f32 %v2239_v7, %v2215_v3  ;;  %v2272_v59 = vmul.f32 %v2215_v3, %v2215_v3  ;;  %v2296_v11 = vadd.f32 %v2295_v19, %v2271_v12  ;;  %v2969_v54 = vadd.f32 %v2968_v34, %v2871_v21 }
 0x1a8   : > { %v2971_v49 = vadd.f32 %v2970_v6, %v2076_v63 }
 0x1a9   : > { %v2297_v14 = vadd.f32 %v2296_v11, %v2272_v59  ;;  %2111 = vst [vmem:[%s3638_s23 + $0xc8] sm:$0xff] %v2969_v54  ;;  %v2241_v43 = vadd.f32 %v2240_v41, %v2216_v2  ;;  %v2218_v53 = vsel %vm2192_vm4, %v2969_v54, 0.0 }
 0x1aa   : > { %2110 = vst [vmem:[%s3638_s23 + $0xc0] sm:$0xff] %v2971_v49  ;;  %v2217_v23 = vsel %vm2191_vm5, %v2971_v49, 0.0  ;;  %v2275_v25 = vmul.f32 %v2218_v53, %v2218_v53 }
 0x1ab   : > { %v2242_v0 = vadd.f32 %v2241_v43, %v2217_v23  ;;  %v2274_v26 = vmul.f32 %v2217_v23, %v2217_v23  ;;  %v2298_v29 = vadd.f32 %v2297_v14, %v2273_v13 }
 0x1ad   : > { %v2243_v47 = vadd.f32 %v2242_v0, %v2218_v53  ;;  %v2299_v51 = vadd.f32 %v2298_v29, %v2274_v26 }
 0x1af   : > { %v2244_v57 = vrot.slane %v2243_v47, 4  ;;  %v2300_v60 = vadd.f32 %v2299_v51, %v2275_v25 }
 0x1b1   : > { %v2245_v50 = vadd.f32 %v2244_v57, %v2243_v47  ;;  %v2301_v4 = vrot.slane %v2300_v60, 4 }
 0x1b3   : > { %v2246_v31 = vrot.slane %v2245_v50, 2  ;;  %v2302_v28 = vadd.f32 %v2301_v4, %v2300_v60 }
 0x1b5   : > { %v2247_v61 = vadd.f32 %v2246_v31, %v2245_v50  ;;  %v2303_v16 = vrot.slane %v2302_v28, 2 }
 0x1b7   : > { %v2248_v46 = vrot.slane %v2247_v61, 1  ;;  %v2304_v5 = vadd.f32 %v2303_v16, %v2302_v28 }
 0x1b9   : > { %v2305_v22 = vrot.slane %v2304_v5, 1  ;;  %v2249_v40 = vadd.f32 %v2248_v46, %v2247_v61 }
 0x1bb   : > { %v2306_v1 = vadd.f32 %v2305_v22, %v2304_v5 }
 0x1bd   : > { %v2308_v36 = vsel %vm2307_vm6, %v2249_v40, %v2306_v1 }
 0x1be   : > { %2309 = vst [vmem:[%s265_s27] sm:$0x3] %v2308_v36 }
 0x1bf PF: > { %s17_s21 = sadd.s32 1, %s3090_s21  }
 0x1c0   : > { %p14_p5 = scmp.ge.s32.totalorder %s17_s21, 5  }
 0x1c2   :  { %16 = sbr.rel (!%p14_p5) target bundleno = 1 (0x1), region = 82 }

</bundles_post_ra>
